<compile_context>
chip_gen: v5e
topology: v5e:2x2
jax: 0.10.0
libtpu: 0.0.40
codegen_flags: <defaults>
</compile_context>

<pallas_src>
import functools

import jax
import jax.numpy as jnp
from jax import lax
from jax.experimental import pallas as pl
from jax.experimental.pallas import tpu as pltpu

# ---- model hyper-parameters (small but consistent with the module) ----------
H = 32                  # hidden_dim
NC = 8                  # num_codebooks (forward always pads/truncates to 8)
V = 256                 # codebook_size (module default is 1024; small for the demo)
EXPAND = 2.0
DI = int(H * EXPAND)    # d_inner = 64
D2 = 2 * DI             # merged in_proj width = 128 (lane-dense)
HH = H // 2             # output-head hidden = 16
N_LAYERS = 4
EPS = 1e-5              # nn.LayerNorm default eps

HALO = 8                # per-side halo rows (>= N_LAYERS conv reach, multiple of 8)
TT_MAX = 512            # time-tile rows (output tile = NC*TT*V*4B = 4 MiB at 512)
_VMEM_LIMIT = 32 * 1024 * 1024   # well above actual use, safe on v5e/v6e/v7x


def _layernorm(x, gamma, beta):
    mu = jnp.mean(x, axis=-1, keepdims=True)
    var = jnp.mean((x - mu) ** 2, axis=-1, keepdims=True)
    return (x - mu) * lax.rsqrt(var + EPS) * gamma + beta


# =============================================================================
# Single fused kernel: token one-hot gather (tables pre-LN'd & 1/NC-scaled)
# -> +context -> 4 Mamba blocks on a TT+2*HALO window -> fused output heads on
# the centre TT rows, written lane-dense as (1, NC, TT, V).
# =============================================================================
def _fused_kernel(tok_ref, tab_ref, ctx_ref,
                  mg_ref, mb_ref, win_ref, wcv_ref, wdt_ref, bdt_ref, wo_ref,
                  w1_ref, b1_ref, w2_ref, b2_ref,
                  o_ref, *, TT):
    TWIN = TT + 2 * HALO
    t = pl.program_id(1)
    start = pl.multiple_of(t * TT, 8)          # window start in padded-token coords

    # ---- token window + row-validity mask (padded rows carry -1) ------------
    tok_win = tok_ref[0, pl.ds(start, TWIN), :]                  # (TWIN, NC) int32
    mask = (tok_win[:, 0:1] >= 0).astype(jnp.float32)            # (TWIN, 1)

    # ---- embedding: in-kernel gather as one-hot matmuls ---------------------
    # per-codebook LayerNorm and the 1/NC mean are folded into the tables;
    # -1 (padding) tokens produce an all-zero one-hot row.
    col_iota = lax.broadcasted_iota(jnp.int32, (TWIN, V), 1)
    x = jnp.zeros((TWIN, H), jnp.float32)
    for c in range(NC):
        oh = (col_iota == tok_win[:, c:c + 1]).astype(jnp.float32)   # (TWIN, V)
        x = x + jnp.dot(oh, tab_ref[c], preferred_element_type=jnp.float32)
    x = x + ctx_ref[0]                          # precomputed context projection (1, H)

    lane_left = lax.broadcasted_iota(jnp.int32, (TWIN, D2), 1) < DI

    # ---- 4 fused OptimizedMambaBlocks (reverse=False) ------------------------
    for l in range(N_LAYERS):
        residual = x
        xn = _layernorm(x, mg_ref[l], mb_ref[l])                     # (TWIN, H)
        xp = jnp.dot(xn, win_ref[l], preferred_element_type=jnp.float32)  # (TWIN, 128)
        xp = xp * mask                           # zero rows outside the true sequence
        # depthwise conv1d(k=3, pad=1): neighbours via XLU roll; wrap rows fall
        # inside the halo and are never written; true-boundary zero padding is
        # provided by the masked rows.
        w = wcv_ref[l]                           # (3, 128); x2-half taps are [0,1,0]
        x_prev = pltpu.roll(xp, shift=1, axis=0)
        x_next = pltpu.roll(xp, shift=TWIN - 1, axis=0)
        conv = w[0:1, :] * x_prev + w[1:2, :] * xp + w[2:3, :] * x_next
        sig = 1.0 / (1.0 + jnp.exp(-conv))       # one sigmoid covers both halves
        act = jnp.where(lane_left, conv * sig, sig)   # [SiLU(conv(x1)) | sigmoid(x2)]
        # dt_proj zero-padded to K=128 so no lane slicing is needed before the matmul
        dt = jnp.dot(act, wdt_ref[l], preferred_element_type=jnp.float32) + bdt_ref[l]
        gate = 1.0 - 1.0 / (2.0 + jnp.exp(dt))   # == sigmoid(softplus(dt)), exact
        x_gated = act[:, :DI] * act[:, DI:] * gate                   # (TWIN, DI)
        out = jnp.dot(x_gated, wo_ref[l], preferred_element_type=jnp.float32)
        x = out + residual                       # layer_scale folded into wo

    # ---- fused output heads on the centre TT rows (halo dropped) ------------
    xc = x[HALO:HALO + TT, :]
    mu = jnp.mean(xc, axis=-1, keepdims=True)
    var = jnp.mean((xc - mu) ** 2, axis=-1, keepdims=True)
    x_hat = (xc - mu) * lax.rsqrt(var + EPS)     # head-LN affine folded into W1/b1
    h = jnp.dot(x_hat, w1_ref[...], preferred_element_type=jnp.float32) + b1_ref[...]
    # TODO(synk): torch nn.GELU default is the exact erf form; the tanh form keeps
    # the transcendental on the EUP (max abs diff ~1e-3 in f32).
    h = 0.5 * h * (1.0 + jnp.tanh(0.7978845608028654 * (h + 0.044715 * h * h * h)))
    for c in range(NC):
        hc = h[:, c * HH:(c + 1) * HH]
        o_ref[0, c] = jnp.dot(hc, w2_ref[c], preferred_element_type=jnp.float32) + b2_ref[c]


# =============================================================================
# Offline parameter folding (done once, outside the kernel).
# =============================================================================
def fold_params(params):
    mp = params["mamba"]
    hp = params["heads"]

    # embedding LayerNorm + 1/NC mean folded into the tables (exact).
    tab = params["embed_tables"]                                   # (NC, V, H)
    mu = jnp.mean(tab, axis=-1, keepdims=True)
    var = jnp.mean((tab - mu) ** 2, axis=-1, keepdims=True)
    g = params["embed_ln_g"][:, None, :]
    b = params["embed_ln_b"][:, None, :]
    tab_ln = ((tab - mu) * lax.rsqrt(var + EPS) * g + b) * (1.0 / NC)

    # conv taps padded to 128 lanes: identity taps [0,1,0] on the x2 half.
    ident = jnp.tile(jnp.asarray([[0.0], [1.0], [0.0]], jnp.float32)[None],
                     (N_LAYERS, 1, DI))
    wcv_pad = jnp.concatenate([mp["w_conv"], ident], axis=-1)      # (L, 3, 128)

    # dt_proj padded with zero rows for the sigmoid(x2) half of the activation.
    wdt_pad = jnp.concatenate(
        [mp["w_dt"], jnp.zeros((N_LAYERS, DI, DI), jnp.float32)], axis=1)   # (L, 128, 64)

    # layer_scale folded into out_proj.
    wo_scaled = mp["w_out"] * mp["layer_scale"]                    # (L, DI, H)

    # head LayerNorm affine folded into the first head Linear.
    hg = hp["ln_g"][:, 0, :]
    hb = hp["ln_b"][:, 0, :]
    w1f = hp["w1"] * hg[:, :, None]                                # (NC, H, HH)
    b1f = hp["b1"][:, 0, :] + jnp.einsum("ch,chk->ck", hb, hp["w1"])
    w1_all = jnp.transpose(w1f, (1, 0, 2)).reshape(H, NC * HH)     # (32, 128)
    b1_all = b1f.reshape(1, NC * HH)                               # (1, 128)

    return {
        "tables": tab_ln,
        "ctx_w": params["ctx_w"], "ctx_b": params["ctx_b"],
        "ln_g": mp["ln_g"], "ln_b": mp["ln_b"],
        "w_in": mp["w_in"], "w_conv": wcv_pad, "w_dt": wdt_pad, "b_dt": mp["b_dt"],
        "w_out": wo_scaled,
        "w1": w1_all, "b1": b1_all, "w2": hp["w2"], "b2": hp["b2"],
    }


def _round_up(n, m):
    return ((n + m - 1) // m) * m


def _pick_tt(T):
    return TT_MAX if T >= TT_MAX else _round_up(T, 8)


# =============================================================================
# Full forward pass (wrapper).
# =============================================================================
def forward(fp, audio_tokens, text_context):
    B, C, T = audio_tokens.shape
    if C < NC:
        pad = jnp.zeros((B, NC - C, T), dtype=audio_tokens.dtype)  # token id 0, like torch
        audio_tokens = jnp.concatenate([audio_tokens, pad], axis=1)
    elif C > NC:
        audio_tokens = audio_tokens[:, :NC, :]

    TT = _pick_tt(T)
    NT = -(-T // TT)
    T_out = NT * TT
    T_tok = T_out + 2 * HALO

    # (B, T_tok, NC) token layout; padded rows are -1 (gives a zero one-hot row
    # AND drives the in-kernel validity mask).
    tok = jnp.transpose(audio_tokens.astype(jnp.int32), (0, 2, 1))
    tok = jnp.pad(tok, ((0, 0), (HALO, T_tok - HALO - T), (0, 0)), constant_values=-1)

    # text-context projection precomputed in plain JAX (tiny M=1 matmul per row).
    ctx = (text_context.astype(jnp.float32) @ fp["ctx_w"] + fp["ctx_b"]).reshape(B, 1, H)

    kernel = functools.partial(_fused_kernel, TT=TT)

    def wspec(a):
        nd = a.ndim
        return pl.BlockSpec(a.shape, lambda b, t, _nd=nd: (0,) * _nd)

    out = pl.pallas_call(
        kernel,
        out_shape=jax.ShapeDtypeStruct((B, NC, T_out, V), jnp.float32),
        grid=(B, NT),
        in_specs=[
            pl.BlockSpec((1, T_tok, NC), lambda b, t: (b, 0, 0)),
            wspec(fp["tables"]),
            pl.BlockSpec((1, 1, H), lambda b, t: (b, 0, 0)),
            wspec(fp["ln_g"]), wspec(fp["ln_b"]), wspec(fp["w_in"]),
            wspec(fp["w_conv"]), wspec(fp["w_dt"]), wspec(fp["b_dt"]), wspec(fp["w_out"]),
            wspec(fp["w1"]), wspec(fp["b1"]), wspec(fp["w2"]), wspec(fp["b2"]),
        ],
        out_specs=pl.BlockSpec((1, NC, TT, V), lambda b, t: (b, 0, t, 0)),
        compiler_params=pltpu.CompilerParams(
            dimension_semantics=("parallel", "parallel"),
            vmem_limit_bytes=_VMEM_LIMIT),
    )(tok, fp["tables"], ctx,
      fp["ln_g"], fp["ln_b"], fp["w_in"], fp["w_conv"], fp["w_dt"], fp["b_dt"], fp["w_out"],
      fp["w1"], fp["b1"], fp["w2"], fp["b2"])

    return out[:, :, :T, :] if T_out != T else out


# =============================================================================
# Deterministic synthetic parameters (shapes per the module's __init__).
# Linear weights are stored pre-transposed as (in, out); per-layer Mamba weights
# are stacked on a leading N_LAYERS axis.
# =============================================================================
def init_params(key):
    ks = iter(jax.random.split(key, 16))
    nrm = lambda shape, s: jax.random.normal(next(ks), shape, jnp.float32) * s

    return {
        "embed_tables": nrm((NC, V, H), 0.02),
        "embed_ln_g": jnp.ones((NC, H), jnp.float32),
        "embed_ln_b": jnp.zeros((NC, H), jnp.float32),
        "ctx_w": nrm((H, H), 0.05),
        "ctx_b": jnp.zeros((1, H), jnp.float32),
        "mamba": {
            "ln_g": jnp.ones((N_LAYERS, 1, H), jnp.float32),
            "ln_b": jnp.zeros((N_LAYERS, 1, H), jnp.float32),
            "w_in": nrm((N_LAYERS, H, D2), 0.05),      # [:, :, :DI] -> x1, [:, :, DI:] -> x2
            "w_conv": nrm((N_LAYERS, 3, DI), 0.2),     # depthwise taps (k, channel), bias-free
            "w_dt": nrm((N_LAYERS, DI, DI), 0.05),
            "b_dt": jnp.zeros((N_LAYERS, 1, DI), jnp.float32),
            "w_out": nrm((N_LAYERS, DI, H), 0.05),
            "layer_scale": jnp.full((N_LAYERS, 1, H), 0.1, jnp.float32),
        },
        "heads": {
            "ln_g": jnp.ones((NC, 1, H), jnp.float32),
            "ln_b": jnp.zeros((NC, 1, H), jnp.float32),
            "w1": nrm((NC, H, HH), 0.05),
            "b1": jnp.zeros((NC, 1, HH), jnp.float32),
            "w2": nrm((NC, HH, V), 0.05),
            "b2": jnp.zeros((NC, 1, V), jnp.float32),
        },
    }


if __name__ == "__main__":
    key = jax.random.PRNGKey(0)
    pkey, tkey, ckey = jax.random.split(key, 3)

    params = init_params(pkey)
    fp = fold_params(params)          # offline folding (LN into tables, scales into weights)

    B, C, T = 2, 4, 8                 # C < 8 exercises the zero-padding branch
    audio_tokens = jax.random.randint(tkey, (B, C, T), 0, V, dtype=jnp.int32)
    text_context = jax.random.normal(ckey, (B, H), jnp.float32)

    out = forward(fp, audio_tokens, text_context)
    out = jax.block_until_ready(out)

    assert out.shape == (B, NC, T, V), out.shape
    assert out.dtype == jnp.float32
    assert bool(jnp.isfinite(out).all())
    print("KERNEL_OK")
</pallas_src>

<mosaic_0001>
module attributes {stable_mosaic.version = 11 : i64} {
  func.func @_fused_kernel(%arg0: i32, %arg1: i32, %arg2: memref<1x24x8xi32, #tpu.memory_space<vmem>>, %arg3: memref<8x256x32xf32, #tpu.memory_space<vmem>>, %arg4: memref<1x1x32xf32, #tpu.memory_space<vmem>>, %arg5: memref<4x1x32xf32, #tpu.memory_space<vmem>>, %arg6: memref<4x1x32xf32, #tpu.memory_space<vmem>>, %arg7: memref<4x32x128xf32, #tpu.memory_space<vmem>>, %arg8: memref<4x3x128xf32, #tpu.memory_space<vmem>>, %arg9: memref<4x128x64xf32, #tpu.memory_space<vmem>>, %arg10: memref<4x1x64xf32, #tpu.memory_space<vmem>>, %arg11: memref<4x64x32xf32, #tpu.memory_space<vmem>>, %arg12: memref<32x128xf32, #tpu.memory_space<vmem>>, %arg13: memref<1x128xf32, #tpu.memory_space<vmem>>, %arg14: memref<8x16x256xf32, #tpu.memory_space<vmem>>, %arg15: memref<8x1x256xf32, #tpu.memory_space<vmem>>, %arg16: memref<1x8x8x256xf32, #tpu.memory_space<vmem>>) attributes {dimension_semantics = [#tpu.dimension_semantics<parallel>, #tpu.dimension_semantics<parallel>], iteration_bounds = array<i64: 2, 1>, scalar_prefetch = 0 : i64, scratch_operands = 0 : i64, tpu.core_type = #tpu.core_type<tc>, window_params = [{transform_indices = @transform_0, window_bounds = array<i64: 1, 24, 8>}, {pipeline_mode = #tpu.pipeline_mode<synchronous>, transform_indices = @transform_1, window_bounds = array<i64: 8, 256, 32>}, {transform_indices = @transform_2, window_bounds = array<i64: 1, 1, 32>}, {pipeline_mode = #tpu.pipeline_mode<synchronous>, transform_indices = @transform_3, window_bounds = array<i64: 4, 1, 32>}, {pipeline_mode = #tpu.pipeline_mode<synchronous>, transform_indices = @transform_4, window_bounds = array<i64: 4, 1, 32>}, {pipeline_mode = #tpu.pipeline_mode<synchronous>, transform_indices = @transform_5, window_bounds = array<i64: 4, 32, 128>}, {pipeline_mode = #tpu.pipeline_mode<synchronous>, transform_indices = @transform_6, window_bounds = array<i64: 4, 3, 128>}, {pipeline_mode = #tpu.pipeline_mode<synchronous>, transform_indices = @transform_7, window_bounds = array<i64: 4, 128, 64>}, {pipeline_mode = #tpu.pipeline_mode<synchronous>, transform_indices = @transform_8, window_bounds = array<i64: 4, 1, 64>}, {pipeline_mode = #tpu.pipeline_mode<synchronous>, transform_indices = @transform_9, window_bounds = array<i64: 4, 64, 32>}, {pipeline_mode = #tpu.pipeline_mode<synchronous>, transform_indices = @transform_10, window_bounds = array<i64: 32, 128>}, {pipeline_mode = #tpu.pipeline_mode<synchronous>, transform_indices = @transform_11, window_bounds = array<i64: 1, 128>}, {pipeline_mode = #tpu.pipeline_mode<synchronous>, transform_indices = @transform_12, window_bounds = array<i64: 8, 16, 256>}, {pipeline_mode = #tpu.pipeline_mode<synchronous>, transform_indices = @transform_13, window_bounds = array<i64: 8, 1, 256>}, {transform_indices = @transform_14, window_bounds = array<i64: 1, 8, 8, 256>}]} {
    %c8_i32 = arith.constant 8 : i32
    %0 = arith.muli %arg1, %c8_i32 : i32
    %1 = tpu.assume_multiple %0, 8 : i32
    %c0 = arith.constant 0 : index
    %2 = arith.index_cast %1 : i32 to index
    %c0_0 = arith.constant 0 : index
    %3 = vector.load %arg2[%c0, %2, %c0_0] : memref<1x24x8xi32, #tpu.memory_space<vmem>>, vector<1x24x8xi32>
    %4 = vector.shape_cast %3 : vector<1x24x8xi32> to vector<24x8xi32>
    %5 = vector.extract_strided_slice %4 {offsets = [0, 0], sizes = [24, 1], strides = [1, 1]} : vector<24x8xi32> to vector<24x1xi32>
    %c0_i32 = arith.constant 0 : i32
    %6 = vector.broadcast %c0_i32 : i32 to vector<24x1xi32>
    %7 = arith.cmpi sge, %5, %6 : vector<24x1xi32>
    %8 = arith.extui %7 : vector<24x1xi1> to vector<24x1xi32>
    %9 = arith.sitofp %8 : vector<24x1xi32> to vector<24x1xf32>
    %10 = tpu.iota {dimensions = array<i32: 1>} : vector<24x256xi32>
    %cst = arith.constant 0.000000e+00 : f32
    %11 = vector.broadcast %cst : f32 to vector<24x32xf32>
    %12 = vector.extract_strided_slice %4 {offsets = [0, 0], sizes = [24, 1], strides = [1, 1]} : vector<24x8xi32> to vector<24x1xi32>
    %13 = vector.broadcast %12 : vector<24x1xi32> to vector<24x256xi32>
    %14 = arith.cmpi eq, %10, %13 : vector<24x256xi32>
    %15 = arith.extui %14 : vector<24x256xi1> to vector<24x256xi32>
    %16 = arith.sitofp %15 : vector<24x256xi32> to vector<24x256xf32>
    %c0_1 = arith.constant 0 : index
    %c0_2 = arith.constant 0 : index
    %c0_3 = arith.constant 0 : index
    %17 = vector.load %arg3[%c0_1, %c0_2, %c0_3] : memref<8x256x32xf32, #tpu.memory_space<vmem>>, vector<1x256x32xf32>
    %18 = vector.shape_cast %17 : vector<1x256x32xf32> to vector<256x32xf32>
    %cst_4 = arith.constant dense<0.000000e+00> : vector<24x32xf32>
    %19 = tpu.matmul %16, %18, %cst_4 {dimension_numbers = #tpu.dot_dimension_numbers<[1], [0], [0], [1], [0, 0, 1, 1], [], []>} : vector<24x256xf32>, vector<256x32xf32>, vector<24x32xf32> -> vector<24x32xf32>
    %20 = arith.addf %11, %19 : vector<24x32xf32>
    %21 = vector.extract_strided_slice %4 {offsets = [0, 1], sizes = [24, 1], strides = [1, 1]} : vector<24x8xi32> to vector<24x1xi32>
    %22 = vector.broadcast %21 : vector<24x1xi32> to vector<24x256xi32>
    %23 = arith.cmpi eq, %10, %22 : vector<24x256xi32>
    %24 = arith.extui %23 : vector<24x256xi1> to vector<24x256xi32>
    %25 = arith.sitofp %24 : vector<24x256xi32> to vector<24x256xf32>
    %c1 = arith.constant 1 : index
    %c0_5 = arith.constant 0 : index
    %c0_6 = arith.constant 0 : index
    %26 = vector.load %arg3[%c1, %c0_5, %c0_6] : memref<8x256x32xf32, #tpu.memory_space<vmem>>, vector<1x256x32xf32>
    %27 = vector.shape_cast %26 : vector<1x256x32xf32> to vector<256x32xf32>
    %cst_7 = arith.constant dense<0.000000e+00> : vector<24x32xf32>
    %28 = tpu.matmul %25, %27, %cst_7 {dimension_numbers = #tpu.dot_dimension_numbers<[1], [0], [0], [1], [0, 0, 1, 1], [], []>} : vector<24x256xf32>, vector<256x32xf32>, vector<24x32xf32> -> vector<24x32xf32>
    %29 = arith.addf %20, %28 : vector<24x32xf32>
    %30 = vector.extract_strided_slice %4 {offsets = [0, 2], sizes = [24, 1], strides = [1, 1]} : vector<24x8xi32> to vector<24x1xi32>
    %31 = vector.broadcast %30 : vector<24x1xi32> to vector<24x256xi32>
    %32 = arith.cmpi eq, %10, %31 : vector<24x256xi32>
    %33 = arith.extui %32 : vector<24x256xi1> to vector<24x256xi32>
    %34 = arith.sitofp %33 : vector<24x256xi32> to vector<24x256xf32>
    %c2 = arith.constant 2 : index
    %c0_8 = arith.constant 0 : index
    %c0_9 = arith.constant 0 : index
    %35 = vector.load %arg3[%c2, %c0_8, %c0_9] : memref<8x256x32xf32, #tpu.memory_space<vmem>>, vector<1x256x32xf32>
    %36 = vector.shape_cast %35 : vector<1x256x32xf32> to vector<256x32xf32>
    %cst_10 = arith.constant dense<0.000000e+00> : vector<24x32xf32>
    %37 = tpu.matmul %34, %36, %cst_10 {dimension_numbers = #tpu.dot_dimension_numbers<[1], [0], [0], [1], [0, 0, 1, 1], [], []>} : vector<24x256xf32>, vector<256x32xf32>, vector<24x32xf32> -> vector<24x32xf32>
    %38 = arith.addf %29, %37 : vector<24x32xf32>
    %39 = vector.extract_strided_slice %4 {offsets = [0, 3], sizes = [24, 1], strides = [1, 1]} : vector<24x8xi32> to vector<24x1xi32>
    %40 = vector.broadcast %39 : vector<24x1xi32> to vector<24x256xi32>
    %41 = arith.cmpi eq, %10, %40 : vector<24x256xi32>
    %42 = arith.extui %41 : vector<24x256xi1> to vector<24x256xi32>
    %43 = arith.sitofp %42 : vector<24x256xi32> to vector<24x256xf32>
    %c3 = arith.constant 3 : index
    %c0_11 = arith.constant 0 : index
    %c0_12 = arith.constant 0 : index
    %44 = vector.load %arg3[%c3, %c0_11, %c0_12] : memref<8x256x32xf32, #tpu.memory_space<vmem>>, vector<1x256x32xf32>
    %45 = vector.shape_cast %44 : vector<1x256x32xf32> to vector<256x32xf32>
    %cst_13 = arith.constant dense<0.000000e+00> : vector<24x32xf32>
    %46 = tpu.matmul %43, %45, %cst_13 {dimension_numbers = #tpu.dot_dimension_numbers<[1], [0], [0], [1], [0, 0, 1, 1], [], []>} : vector<24x256xf32>, vector<256x32xf32>, vector<24x32xf32> -> vector<24x32xf32>
    %47 = arith.addf %38, %46 : vector<24x32xf32>
    %48 = vector.extract_strided_slice %4 {offsets = [0, 4], sizes = [24, 1], strides = [1, 1]} : vector<24x8xi32> to vector<24x1xi32>
    %49 = vector.broadcast %48 : vector<24x1xi32> to vector<24x256xi32>
    %50 = arith.cmpi eq, %10, %49 : vector<24x256xi32>
    %51 = arith.extui %50 : vector<24x256xi1> to vector<24x256xi32>
    %52 = arith.sitofp %51 : vector<24x256xi32> to vector<24x256xf32>
    %c4 = arith.constant 4 : index
    %c0_14 = arith.constant 0 : index
    %c0_15 = arith.constant 0 : index
    %53 = vector.load %arg3[%c4, %c0_14, %c0_15] : memref<8x256x32xf32, #tpu.memory_space<vmem>>, vector<1x256x32xf32>
    %54 = vector.shape_cast %53 : vector<1x256x32xf32> to vector<256x32xf32>
    %cst_16 = arith.constant dense<0.000000e+00> : vector<24x32xf32>
    %55 = tpu.matmul %52, %54, %cst_16 {dimension_numbers = #tpu.dot_dimension_numbers<[1], [0], [0], [1], [0, 0, 1, 1], [], []>} : vector<24x256xf32>, vector<256x32xf32>, vector<24x32xf32> -> vector<24x32xf32>
    %56 = arith.addf %47, %55 : vector<24x32xf32>
    %57 = vector.extract_strided_slice %4 {offsets = [0, 5], sizes = [24, 1], strides = [1, 1]} : vector<24x8xi32> to vector<24x1xi32>
    %58 = vector.broadcast %57 : vector<24x1xi32> to vector<24x256xi32>
    %59 = arith.cmpi eq, %10, %58 : vector<24x256xi32>
    %60 = arith.extui %59 : vector<24x256xi1> to vector<24x256xi32>
    %61 = arith.sitofp %60 : vector<24x256xi32> to vector<24x256xf32>
    %c5 = arith.constant 5 : index
    %c0_17 = arith.constant 0 : index
    %c0_18 = arith.constant 0 : index
    %62 = vector.load %arg3[%c5, %c0_17, %c0_18] : memref<8x256x32xf32, #tpu.memory_space<vmem>>, vector<1x256x32xf32>
    %63 = vector.shape_cast %62 : vector<1x256x32xf32> to vector<256x32xf32>
    %cst_19 = arith.constant dense<0.000000e+00> : vector<24x32xf32>
    %64 = tpu.matmul %61, %63, %cst_19 {dimension_numbers = #tpu.dot_dimension_numbers<[1], [0], [0], [1], [0, 0, 1, 1], [], []>} : vector<24x256xf32>, vector<256x32xf32>, vector<24x32xf32> -> vector<24x32xf32>
    %65 = arith.addf %56, %64 : vector<24x32xf32>
    %66 = vector.extract_strided_slice %4 {offsets = [0, 6], sizes = [24, 1], strides = [1, 1]} : vector<24x8xi32> to vector<24x1xi32>
    %67 = vector.broadcast %66 : vector<24x1xi32> to vector<24x256xi32>
    %68 = arith.cmpi eq, %10, %67 : vector<24x256xi32>
    %69 = arith.extui %68 : vector<24x256xi1> to vector<24x256xi32>
    %70 = arith.sitofp %69 : vector<24x256xi32> to vector<24x256xf32>
    %c6 = arith.constant 6 : index
    %c0_20 = arith.constant 0 : index
    %c0_21 = arith.constant 0 : index
    %71 = vector.load %arg3[%c6, %c0_20, %c0_21] : memref<8x256x32xf32, #tpu.memory_space<vmem>>, vector<1x256x32xf32>
    %72 = vector.shape_cast %71 : vector<1x256x32xf32> to vector<256x32xf32>
    %cst_22 = arith.constant dense<0.000000e+00> : vector<24x32xf32>
    %73 = tpu.matmul %70, %72, %cst_22 {dimension_numbers = #tpu.dot_dimension_numbers<[1], [0], [0], [1], [0, 0, 1, 1], [], []>} : vector<24x256xf32>, vector<256x32xf32>, vector<24x32xf32> -> vector<24x32xf32>
    %74 = arith.addf %65, %73 : vector<24x32xf32>
    %75 = vector.extract_strided_slice %4 {offsets = [0, 7], sizes = [24, 1], strides = [1, 1]} : vector<24x8xi32> to vector<24x1xi32>
    %76 = vector.broadcast %75 : vector<24x1xi32> to vector<24x256xi32>
    %77 = arith.cmpi eq, %10, %76 : vector<24x256xi32>
    %78 = arith.extui %77 : vector<24x256xi1> to vector<24x256xi32>
    %79 = arith.sitofp %78 : vector<24x256xi32> to vector<24x256xf32>
    %c7 = arith.constant 7 : index
    %c0_23 = arith.constant 0 : index
    %c0_24 = arith.constant 0 : index
    %80 = vector.load %arg3[%c7, %c0_23, %c0_24] : memref<8x256x32xf32, #tpu.memory_space<vmem>>, vector<1x256x32xf32>
    %81 = vector.shape_cast %80 : vector<1x256x32xf32> to vector<256x32xf32>
    %cst_25 = arith.constant dense<0.000000e+00> : vector<24x32xf32>
    %82 = tpu.matmul %79, %81, %cst_25 {dimension_numbers = #tpu.dot_dimension_numbers<[1], [0], [0], [1], [0, 0, 1, 1], [], []>} : vector<24x256xf32>, vector<256x32xf32>, vector<24x32xf32> -> vector<24x32xf32>
    %83 = arith.addf %74, %82 : vector<24x32xf32>
    %c0_26 = arith.constant 0 : index
    %c0_27 = arith.constant 0 : index
    %c0_28 = arith.constant 0 : index
    %84 = vector.load %arg4[%c0_26, %c0_27, %c0_28] : memref<1x1x32xf32, #tpu.memory_space<vmem>>, vector<1x1x32xf32>
    %85 = vector.shape_cast %84 : vector<1x1x32xf32> to vector<1x32xf32>
    %86 = vector.broadcast %85 : vector<1x32xf32> to vector<24x32xf32>
    %87 = arith.addf %83, %86 : vector<24x32xf32>
    %88 = tpu.iota {dimensions = array<i32: 1>} : vector<24x128xi32>
    %c64_i32 = arith.constant 64 : i32
    %89 = vector.broadcast %c64_i32 : i32 to vector<24x128xi32>
    %90 = arith.cmpi slt, %88, %89 : vector<24x128xi32>
    %c0_29 = arith.constant 0 : index
    %c0_30 = arith.constant 0 : index
    %c0_31 = arith.constant 0 : index
    %91 = vector.load %arg5[%c0_29, %c0_30, %c0_31] : memref<4x1x32xf32, #tpu.memory_space<vmem>>, vector<1x1x32xf32>
    %92 = vector.shape_cast %91 : vector<1x1x32xf32> to vector<1x32xf32>
    %c0_32 = arith.constant 0 : index
    %c0_33 = arith.constant 0 : index
    %c0_34 = arith.constant 0 : index
    %93 = vector.load %arg6[%c0_32, %c0_33, %c0_34] : memref<4x1x32xf32, #tpu.memory_space<vmem>>, vector<1x1x32xf32>
    %94 = vector.shape_cast %93 : vector<1x1x32xf32> to vector<1x32xf32>
    %cst_35 = arith.constant dense<0.000000e+00> : vector<24xf32>
    %95 = vector.multi_reduction <add>, %87, %cst_35 [1] : vector<24x32xf32> to vector<24xf32>
    %96 = vector.shape_cast %95 : vector<24xf32> to vector<24x1xf32>
    %cst_36 = arith.constant 3.200000e+01 : f32
    %97 = vector.broadcast %cst_36 : f32 to vector<24x1xf32>
    %98 = arith.divf %96, %97 : vector<24x1xf32>
    %99 = vector.broadcast %98 : vector<24x1xf32> to vector<24x32xf32>
    %100 = arith.subf %87, %99 : vector<24x32xf32>
    %101 = arith.mulf %100, %100 : vector<24x32xf32>
    %cst_37 = arith.constant dense<0.000000e+00> : vector<24xf32>
    %102 = vector.multi_reduction <add>, %101, %cst_37 [1] : vector<24x32xf32> to vector<24xf32>
    %103 = vector.shape_cast %102 : vector<24xf32> to vector<24x1xf32>
    %cst_38 = arith.constant 3.200000e+01 : f32
    %104 = vector.broadcast %cst_38 : f32 to vector<24x1xf32>
    %105 = arith.divf %103, %104 : vector<24x1xf32>
    %106 = vector.broadcast %98 : vector<24x1xf32> to vector<24x32xf32>
    %107 = arith.subf %87, %106 : vector<24x32xf32>
    %cst_39 = arith.constant 9.99999974E-6 : f32
    %108 = vector.broadcast %cst_39 : f32 to vector<24x1xf32>
    %109 = arith.addf %105, %108 : vector<24x1xf32>
    %110 = math.rsqrt %109 : vector<24x1xf32>
    %111 = vector.broadcast %110 : vector<24x1xf32> to vector<24x32xf32>
    %112 = arith.mulf %107, %111 : vector<24x32xf32>
    %113 = vector.broadcast %92 : vector<1x32xf32> to vector<24x32xf32>
    %114 = arith.mulf %112, %113 : vector<24x32xf32>
    %115 = vector.broadcast %94 : vector<1x32xf32> to vector<24x32xf32>
    %116 = arith.addf %114, %115 : vector<24x32xf32>
    %c0_40 = arith.constant 0 : index
    %c0_41 = arith.constant 0 : index
    %c0_42 = arith.constant 0 : index
    %117 = vector.load %arg7[%c0_40, %c0_41, %c0_42] : memref<4x32x128xf32, #tpu.memory_space<vmem>>, vector<1x32x128xf32>
    %118 = vector.shape_cast %117 : vector<1x32x128xf32> to vector<32x128xf32>
    %cst_43 = arith.constant dense<0.000000e+00> : vector<24x128xf32>
    %119 = tpu.matmul %116, %118, %cst_43 {dimension_numbers = #tpu.dot_dimension_numbers<[1], [0], [0], [1], [0, 0, 1, 1], [], []>} : vector<24x32xf32>, vector<32x128xf32>, vector<24x128xf32> -> vector<24x128xf32>
    %120 = vector.broadcast %9 : vector<24x1xf32> to vector<24x128xf32>
    %121 = arith.mulf %119, %120 : vector<24x128xf32>
    %c0_44 = arith.constant 0 : index
    %c0_45 = arith.constant 0 : index
    %c0_46 = arith.constant 0 : index
    %122 = vector.load %arg8[%c0_44, %c0_45, %c0_46] : memref<4x3x128xf32, #tpu.memory_space<vmem>>, vector<1x3x128xf32>
    %123 = vector.shape_cast %122 : vector<1x3x128xf32> to vector<3x128xf32>
    %c1_i32 = arith.constant 1 : i32
    %124 = tpu.dynamic_rotate %121 by %c1_i32 dim 0 : vector<24x128xf32>, i32 -> vector<24x128xf32>
    %c23_i32 = arith.constant 23 : i32
    %125 = tpu.dynamic_rotate %121 by %c23_i32 dim 0 : vector<24x128xf32>, i32 -> vector<24x128xf32>
    %126 = vector.extract_strided_slice %123 {offsets = [0, 0], sizes = [1, 128], strides = [1, 1]} : vector<3x128xf32> to vector<1x128xf32>
    %127 = vector.broadcast %126 : vector<1x128xf32> to vector<24x128xf32>
    %128 = arith.mulf %127, %124 : vector<24x128xf32>
    %129 = vector.extract_strided_slice %123 {offsets = [1, 0], sizes = [1, 128], strides = [1, 1]} : vector<3x128xf32> to vector<1x128xf32>
    %130 = vector.broadcast %129 : vector<1x128xf32> to vector<24x128xf32>
    %131 = arith.mulf %130, %121 : vector<24x128xf32>
    %132 = arith.addf %128, %131 : vector<24x128xf32>
    %133 = vector.extract_strided_slice %123 {offsets = [2, 0], sizes = [1, 128], strides = [1, 1]} : vector<3x128xf32> to vector<1x128xf32>
    %134 = vector.broadcast %133 : vector<1x128xf32> to vector<24x128xf32>
    %135 = arith.mulf %134, %125 : vector<24x128xf32>
    %136 = arith.addf %132, %135 : vector<24x128xf32>
    %cst_47 = arith.constant 0.000000e+00 : f32
    %137 = vector.broadcast %cst_47 : f32 to vector<24x128xf32>
    %138 = arith.subf %137, %136 : vector<24x128xf32>
    %139 = math.exp %138 : vector<24x128xf32>
    %cst_48 = arith.constant 1.000000e+00 : f32
    %140 = vector.broadcast %cst_48 : f32 to vector<24x128xf32>
    %141 = arith.addf %140, %139 : vector<24x128xf32>
    %cst_49 = arith.constant 1.000000e+00 : f32
    %142 = vector.broadcast %cst_49 : f32 to vector<24x128xf32>
    %143 = arith.divf %142, %141 : vector<24x128xf32>
    %144 = arith.mulf %136, %143 : vector<24x128xf32>
    %145 = arith.select %90, %144, %143 : vector<24x128xi1>, vector<24x128xf32>
    %c0_50 = arith.constant 0 : index
    %c0_51 = arith.constant 0 : index
    %c0_52 = arith.constant 0 : index
    %146 = vector.load %arg9[%c0_50, %c0_51, %c0_52] : memref<4x128x64xf32, #tpu.memory_space<vmem>>, vector<1x128x64xf32>
    %147 = vector.shape_cast %146 : vector<1x128x64xf32> to vector<128x64xf32>
    %cst_53 = arith.constant dense<0.000000e+00> : vector<24x64xf32>
    %148 = tpu.matmul %145, %147, %cst_53 {dimension_numbers = #tpu.dot_dimension_numbers<[1], [0], [0], [1], [0, 0, 1, 1], [], []>} : vector<24x128xf32>, vector<128x64xf32>, vector<24x64xf32> -> vector<24x64xf32>
    %c0_54 = arith.constant 0 : index
    %c0_55 = arith.constant 0 : index
    %c0_56 = arith.constant 0 : index
    %149 = vector.load %arg10[%c0_54, %c0_55, %c0_56] : memref<4x1x64xf32, #tpu.memory_space<vmem>>, vector<1x1x64xf32>
    %150 = vector.shape_cast %149 : vector<1x1x64xf32> to vector<1x64xf32>
    %151 = vector.broadcast %150 : vector<1x64xf32> to vector<24x64xf32>
    %152 = arith.addf %148, %151 : vector<24x64xf32>
    %153 = math.exp %152 : vector<24x64xf32>
    %cst_57 = arith.constant 2.000000e+00 : f32
    %154 = vector.broadcast %cst_57 : f32 to vector<24x64xf32>
    %155 = arith.addf %154, %153 : vector<24x64xf32>
    %cst_58 = arith.constant 1.000000e+00 : f32
    %156 = vector.broadcast %cst_58 : f32 to vector<24x64xf32>
    %157 = arith.divf %156, %155 : vector<24x64xf32>
    %cst_59 = arith.constant 1.000000e+00 : f32
    %158 = vector.broadcast %cst_59 : f32 to vector<24x64xf32>
    %159 = arith.subf %158, %157 : vector<24x64xf32>
    %160 = vector.extract_strided_slice %145 {offsets = [0, 0], sizes = [24, 64], strides = [1, 1]} : vector<24x128xf32> to vector<24x64xf32>
    %161 = vector.extract_strided_slice %145 {offsets = [0, 64], sizes = [24, 64], strides = [1, 1]} : vector<24x128xf32> to vector<24x64xf32>
    %162 = arith.mulf %160, %161 : vector<24x64xf32>
    %163 = arith.mulf %162, %159 : vector<24x64xf32>
    %c0_60 = arith.constant 0 : index
    %c0_61 = arith.constant 0 : index
    %c0_62 = arith.constant 0 : index
    %164 = vector.load %arg11[%c0_60, %c0_61, %c0_62] : memref<4x64x32xf32, #tpu.memory_space<vmem>>, vector<1x64x32xf32>
    %165 = vector.shape_cast %164 : vector<1x64x32xf32> to vector<64x32xf32>
    %cst_63 = arith.constant dense<0.000000e+00> : vector<24x32xf32>
    %166 = tpu.matmul %163, %165, %cst_63 {dimension_numbers = #tpu.dot_dimension_numbers<[1], [0], [0], [1], [0, 0, 1, 1], [], []>} : vector<24x64xf32>, vector<64x32xf32>, vector<24x32xf32> -> vector<24x32xf32>
    %167 = arith.addf %166, %87 : vector<24x32xf32>
    %c1_64 = arith.constant 1 : index
    %c0_65 = arith.constant 0 : index
    %c0_66 = arith.constant 0 : index
    %168 = vector.load %arg5[%c1_64, %c0_65, %c0_66] : memref<4x1x32xf32, #tpu.memory_space<vmem>>, vector<1x1x32xf32>
    %169 = vector.shape_cast %168 : vector<1x1x32xf32> to vector<1x32xf32>
    %c1_67 = arith.constant 1 : index
    %c0_68 = arith.constant 0 : index
    %c0_69 = arith.constant 0 : index
    %170 = vector.load %arg6[%c1_67, %c0_68, %c0_69] : memref<4x1x32xf32, #tpu.memory_space<vmem>>, vector<1x1x32xf32>
    %171 = vector.shape_cast %170 : vector<1x1x32xf32> to vector<1x32xf32>
    %cst_70 = arith.constant dense<0.000000e+00> : vector<24xf32>
    %172 = vector.multi_reduction <add>, %167, %cst_70 [1] : vector<24x32xf32> to vector<24xf32>
    %173 = vector.shape_cast %172 : vector<24xf32> to vector<24x1xf32>
    %cst_71 = arith.constant 3.200000e+01 : f32
    %174 = vector.broadcast %cst_71 : f32 to vector<24x1xf32>
    %175 = arith.divf %173, %174 : vector<24x1xf32>
    %176 = vector.broadcast %175 : vector<24x1xf32> to vector<24x32xf32>
    %177 = arith.subf %167, %176 : vector<24x32xf32>
    %178 = arith.mulf %177, %177 : vector<24x32xf32>
    %cst_72 = arith.constant dense<0.000000e+00> : vector<24xf32>
    %179 = vector.multi_reduction <add>, %178, %cst_72 [1] : vector<24x32xf32> to vector<24xf32>
    %180 = vector.shape_cast %179 : vector<24xf32> to vector<24x1xf32>
    %cst_73 = arith.constant 3.200000e+01 : f32
    %181 = vector.broadcast %cst_73 : f32 to vector<24x1xf32>
    %182 = arith.divf %180, %181 : vector<24x1xf32>
    %183 = vector.broadcast %175 : vector<24x1xf32> to vector<24x32xf32>
    %184 = arith.subf %167, %183 : vector<24x32xf32>
    %cst_74 = arith.constant 9.99999974E-6 : f32
    %185 = vector.broadcast %cst_74 : f32 to vector<24x1xf32>
    %186 = arith.addf %182, %185 : vector<24x1xf32>
    %187 = math.rsqrt %186 : vector<24x1xf32>
    %188 = vector.broadcast %187 : vector<24x1xf32> to vector<24x32xf32>
    %189 = arith.mulf %184, %188 : vector<24x32xf32>
    %190 = vector.broadcast %169 : vector<1x32xf32> to vector<24x32xf32>
    %191 = arith.mulf %189, %190 : vector<24x32xf32>
    %192 = vector.broadcast %171 : vector<1x32xf32> to vector<24x32xf32>
    %193 = arith.addf %191, %192 : vector<24x32xf32>
    %c1_75 = arith.constant 1 : index
    %c0_76 = arith.constant 0 : index
    %c0_77 = arith.constant 0 : index
    %194 = vector.load %arg7[%c1_75, %c0_76, %c0_77] : memref<4x32x128xf32, #tpu.memory_space<vmem>>, vector<1x32x128xf32>
    %195 = vector.shape_cast %194 : vector<1x32x128xf32> to vector<32x128xf32>
    %cst_78 = arith.constant dense<0.000000e+00> : vector<24x128xf32>
    %196 = tpu.matmul %193, %195, %cst_78 {dimension_numbers = #tpu.dot_dimension_numbers<[1], [0], [0], [1], [0, 0, 1, 1], [], []>} : vector<24x32xf32>, vector<32x128xf32>, vector<24x128xf32> -> vector<24x128xf32>
    %197 = vector.broadcast %9 : vector<24x1xf32> to vector<24x128xf32>
    %198 = arith.mulf %196, %197 : vector<24x128xf32>
    %c1_79 = arith.constant 1 : index
    %c0_80 = arith.constant 0 : index
    %c0_81 = arith.constant 0 : index
    %199 = vector.load %arg8[%c1_79, %c0_80, %c0_81] : memref<4x3x128xf32, #tpu.memory_space<vmem>>, vector<1x3x128xf32>
    %200 = vector.shape_cast %199 : vector<1x3x128xf32> to vector<3x128xf32>
    %c1_i32_82 = arith.constant 1 : i32
    %201 = tpu.dynamic_rotate %198 by %c1_i32_82 dim 0 : vector<24x128xf32>, i32 -> vector<24x128xf32>
    %c23_i32_83 = arith.constant 23 : i32
    %202 = tpu.dynamic_rotate %198 by %c23_i32_83 dim 0 : vector<24x128xf32>, i32 -> vector<24x128xf32>
    %203 = vector.extract_strided_slice %200 {offsets = [0, 0], sizes = [1, 128], strides = [1, 1]} : vector<3x128xf32> to vector<1x128xf32>
    %204 = vector.broadcast %203 : vector<1x128xf32> to vector<24x128xf32>
    %205 = arith.mulf %204, %201 : vector<24x128xf32>
    %206 = vector.extract_strided_slice %200 {offsets = [1, 0], sizes = [1, 128], strides = [1, 1]} : vector<3x128xf32> to vector<1x128xf32>
    %207 = vector.broadcast %206 : vector<1x128xf32> to vector<24x128xf32>
    %208 = arith.mulf %207, %198 : vector<24x128xf32>
    %209 = arith.addf %205, %208 : vector<24x128xf32>
    %210 = vector.extract_strided_slice %200 {offsets = [2, 0], sizes = [1, 128], strides = [1, 1]} : vector<3x128xf32> to vector<1x128xf32>
    %211 = vector.broadcast %210 : vector<1x128xf32> to vector<24x128xf32>
    %212 = arith.mulf %211, %202 : vector<24x128xf32>
    %213 = arith.addf %209, %212 : vector<24x128xf32>
    %cst_84 = arith.constant 0.000000e+00 : f32
    %214 = vector.broadcast %cst_84 : f32 to vector<24x128xf32>
    %215 = arith.subf %214, %213 : vector<24x128xf32>
    %216 = math.exp %215 : vector<24x128xf32>
    %cst_85 = arith.constant 1.000000e+00 : f32
    %217 = vector.broadcast %cst_85 : f32 to vector<24x128xf32>
    %218 = arith.addf %217, %216 : vector<24x128xf32>
    %cst_86 = arith.constant 1.000000e+00 : f32
    %219 = vector.broadcast %cst_86 : f32 to vector<24x128xf32>
    %220 = arith.divf %219, %218 : vector<24x128xf32>
    %221 = arith.mulf %213, %220 : vector<24x128xf32>
    %222 = arith.select %90, %221, %220 : vector<24x128xi1>, vector<24x128xf32>
    %c1_87 = arith.constant 1 : index
    %c0_88 = arith.constant 0 : index
    %c0_89 = arith.constant 0 : index
    %223 = vector.load %arg9[%c1_87, %c0_88, %c0_89] : memref<4x128x64xf32, #tpu.memory_space<vmem>>, vector<1x128x64xf32>
    %224 = vector.shape_cast %223 : vector<1x128x64xf32> to vector<128x64xf32>
    %cst_90 = arith.constant dense<0.000000e+00> : vector<24x64xf32>
    %225 = tpu.matmul %222, %224, %cst_90 {dimension_numbers = #tpu.dot_dimension_numbers<[1], [0], [0], [1], [0, 0, 1, 1], [], []>} : vector<24x128xf32>, vector<128x64xf32>, vector<24x64xf32> -> vector<24x64xf32>
    %c1_91 = arith.constant 1 : index
    %c0_92 = arith.constant 0 : index
    %c0_93 = arith.constant 0 : index
    %226 = vector.load %arg10[%c1_91, %c0_92, %c0_93] : memref<4x1x64xf32, #tpu.memory_space<vmem>>, vector<1x1x64xf32>
    %227 = vector.shape_cast %226 : vector<1x1x64xf32> to vector<1x64xf32>
    %228 = vector.broadcast %227 : vector<1x64xf32> to vector<24x64xf32>
    %229 = arith.addf %225, %228 : vector<24x64xf32>
    %230 = math.exp %229 : vector<24x64xf32>
    %cst_94 = arith.constant 2.000000e+00 : f32
    %231 = vector.broadcast %cst_94 : f32 to vector<24x64xf32>
    %232 = arith.addf %231, %230 : vector<24x64xf32>
    %cst_95 = arith.constant 1.000000e+00 : f32
    %233 = vector.broadcast %cst_95 : f32 to vector<24x64xf32>
    %234 = arith.divf %233, %232 : vector<24x64xf32>
    %cst_96 = arith.constant 1.000000e+00 : f32
    %235 = vector.broadcast %cst_96 : f32 to vector<24x64xf32>
    %236 = arith.subf %235, %234 : vector<24x64xf32>
    %237 = vector.extract_strided_slice %222 {offsets = [0, 0], sizes = [24, 64], strides = [1, 1]} : vector<24x128xf32> to vector<24x64xf32>
    %238 = vector.extract_strided_slice %222 {offsets = [0, 64], sizes = [24, 64], strides = [1, 1]} : vector<24x128xf32> to vector<24x64xf32>
    %239 = arith.mulf %237, %238 : vector<24x64xf32>
    %240 = arith.mulf %239, %236 : vector<24x64xf32>
    %c1_97 = arith.constant 1 : index
    %c0_98 = arith.constant 0 : index
    %c0_99 = arith.constant 0 : index
    %241 = vector.load %arg11[%c1_97, %c0_98, %c0_99] : memref<4x64x32xf32, #tpu.memory_space<vmem>>, vector<1x64x32xf32>
    %242 = vector.shape_cast %241 : vector<1x64x32xf32> to vector<64x32xf32>
    %cst_100 = arith.constant dense<0.000000e+00> : vector<24x32xf32>
    %243 = tpu.matmul %240, %242, %cst_100 {dimension_numbers = #tpu.dot_dimension_numbers<[1], [0], [0], [1], [0, 0, 1, 1], [], []>} : vector<24x64xf32>, vector<64x32xf32>, vector<24x32xf32> -> vector<24x32xf32>
    %244 = arith.addf %243, %167 : vector<24x32xf32>
    %c2_101 = arith.constant 2 : index
    %c0_102 = arith.constant 0 : index
    %c0_103 = arith.constant 0 : index
    %245 = vector.load %arg5[%c2_101, %c0_102, %c0_103] : memref<4x1x32xf32, #tpu.memory_space<vmem>>, vector<1x1x32xf32>
    %246 = vector.shape_cast %245 : vector<1x1x32xf32> to vector<1x32xf32>
    %c2_104 = arith.constant 2 : index
    %c0_105 = arith.constant 0 : index
    %c0_106 = arith.constant 0 : index
    %247 = vector.load %arg6[%c2_104, %c0_105, %c0_106] : memref<4x1x32xf32, #tpu.memory_space<vmem>>, vector<1x1x32xf32>
    %248 = vector.shape_cast %247 : vector<1x1x32xf32> to vector<1x32xf32>
    %cst_107 = arith.constant dense<0.000000e+00> : vector<24xf32>
    %249 = vector.multi_reduction <add>, %244, %cst_107 [1] : vector<24x32xf32> to vector<24xf32>
    %250 = vector.shape_cast %249 : vector<24xf32> to vector<24x1xf32>
    %cst_108 = arith.constant 3.200000e+01 : f32
    %251 = vector.broadcast %cst_108 : f32 to vector<24x1xf32>
    %252 = arith.divf %250, %251 : vector<24x1xf32>
    %253 = vector.broadcast %252 : vector<24x1xf32> to vector<24x32xf32>
    %254 = arith.subf %244, %253 : vector<24x32xf32>
    %255 = arith.mulf %254, %254 : vector<24x32xf32>
    %cst_109 = arith.constant dense<0.000000e+00> : vector<24xf32>
    %256 = vector.multi_reduction <add>, %255, %cst_109 [1] : vector<24x32xf32> to vector<24xf32>
    %257 = vector.shape_cast %256 : vector<24xf32> to vector<24x1xf32>
    %cst_110 = arith.constant 3.200000e+01 : f32
    %258 = vector.broadcast %cst_110 : f32 to vector<24x1xf32>
    %259 = arith.divf %257, %258 : vector<24x1xf32>
    %260 = vector.broadcast %252 : vector<24x1xf32> to vector<24x32xf32>
    %261 = arith.subf %244, %260 : vector<24x32xf32>
    %cst_111 = arith.constant 9.99999974E-6 : f32
    %262 = vector.broadcast %cst_111 : f32 to vector<24x1xf32>
    %263 = arith.addf %259, %262 : vector<24x1xf32>
    %264 = math.rsqrt %263 : vector<24x1xf32>
    %265 = vector.broadcast %264 : vector<24x1xf32> to vector<24x32xf32>
    %266 = arith.mulf %261, %265 : vector<24x32xf32>
    %267 = vector.broadcast %246 : vector<1x32xf32> to vector<24x32xf32>
    %268 = arith.mulf %266, %267 : vector<24x32xf32>
    %269 = vector.broadcast %248 : vector<1x32xf32> to vector<24x32xf32>
    %270 = arith.addf %268, %269 : vector<24x32xf32>
    %c2_112 = arith.constant 2 : index
    %c0_113 = arith.constant 0 : index
    %c0_114 = arith.constant 0 : index
    %271 = vector.load %arg7[%c2_112, %c0_113, %c0_114] : memref<4x32x128xf32, #tpu.memory_space<vmem>>, vector<1x32x128xf32>
    %272 = vector.shape_cast %271 : vector<1x32x128xf32> to vector<32x128xf32>
    %cst_115 = arith.constant dense<0.000000e+00> : vector<24x128xf32>
    %273 = tpu.matmul %270, %272, %cst_115 {dimension_numbers = #tpu.dot_dimension_numbers<[1], [0], [0], [1], [0, 0, 1, 1], [], []>} : vector<24x32xf32>, vector<32x128xf32>, vector<24x128xf32> -> vector<24x128xf32>
    %274 = vector.broadcast %9 : vector<24x1xf32> to vector<24x128xf32>
    %275 = arith.mulf %273, %274 : vector<24x128xf32>
    %c2_116 = arith.constant 2 : index
    %c0_117 = arith.constant 0 : index
    %c0_118 = arith.constant 0 : index
    %276 = vector.load %arg8[%c2_116, %c0_117, %c0_118] : memref<4x3x128xf32, #tpu.memory_space<vmem>>, vector<1x3x128xf32>
    %277 = vector.shape_cast %276 : vector<1x3x128xf32> to vector<3x128xf32>
    %c1_i32_119 = arith.constant 1 : i32
    %278 = tpu.dynamic_rotate %275 by %c1_i32_119 dim 0 : vector<24x128xf32>, i32 -> vector<24x128xf32>
    %c23_i32_120 = arith.constant 23 : i32
    %279 = tpu.dynamic_rotate %275 by %c23_i32_120 dim 0 : vector<24x128xf32>, i32 -> vector<24x128xf32>
    %280 = vector.extract_strided_slice %277 {offsets = [0, 0], sizes = [1, 128], strides = [1, 1]} : vector<3x128xf32> to vector<1x128xf32>
    %281 = vector.broadcast %280 : vector<1x128xf32> to vector<24x128xf32>
    %282 = arith.mulf %281, %278 : vector<24x128xf32>
    %283 = vector.extract_strided_slice %277 {offsets = [1, 0], sizes = [1, 128], strides = [1, 1]} : vector<3x128xf32> to vector<1x128xf32>
    %284 = vector.broadcast %283 : vector<1x128xf32> to vector<24x128xf32>
    %285 = arith.mulf %284, %275 : vector<24x128xf32>
    %286 = arith.addf %282, %285 : vector<24x128xf32>
    %287 = vector.extract_strided_slice %277 {offsets = [2, 0], sizes = [1, 128], strides = [1, 1]} : vector<3x128xf32> to vector<1x128xf32>
    %288 = vector.broadcast %287 : vector<1x128xf32> to vector<24x128xf32>
    %289 = arith.mulf %288, %279 : vector<24x128xf32>
    %290 = arith.addf %286, %289 : vector<24x128xf32>
    %cst_121 = arith.constant 0.000000e+00 : f32
    %291 = vector.broadcast %cst_121 : f32 to vector<24x128xf32>
    %292 = arith.subf %291, %290 : vector<24x128xf32>
    %293 = math.exp %292 : vector<24x128xf32>
    %cst_122 = arith.constant 1.000000e+00 : f32
    %294 = vector.broadcast %cst_122 : f32 to vector<24x128xf32>
    %295 = arith.addf %294, %293 : vector<24x128xf32>
    %cst_123 = arith.constant 1.000000e+00 : f32
    %296 = vector.broadcast %cst_123 : f32 to vector<24x128xf32>
    %297 = arith.divf %296, %295 : vector<24x128xf32>
    %298 = arith.mulf %290, %297 : vector<24x128xf32>
    %299 = arith.select %90, %298, %297 : vector<24x128xi1>, vector<24x128xf32>
    %c2_124 = arith.constant 2 : index
    %c0_125 = arith.constant 0 : index
    %c0_126 = arith.constant 0 : index
    %300 = vector.load %arg9[%c2_124, %c0_125, %c0_126] : memref<4x128x64xf32, #tpu.memory_space<vmem>>, vector<1x128x64xf32>
    %301 = vector.shape_cast %300 : vector<1x128x64xf32> to vector<128x64xf32>
    %cst_127 = arith.constant dense<0.000000e+00> : vector<24x64xf32>
    %302 = tpu.matmul %299, %301, %cst_127 {dimension_numbers = #tpu.dot_dimension_numbers<[1], [0], [0], [1], [0, 0, 1, 1], [], []>} : vector<24x128xf32>, vector<128x64xf32>, vector<24x64xf32> -> vector<24x64xf32>
    %c2_128 = arith.constant 2 : index
    %c0_129 = arith.constant 0 : index
    %c0_130 = arith.constant 0 : index
    %303 = vector.load %arg10[%c2_128, %c0_129, %c0_130] : memref<4x1x64xf32, #tpu.memory_space<vmem>>, vector<1x1x64xf32>
    %304 = vector.shape_cast %303 : vector<1x1x64xf32> to vector<1x64xf32>
    %305 = vector.broadcast %304 : vector<1x64xf32> to vector<24x64xf32>
    %306 = arith.addf %302, %305 : vector<24x64xf32>
    %307 = math.exp %306 : vector<24x64xf32>
    %cst_131 = arith.constant 2.000000e+00 : f32
    %308 = vector.broadcast %cst_131 : f32 to vector<24x64xf32>
    %309 = arith.addf %308, %307 : vector<24x64xf32>
    %cst_132 = arith.constant 1.000000e+00 : f32
    %310 = vector.broadcast %cst_132 : f32 to vector<24x64xf32>
    %311 = arith.divf %310, %309 : vector<24x64xf32>
    %cst_133 = arith.constant 1.000000e+00 : f32
    %312 = vector.broadcast %cst_133 : f32 to vector<24x64xf32>
    %313 = arith.subf %312, %311 : vector<24x64xf32>
    %314 = vector.extract_strided_slice %299 {offsets = [0, 0], sizes = [24, 64], strides = [1, 1]} : vector<24x128xf32> to vector<24x64xf32>
    %315 = vector.extract_strided_slice %299 {offsets = [0, 64], sizes = [24, 64], strides = [1, 1]} : vector<24x128xf32> to vector<24x64xf32>
    %316 = arith.mulf %314, %315 : vector<24x64xf32>
    %317 = arith.mulf %316, %313 : vector<24x64xf32>
    %c2_134 = arith.constant 2 : index
    %c0_135 = arith.constant 0 : index
    %c0_136 = arith.constant 0 : index
    %318 = vector.load %arg11[%c2_134, %c0_135, %c0_136] : memref<4x64x32xf32, #tpu.memory_space<vmem>>, vector<1x64x32xf32>
    %319 = vector.shape_cast %318 : vector<1x64x32xf32> to vector<64x32xf32>
    %cst_137 = arith.constant dense<0.000000e+00> : vector<24x32xf32>
    %320 = tpu.matmul %317, %319, %cst_137 {dimension_numbers = #tpu.dot_dimension_numbers<[1], [0], [0], [1], [0, 0, 1, 1], [], []>} : vector<24x64xf32>, vector<64x32xf32>, vector<24x32xf32> -> vector<24x32xf32>
    %321 = arith.addf %320, %244 : vector<24x32xf32>
    %c3_138 = arith.constant 3 : index
    %c0_139 = arith.constant 0 : index
    %c0_140 = arith.constant 0 : index
    %322 = vector.load %arg5[%c3_138, %c0_139, %c0_140] : memref<4x1x32xf32, #tpu.memory_space<vmem>>, vector<1x1x32xf32>
    %323 = vector.shape_cast %322 : vector<1x1x32xf32> to vector<1x32xf32>
    %c3_141 = arith.constant 3 : index
    %c0_142 = arith.constant 0 : index
    %c0_143 = arith.constant 0 : index
    %324 = vector.load %arg6[%c3_141, %c0_142, %c0_143] : memref<4x1x32xf32, #tpu.memory_space<vmem>>, vector<1x1x32xf32>
    %325 = vector.shape_cast %324 : vector<1x1x32xf32> to vector<1x32xf32>
    %cst_144 = arith.constant dense<0.000000e+00> : vector<24xf32>
    %326 = vector.multi_reduction <add>, %321, %cst_144 [1] : vector<24x32xf32> to vector<24xf32>
    %327 = vector.shape_cast %326 : vector<24xf32> to vector<24x1xf32>
    %cst_145 = arith.constant 3.200000e+01 : f32
    %328 = vector.broadcast %cst_145 : f32 to vector<24x1xf32>
    %329 = arith.divf %327, %328 : vector<24x1xf32>
    %330 = vector.broadcast %329 : vector<24x1xf32> to vector<24x32xf32>
    %331 = arith.subf %321, %330 : vector<24x32xf32>
    %332 = arith.mulf %331, %331 : vector<24x32xf32>
    %cst_146 = arith.constant dense<0.000000e+00> : vector<24xf32>
    %333 = vector.multi_reduction <add>, %332, %cst_146 [1] : vector<24x32xf32> to vector<24xf32>
    %334 = vector.shape_cast %333 : vector<24xf32> to vector<24x1xf32>
    %cst_147 = arith.constant 3.200000e+01 : f32
    %335 = vector.broadcast %cst_147 : f32 to vector<24x1xf32>
    %336 = arith.divf %334, %335 : vector<24x1xf32>
    %337 = vector.broadcast %329 : vector<24x1xf32> to vector<24x32xf32>
    %338 = arith.subf %321, %337 : vector<24x32xf32>
    %cst_148 = arith.constant 9.99999974E-6 : f32
    %339 = vector.broadcast %cst_148 : f32 to vector<24x1xf32>
    %340 = arith.addf %336, %339 : vector<24x1xf32>
    %341 = math.rsqrt %340 : vector<24x1xf32>
    %342 = vector.broadcast %341 : vector<24x1xf32> to vector<24x32xf32>
    %343 = arith.mulf %338, %342 : vector<24x32xf32>
    %344 = vector.broadcast %323 : vector<1x32xf32> to vector<24x32xf32>
    %345 = arith.mulf %343, %344 : vector<24x32xf32>
    %346 = vector.broadcast %325 : vector<1x32xf32> to vector<24x32xf32>
    %347 = arith.addf %345, %346 : vector<24x32xf32>
    %c3_149 = arith.constant 3 : index
    %c0_150 = arith.constant 0 : index
    %c0_151 = arith.constant 0 : index
    %348 = vector.load %arg7[%c3_149, %c0_150, %c0_151] : memref<4x32x128xf32, #tpu.memory_space<vmem>>, vector<1x32x128xf32>
    %349 = vector.shape_cast %348 : vector<1x32x128xf32> to vector<32x128xf32>
    %cst_152 = arith.constant dense<0.000000e+00> : vector<24x128xf32>
    %350 = tpu.matmul %347, %349, %cst_152 {dimension_numbers = #tpu.dot_dimension_numbers<[1], [0], [0], [1], [0, 0, 1, 1], [], []>} : vector<24x32xf32>, vector<32x128xf32>, vector<24x128xf32> -> vector<24x128xf32>
    %351 = vector.broadcast %9 : vector<24x1xf32> to vector<24x128xf32>
    %352 = arith.mulf %350, %351 : vector<24x128xf32>
    %c3_153 = arith.constant 3 : index
    %c0_154 = arith.constant 0 : index
    %c0_155 = arith.constant 0 : index
    %353 = vector.load %arg8[%c3_153, %c0_154, %c0_155] : memref<4x3x128xf32, #tpu.memory_space<vmem>>, vector<1x3x128xf32>
    %354 = vector.shape_cast %353 : vector<1x3x128xf32> to vector<3x128xf32>
    %c1_i32_156 = arith.constant 1 : i32
    %355 = tpu.dynamic_rotate %352 by %c1_i32_156 dim 0 : vector<24x128xf32>, i32 -> vector<24x128xf32>
    %c23_i32_157 = arith.constant 23 : i32
    %356 = tpu.dynamic_rotate %352 by %c23_i32_157 dim 0 : vector<24x128xf32>, i32 -> vector<24x128xf32>
    %357 = vector.extract_strided_slice %354 {offsets = [0, 0], sizes = [1, 128], strides = [1, 1]} : vector<3x128xf32> to vector<1x128xf32>
    %358 = vector.broadcast %357 : vector<1x128xf32> to vector<24x128xf32>
    %359 = arith.mulf %358, %355 : vector<24x128xf32>
    %360 = vector.extract_strided_slice %354 {offsets = [1, 0], sizes = [1, 128], strides = [1, 1]} : vector<3x128xf32> to vector<1x128xf32>
    %361 = vector.broadcast %360 : vector<1x128xf32> to vector<24x128xf32>
    %362 = arith.mulf %361, %352 : vector<24x128xf32>
    %363 = arith.addf %359, %362 : vector<24x128xf32>
    %364 = vector.extract_strided_slice %354 {offsets = [2, 0], sizes = [1, 128], strides = [1, 1]} : vector<3x128xf32> to vector<1x128xf32>
    %365 = vector.broadcast %364 : vector<1x128xf32> to vector<24x128xf32>
    %366 = arith.mulf %365, %356 : vector<24x128xf32>
    %367 = arith.addf %363, %366 : vector<24x128xf32>
    %cst_158 = arith.constant 0.000000e+00 : f32
    %368 = vector.broadcast %cst_158 : f32 to vector<24x128xf32>
    %369 = arith.subf %368, %367 : vector<24x128xf32>
    %370 = math.exp %369 : vector<24x128xf32>
    %cst_159 = arith.constant 1.000000e+00 : f32
    %371 = vector.broadcast %cst_159 : f32 to vector<24x128xf32>
    %372 = arith.addf %371, %370 : vector<24x128xf32>
    %cst_160 = arith.constant 1.000000e+00 : f32
    %373 = vector.broadcast %cst_160 : f32 to vector<24x128xf32>
    %374 = arith.divf %373, %372 : vector<24x128xf32>
    %375 = arith.mulf %367, %374 : vector<24x128xf32>
    %376 = arith.select %90, %375, %374 : vector<24x128xi1>, vector<24x128xf32>
    %c3_161 = arith.constant 3 : index
    %c0_162 = arith.constant 0 : index
    %c0_163 = arith.constant 0 : index
    %377 = vector.load %arg9[%c3_161, %c0_162, %c0_163] : memref<4x128x64xf32, #tpu.memory_space<vmem>>, vector<1x128x64xf32>
    %378 = vector.shape_cast %377 : vector<1x128x64xf32> to vector<128x64xf32>
    %cst_164 = arith.constant dense<0.000000e+00> : vector<24x64xf32>
    %379 = tpu.matmul %376, %378, %cst_164 {dimension_numbers = #tpu.dot_dimension_numbers<[1], [0], [0], [1], [0, 0, 1, 1], [], []>} : vector<24x128xf32>, vector<128x64xf32>, vector<24x64xf32> -> vector<24x64xf32>
    %c3_165 = arith.constant 3 : index
    %c0_166 = arith.constant 0 : index
    %c0_167 = arith.constant 0 : index
    %380 = vector.load %arg10[%c3_165, %c0_166, %c0_167] : memref<4x1x64xf32, #tpu.memory_space<vmem>>, vector<1x1x64xf32>
    %381 = vector.shape_cast %380 : vector<1x1x64xf32> to vector<1x64xf32>
    %382 = vector.broadcast %381 : vector<1x64xf32> to vector<24x64xf32>
    %383 = arith.addf %379, %382 : vector<24x64xf32>
    %384 = math.exp %383 : vector<24x64xf32>
    %cst_168 = arith.constant 2.000000e+00 : f32
    %385 = vector.broadcast %cst_168 : f32 to vector<24x64xf32>
    %386 = arith.addf %385, %384 : vector<24x64xf32>
    %cst_169 = arith.constant 1.000000e+00 : f32
    %387 = vector.broadcast %cst_169 : f32 to vector<24x64xf32>
    %388 = arith.divf %387, %386 : vector<24x64xf32>
    %cst_170 = arith.constant 1.000000e+00 : f32
    %389 = vector.broadcast %cst_170 : f32 to vector<24x64xf32>
    %390 = arith.subf %389, %388 : vector<24x64xf32>
    %391 = vector.extract_strided_slice %376 {offsets = [0, 0], sizes = [24, 64], strides = [1, 1]} : vector<24x128xf32> to vector<24x64xf32>
    %392 = vector.extract_strided_slice %376 {offsets = [0, 64], sizes = [24, 64], strides = [1, 1]} : vector<24x128xf32> to vector<24x64xf32>
    %393 = arith.mulf %391, %392 : vector<24x64xf32>
    %394 = arith.mulf %393, %390 : vector<24x64xf32>
    %c3_171 = arith.constant 3 : index
    %c0_172 = arith.constant 0 : index
    %c0_173 = arith.constant 0 : index
    %395 = vector.load %arg11[%c3_171, %c0_172, %c0_173] : memref<4x64x32xf32, #tpu.memory_space<vmem>>, vector<1x64x32xf32>
    %396 = vector.shape_cast %395 : vector<1x64x32xf32> to vector<64x32xf32>
    %cst_174 = arith.constant dense<0.000000e+00> : vector<24x32xf32>
    %397 = tpu.matmul %394, %396, %cst_174 {dimension_numbers = #tpu.dot_dimension_numbers<[1], [0], [0], [1], [0, 0, 1, 1], [], []>} : vector<24x64xf32>, vector<64x32xf32>, vector<24x32xf32> -> vector<24x32xf32>
    %398 = arith.addf %397, %321 : vector<24x32xf32>
    %399 = vector.extract_strided_slice %398 {offsets = [8, 0], sizes = [8, 32], strides = [1, 1]} : vector<24x32xf32> to vector<8x32xf32>
    %cst_175 = arith.constant dense<0.000000e+00> : vector<8xf32>
    %400 = vector.multi_reduction <add>, %399, %cst_175 [1] : vector<8x32xf32> to vector<8xf32>
    %401 = vector.shape_cast %400 : vector<8xf32> to vector<8x1xf32>
    %cst_176 = arith.constant 3.200000e+01 : f32
    %402 = vector.broadcast %cst_176 : f32 to vector<8x1xf32>
    %403 = arith.divf %401, %402 : vector<8x1xf32>
    %404 = vector.broadcast %403 : vector<8x1xf32> to vector<8x32xf32>
    %405 = arith.subf %399, %404 : vector<8x32xf32>
    %406 = arith.mulf %405, %405 : vector<8x32xf32>
    %cst_177 = arith.constant dense<0.000000e+00> : vector<8xf32>
    %407 = vector.multi_reduction <add>, %406, %cst_177 [1] : vector<8x32xf32> to vector<8xf32>
    %408 = vector.shape_cast %407 : vector<8xf32> to vector<8x1xf32>
    %cst_178 = arith.constant 3.200000e+01 : f32
    %409 = vector.broadcast %cst_178 : f32 to vector<8x1xf32>
    %410 = arith.divf %408, %409 : vector<8x1xf32>
    %411 = vector.broadcast %403 : vector<8x1xf32> to vector<8x32xf32>
    %412 = arith.subf %399, %411 : vector<8x32xf32>
    %cst_179 = arith.constant 9.99999974E-6 : f32
    %413 = vector.broadcast %cst_179 : f32 to vector<8x1xf32>
    %414 = arith.addf %410, %413 : vector<8x1xf32>
    %415 = math.rsqrt %414 : vector<8x1xf32>
    %416 = vector.broadcast %415 : vector<8x1xf32> to vector<8x32xf32>
    %417 = arith.mulf %412, %416 : vector<8x32xf32>
    %c0_180 = arith.constant 0 : index
    %c0_181 = arith.constant 0 : index
    %418 = vector.load %arg12[%c0_180, %c0_181] : memref<32x128xf32, #tpu.memory_space<vmem>>, vector<32x128xf32>
    %cst_182 = arith.constant dense<0.000000e+00> : vector<8x128xf32>
    %419 = tpu.matmul %417, %418, %cst_182 {dimension_numbers = #tpu.dot_dimension_numbers<[1], [0], [0], [1], [0, 0, 1, 1], [], []>} : vector<8x32xf32>, vector<32x128xf32>, vector<8x128xf32> -> vector<8x128xf32>
    %c0_183 = arith.constant 0 : index
    %c0_184 = arith.constant 0 : index
    %420 = vector.load %arg13[%c0_183, %c0_184] : memref<1x128xf32, #tpu.memory_space<vmem>>, vector<1x128xf32>
    %421 = vector.broadcast %420 : vector<1x128xf32> to vector<8x128xf32>
    %422 = arith.addf %419, %421 : vector<8x128xf32>
    %cst_185 = arith.constant 5.000000e-01 : f32
    %423 = vector.broadcast %cst_185 : f32 to vector<8x128xf32>
    %424 = arith.mulf %423, %422 : vector<8x128xf32>
    %cst_186 = arith.constant 4.471500e-02 : f32
    %425 = vector.broadcast %cst_186 : f32 to vector<8x128xf32>
    %426 = arith.mulf %425, %422 : vector<8x128xf32>
    %427 = arith.mulf %426, %422 : vector<8x128xf32>
    %428 = arith.mulf %427, %422 : vector<8x128xf32>
    %429 = arith.addf %422, %428 : vector<8x128xf32>
    %cst_187 = arith.constant 0.797884583 : f32
    %430 = vector.broadcast %cst_187 : f32 to vector<8x128xf32>
    %431 = arith.mulf %430, %429 : vector<8x128xf32>
    %432 = math.tanh %431 : vector<8x128xf32>
    %cst_188 = arith.constant 1.000000e+00 : f32
    %433 = vector.broadcast %cst_188 : f32 to vector<8x128xf32>
    %434 = arith.addf %433, %432 : vector<8x128xf32>
    %435 = arith.mulf %424, %434 : vector<8x128xf32>
    %436 = vector.extract_strided_slice %435 {offsets = [0, 0], sizes = [8, 16], strides = [1, 1]} : vector<8x128xf32> to vector<8x16xf32>
    %c0_189 = arith.constant 0 : index
    %c0_190 = arith.constant 0 : index
    %c0_191 = arith.constant 0 : index
    %437 = vector.load %arg14[%c0_189, %c0_190, %c0_191] : memref<8x16x256xf32, #tpu.memory_space<vmem>>, vector<1x16x256xf32>
    %438 = vector.shape_cast %437 : vector<1x16x256xf32> to vector<16x256xf32>
    %cst_192 = arith.constant dense<0.000000e+00> : vector<8x256xf32>
    %439 = tpu.matmul %436, %438, %cst_192 {dimension_numbers = #tpu.dot_dimension_numbers<[1], [0], [0], [1], [0, 0, 1, 1], [], []>} : vector<8x16xf32>, vector<16x256xf32>, vector<8x256xf32> -> vector<8x256xf32>
    %c0_193 = arith.constant 0 : index
    %c0_194 = arith.constant 0 : index
    %c0_195 = arith.constant 0 : index
    %440 = vector.load %arg15[%c0_193, %c0_194, %c0_195] : memref<8x1x256xf32, #tpu.memory_space<vmem>>, vector<1x1x256xf32>
    %441 = vector.shape_cast %440 : vector<1x1x256xf32> to vector<1x256xf32>
    %442 = vector.broadcast %441 : vector<1x256xf32> to vector<8x256xf32>
    %443 = arith.addf %439, %442 : vector<8x256xf32>
    %c0_196 = arith.constant 0 : index
    %c0_197 = arith.constant 0 : index
    %c0_198 = arith.constant 0 : index
    %c0_199 = arith.constant 0 : index
    %444 = vector.load %arg16[%c0_196, %c0_197, %c0_198, %c0_199] : memref<1x8x8x256xf32, #tpu.memory_space<vmem>>, vector<1x1x8x256xf32>
    %445 = vector.shape_cast %444 : vector<1x1x8x256xf32> to vector<8x256xf32>
    %446 = vector.shape_cast %443 : vector<8x256xf32> to vector<1x1x8x256xf32>
    tpu.vector_store %arg16[%c0_196, %c0_197, %c0_198, %c0_199], %446 {strides = array<i32>} : memref<1x8x8x256xf32, #tpu.memory_space<vmem>>, vector<1x1x8x256xf32>,
    %447 = vector.extract_strided_slice %435 {offsets = [0, 16], sizes = [8, 16], strides = [1, 1]} : vector<8x128xf32> to vector<8x16xf32>
    %c1_200 = arith.constant 1 : index
    %c0_201 = arith.constant 0 : index
    %c0_202 = arith.constant 0 : index
    %448 = vector.load %arg14[%c1_200, %c0_201, %c0_202] : memref<8x16x256xf32, #tpu.memory_space<vmem>>, vector<1x16x256xf32>
    %449 = vector.shape_cast %448 : vector<1x16x256xf32> to vector<16x256xf32>
    %cst_203 = arith.constant dense<0.000000e+00> : vector<8x256xf32>
    %450 = tpu.matmul %447, %449, %cst_203 {dimension_numbers = #tpu.dot_dimension_numbers<[1], [0], [0], [1], [0, 0, 1, 1], [], []>} : vector<8x16xf32>, vector<16x256xf32>, vector<8x256xf32> -> vector<8x256xf32>
    %c1_204 = arith.constant 1 : index
    %c0_205 = arith.constant 0 : index
    %c0_206 = arith.constant 0 : index
    %451 = vector.load %arg15[%c1_204, %c0_205, %c0_206] : memref<8x1x256xf32, #tpu.memory_space<vmem>>, vector<1x1x256xf32>
    %452 = vector.shape_cast %451 : vector<1x1x256xf32> to vector<1x256xf32>
    %453 = vector.broadcast %452 : vector<1x256xf32> to vector<8x256xf32>
    %454 = arith.addf %450, %453 : vector<8x256xf32>
    %c0_207 = arith.constant 0 : index
    %c1_208 = arith.constant 1 : index
    %c0_209 = arith.constant 0 : index
    %c0_210 = arith.constant 0 : index
    %455 = vector.load %arg16[%c0_207, %c1_208, %c0_209, %c0_210] : memref<1x8x8x256xf32, #tpu.memory_space<vmem>>, vector<1x1x8x256xf32>
    %456 = vector.shape_cast %455 : vector<1x1x8x256xf32> to vector<8x256xf32>
    %457 = vector.shape_cast %454 : vector<8x256xf32> to vector<1x1x8x256xf32>
    tpu.vector_store %arg16[%c0_207, %c1_208, %c0_209, %c0_210], %457 {strides = array<i32>} : memref<1x8x8x256xf32, #tpu.memory_space<vmem>>, vector<1x1x8x256xf32>,
    %458 = vector.extract_strided_slice %435 {offsets = [0, 32], sizes = [8, 16], strides = [1, 1]} : vector<8x128xf32> to vector<8x16xf32>
    %c2_211 = arith.constant 2 : index
    %c0_212 = arith.constant 0 : index
    %c0_213 = arith.constant 0 : index
    %459 = vector.load %arg14[%c2_211, %c0_212, %c0_213] : memref<8x16x256xf32, #tpu.memory_space<vmem>>, vector<1x16x256xf32>
    %460 = vector.shape_cast %459 : vector<1x16x256xf32> to vector<16x256xf32>
    %cst_214 = arith.constant dense<0.000000e+00> : vector<8x256xf32>
    %461 = tpu.matmul %458, %460, %cst_214 {dimension_numbers = #tpu.dot_dimension_numbers<[1], [0], [0], [1], [0, 0, 1, 1], [], []>} : vector<8x16xf32>, vector<16x256xf32>, vector<8x256xf32> -> vector<8x256xf32>
    %c2_215 = arith.constant 2 : index
    %c0_216 = arith.constant 0 : index
    %c0_217 = arith.constant 0 : index
    %462 = vector.load %arg15[%c2_215, %c0_216, %c0_217] : memref<8x1x256xf32, #tpu.memory_space<vmem>>, vector<1x1x256xf32>
    %463 = vector.shape_cast %462 : vector<1x1x256xf32> to vector<1x256xf32>
    %464 = vector.broadcast %463 : vector<1x256xf32> to vector<8x256xf32>
    %465 = arith.addf %461, %464 : vector<8x256xf32>
    %c0_218 = arith.constant 0 : index
    %c2_219 = arith.constant 2 : index
    %c0_220 = arith.constant 0 : index
    %c0_221 = arith.constant 0 : index
    %466 = vector.load %arg16[%c0_218, %c2_219, %c0_220, %c0_221] : memref<1x8x8x256xf32, #tpu.memory_space<vmem>>, vector<1x1x8x256xf32>
    %467 = vector.shape_cast %466 : vector<1x1x8x256xf32> to vector<8x256xf32>
    %468 = vector.shape_cast %465 : vector<8x256xf32> to vector<1x1x8x256xf32>
    tpu.vector_store %arg16[%c0_218, %c2_219, %c0_220, %c0_221], %468 {strides = array<i32>} : memref<1x8x8x256xf32, #tpu.memory_space<vmem>>, vector<1x1x8x256xf32>,
    %469 = vector.extract_strided_slice %435 {offsets = [0, 48], sizes = [8, 16], strides = [1, 1]} : vector<8x128xf32> to vector<8x16xf32>
    %c3_222 = arith.constant 3 : index
    %c0_223 = arith.constant 0 : index
    %c0_224 = arith.constant 0 : index
    %470 = vector.load %arg14[%c3_222, %c0_223, %c0_224] : memref<8x16x256xf32, #tpu.memory_space<vmem>>, vector<1x16x256xf32>
    %471 = vector.shape_cast %470 : vector<1x16x256xf32> to vector<16x256xf32>
    %cst_225 = arith.constant dense<0.000000e+00> : vector<8x256xf32>
    %472 = tpu.matmul %469, %471, %cst_225 {dimension_numbers = #tpu.dot_dimension_numbers<[1], [0], [0], [1], [0, 0, 1, 1], [], []>} : vector<8x16xf32>, vector<16x256xf32>, vector<8x256xf32> -> vector<8x256xf32>
    %c3_226 = arith.constant 3 : index
    %c0_227 = arith.constant 0 : index
    %c0_228 = arith.constant 0 : index
    %473 = vector.load %arg15[%c3_226, %c0_227, %c0_228] : memref<8x1x256xf32, #tpu.memory_space<vmem>>, vector<1x1x256xf32>
    %474 = vector.shape_cast %473 : vector<1x1x256xf32> to vector<1x256xf32>
    %475 = vector.broadcast %474 : vector<1x256xf32> to vector<8x256xf32>
    %476 = arith.addf %472, %475 : vector<8x256xf32>
    %c0_229 = arith.constant 0 : index
    %c3_230 = arith.constant 3 : index
    %c0_231 = arith.constant 0 : index
    %c0_232 = arith.constant 0 : index
    %477 = vector.load %arg16[%c0_229, %c3_230, %c0_231, %c0_232] : memref<1x8x8x256xf32, #tpu.memory_space<vmem>>, vector<1x1x8x256xf32>
    %478 = vector.shape_cast %477 : vector<1x1x8x256xf32> to vector<8x256xf32>
    %479 = vector.shape_cast %476 : vector<8x256xf32> to vector<1x1x8x256xf32>
    tpu.vector_store %arg16[%c0_229, %c3_230, %c0_231, %c0_232], %479 {strides = array<i32>} : memref<1x8x8x256xf32, #tpu.memory_space<vmem>>, vector<1x1x8x256xf32>,
    %480 = vector.extract_strided_slice %435 {offsets = [0, 64], sizes = [8, 16], strides = [1, 1]} : vector<8x128xf32> to vector<8x16xf32>
    %c4_233 = arith.constant 4 : index
    %c0_234 = arith.constant 0 : index
    %c0_235 = arith.constant 0 : index
    %481 = vector.load %arg14[%c4_233, %c0_234, %c0_235] : memref<8x16x256xf32, #tpu.memory_space<vmem>>, vector<1x16x256xf32>
    %482 = vector.shape_cast %481 : vector<1x16x256xf32> to vector<16x256xf32>
    %cst_236 = arith.constant dense<0.000000e+00> : vector<8x256xf32>
    %483 = tpu.matmul %480, %482, %cst_236 {dimension_numbers = #tpu.dot_dimension_numbers<[1], [0], [0], [1], [0, 0, 1, 1], [], []>} : vector<8x16xf32>, vector<16x256xf32>, vector<8x256xf32> -> vector<8x256xf32>
    %c4_237 = arith.constant 4 : index
    %c0_238 = arith.constant 0 : index
    %c0_239 = arith.constant 0 : index
    %484 = vector.load %arg15[%c4_237, %c0_238, %c0_239] : memref<8x1x256xf32, #tpu.memory_space<vmem>>, vector<1x1x256xf32>
    %485 = vector.shape_cast %484 : vector<1x1x256xf32> to vector<1x256xf32>
    %486 = vector.broadcast %485 : vector<1x256xf32> to vector<8x256xf32>
    %487 = arith.addf %483, %486 : vector<8x256xf32>
    %c0_240 = arith.constant 0 : index
    %c4_241 = arith.constant 4 : index
    %c0_242 = arith.constant 0 : index
    %c0_243 = arith.constant 0 : index
    %488 = vector.load %arg16[%c0_240, %c4_241, %c0_242, %c0_243] : memref<1x8x8x256xf32, #tpu.memory_space<vmem>>, vector<1x1x8x256xf32>
    %489 = vector.shape_cast %488 : vector<1x1x8x256xf32> to vector<8x256xf32>
    %490 = vector.shape_cast %487 : vector<8x256xf32> to vector<1x1x8x256xf32>
    tpu.vector_store %arg16[%c0_240, %c4_241, %c0_242, %c0_243], %490 {strides = array<i32>} : memref<1x8x8x256xf32, #tpu.memory_space<vmem>>, vector<1x1x8x256xf32>,
    %491 = vector.extract_strided_slice %435 {offsets = [0, 80], sizes = [8, 16], strides = [1, 1]} : vector<8x128xf32> to vector<8x16xf32>
    %c5_244 = arith.constant 5 : index
    %c0_245 = arith.constant 0 : index
    %c0_246 = arith.constant 0 : index
    %492 = vector.load %arg14[%c5_244, %c0_245, %c0_246] : memref<8x16x256xf32, #tpu.memory_space<vmem>>, vector<1x16x256xf32>
    %493 = vector.shape_cast %492 : vector<1x16x256xf32> to vector<16x256xf32>
    %cst_247 = arith.constant dense<0.000000e+00> : vector<8x256xf32>
    %494 = tpu.matmul %491, %493, %cst_247 {dimension_numbers = #tpu.dot_dimension_numbers<[1], [0], [0], [1], [0, 0, 1, 1], [], []>} : vector<8x16xf32>, vector<16x256xf32>, vector<8x256xf32> -> vector<8x256xf32>
    %c5_248 = arith.constant 5 : index
    %c0_249 = arith.constant 0 : index
    %c0_250 = arith.constant 0 : index
    %495 = vector.load %arg15[%c5_248, %c0_249, %c0_250] : memref<8x1x256xf32, #tpu.memory_space<vmem>>, vector<1x1x256xf32>
    %496 = vector.shape_cast %495 : vector<1x1x256xf32> to vector<1x256xf32>
    %497 = vector.broadcast %496 : vector<1x256xf32> to vector<8x256xf32>
    %498 = arith.addf %494, %497 : vector<8x256xf32>
    %c0_251 = arith.constant 0 : index
    %c5_252 = arith.constant 5 : index
    %c0_253 = arith.constant 0 : index
    %c0_254 = arith.constant 0 : index
    %499 = vector.load %arg16[%c0_251, %c5_252, %c0_253, %c0_254] : memref<1x8x8x256xf32, #tpu.memory_space<vmem>>, vector<1x1x8x256xf32>
    %500 = vector.shape_cast %499 : vector<1x1x8x256xf32> to vector<8x256xf32>
    %501 = vector.shape_cast %498 : vector<8x256xf32> to vector<1x1x8x256xf32>
    tpu.vector_store %arg16[%c0_251, %c5_252, %c0_253, %c0_254], %501 {strides = array<i32>} : memref<1x8x8x256xf32, #tpu.memory_space<vmem>>, vector<1x1x8x256xf32>,
    %502 = vector.extract_strided_slice %435 {offsets = [0, 96], sizes = [8, 16], strides = [1, 1]} : vector<8x128xf32> to vector<8x16xf32>
    %c6_255 = arith.constant 6 : index
    %c0_256 = arith.constant 0 : index
    %c0_257 = arith.constant 0 : index
    %503 = vector.load %arg14[%c6_255, %c0_256, %c0_257] : memref<8x16x256xf32, #tpu.memory_space<vmem>>, vector<1x16x256xf32>
    %504 = vector.shape_cast %503 : vector<1x16x256xf32> to vector<16x256xf32>
    %cst_258 = arith.constant dense<0.000000e+00> : vector<8x256xf32>
    %505 = tpu.matmul %502, %504, %cst_258 {dimension_numbers = #tpu.dot_dimension_numbers<[1], [0], [0], [1], [0, 0, 1, 1], [], []>} : vector<8x16xf32>, vector<16x256xf32>, vector<8x256xf32> -> vector<8x256xf32>
    %c6_259 = arith.constant 6 : index
    %c0_260 = arith.constant 0 : index
    %c0_261 = arith.constant 0 : index
    %506 = vector.load %arg15[%c6_259, %c0_260, %c0_261] : memref<8x1x256xf32, #tpu.memory_space<vmem>>, vector<1x1x256xf32>
    %507 = vector.shape_cast %506 : vector<1x1x256xf32> to vector<1x256xf32>
    %508 = vector.broadcast %507 : vector<1x256xf32> to vector<8x256xf32>
    %509 = arith.addf %505, %508 : vector<8x256xf32>
    %c0_262 = arith.constant 0 : index
    %c6_263 = arith.constant 6 : index
    %c0_264 = arith.constant 0 : index
    %c0_265 = arith.constant 0 : index
    %510 = vector.load %arg16[%c0_262, %c6_263, %c0_264, %c0_265] : memref<1x8x8x256xf32, #tpu.memory_space<vmem>>, vector<1x1x8x256xf32>
    %511 = vector.shape_cast %510 : vector<1x1x8x256xf32> to vector<8x256xf32>
    %512 = vector.shape_cast %509 : vector<8x256xf32> to vector<1x1x8x256xf32>
    tpu.vector_store %arg16[%c0_262, %c6_263, %c0_264, %c0_265], %512 {strides = array<i32>} : memref<1x8x8x256xf32, #tpu.memory_space<vmem>>, vector<1x1x8x256xf32>,
    %513 = vector.extract_strided_slice %435 {offsets = [0, 112], sizes = [8, 16], strides = [1, 1]} : vector<8x128xf32> to vector<8x16xf32>
    %c7_266 = arith.constant 7 : index
    %c0_267 = arith.constant 0 : index
    %c0_268 = arith.constant 0 : index
    %514 = vector.load %arg14[%c7_266, %c0_267, %c0_268] : memref<8x16x256xf32, #tpu.memory_space<vmem>>, vector<1x16x256xf32>
    %515 = vector.shape_cast %514 : vector<1x16x256xf32> to vector<16x256xf32>
    %cst_269 = arith.constant dense<0.000000e+00> : vector<8x256xf32>
    %516 = tpu.matmul %513, %515, %cst_269 {dimension_numbers = #tpu.dot_dimension_numbers<[1], [0], [0], [1], [0, 0, 1, 1], [], []>} : vector<8x16xf32>, vector<16x256xf32>, vector<8x256xf32> -> vector<8x256xf32>
    %c7_270 = arith.constant 7 : index
    %c0_271 = arith.constant 0 : index
    %c0_272 = arith.constant 0 : index
    %517 = vector.load %arg15[%c7_270, %c0_271, %c0_272] : memref<8x1x256xf32, #tpu.memory_space<vmem>>, vector<1x1x256xf32>
    %518 = vector.shape_cast %517 : vector<1x1x256xf32> to vector<1x256xf32>
    %519 = vector.broadcast %518 : vector<1x256xf32> to vector<8x256xf32>
    %520 = arith.addf %516, %519 : vector<8x256xf32>
    %c0_273 = arith.constant 0 : index
    %c7_274 = arith.constant 7 : index
    %c0_275 = arith.constant 0 : index
    %c0_276 = arith.constant 0 : index
    %521 = vector.load %arg16[%c0_273, %c7_274, %c0_275, %c0_276] : memref<1x8x8x256xf32, #tpu.memory_space<vmem>>, vector<1x1x8x256xf32>
    %522 = vector.shape_cast %521 : vector<1x1x8x256xf32> to vector<8x256xf32>
    %523 = vector.shape_cast %520 : vector<8x256xf32> to vector<1x1x8x256xf32>
    tpu.vector_store %arg16[%c0_273, %c7_274, %c0_275, %c0_276], %523 {strides = array<i32>} : memref<1x8x8x256xf32, #tpu.memory_space<vmem>>, vector<1x1x8x256xf32>,
    return
  }
  func.func @transform_0(%arg0: i32, %arg1: i32) -> (i32, i32, i32) {
    %c0_i32 = arith.constant 0 : i32
    %c0_i32_0 = arith.constant 0 : i32
    %c0_i32_1 = arith.constant 0 : i32
    return %arg0, %c0_i32, %c0_i32_0 : i32, i32, i32
  }
  func.func @transform_1(%arg0: i32, %arg1: i32) -> (i32, i32, i32) {
    %c0_i32 = arith.constant 0 : i32
    %c0_i32_0 = arith.constant 0 : i32
    %c0_i32_1 = arith.constant 0 : i32
    %c0_i32_2 = arith.constant 0 : i32
    return %c0_i32, %c0_i32_0, %c0_i32_1 : i32, i32, i32
  }
  func.func @transform_2(%arg0: i32, %arg1: i32) -> (i32, i32, i32) {
    %c0_i32 = arith.constant 0 : i32
    %c0_i32_0 = arith.constant 0 : i32
    %c0_i32_1 = arith.constant 0 : i32
    return %arg0, %c0_i32, %c0_i32_0 : i32, i32, i32
  }
  func.func @transform_3(%arg0: i32, %arg1: i32) -> (i32, i32, i32) {
    %c0_i32 = arith.constant 0 : i32
    %c0_i32_0 = arith.constant 0 : i32
    %c0_i32_1 = arith.constant 0 : i32
    %c0_i32_2 = arith.constant 0 : i32
    return %c0_i32, %c0_i32_0, %c0_i32_1 : i32, i32, i32
  }
  func.func @transform_4(%arg0: i32, %arg1: i32) -> (i32, i32, i32) {
    %c0_i32 = arith.constant 0 : i32
    %c0_i32_0 = arith.constant 0 : i32
    %c0_i32_1 = arith.constant 0 : i32
    %c0_i32_2 = arith.constant 0 : i32
    return %c0_i32, %c0_i32_0, %c0_i32_1 : i32, i32, i32
  }
  func.func @transform_5(%arg0: i32, %arg1: i32) -> (i32, i32, i32) {
    %c0_i32 = arith.constant 0 : i32
    %c0_i32_0 = arith.constant 0 : i32
    %c0_i32_1 = arith.constant 0 : i32
    %c0_i32_2 = arith.constant 0 : i32
    return %c0_i32, %c0_i32_0, %c0_i32_1 : i32, i32, i32
  }
  func.func @transform_6(%arg0: i32, %arg1: i32) -> (i32, i32, i32) {
    %c0_i32 = arith.constant 0 : i32
    %c0_i32_0 = arith.constant 0 : i32
    %c0_i32_1 = arith.constant 0 : i32
    %c0_i32_2 = arith.constant 0 : i32
    return %c0_i32, %c0_i32_0, %c0_i32_1 : i32, i32, i32
  }
  func.func @transform_7(%arg0: i32, %arg1: i32) -> (i32, i32, i32) {
    %c0_i32 = arith.constant 0 : i32
    %c0_i32_0 = arith.constant 0 : i32
    %c0_i32_1 = arith.constant 0 : i32
    %c0_i32_2 = arith.constant 0 : i32
    return %c0_i32, %c0_i32_0, %c0_i32_1 : i32, i32, i32
  }
  func.func @transform_8(%arg0: i32, %arg1: i32) -> (i32, i32, i32) {
    %c0_i32 = arith.constant 0 : i32
    %c0_i32_0 = arith.constant 0 : i32
    %c0_i32_1 = arith.constant 0 : i32
    %c0_i32_2 = arith.constant 0 : i32
    return %c0_i32, %c0_i32_0, %c0_i32_1 : i32, i32, i32
  }
  func.func @transform_9(%arg0: i32, %arg1: i32) -> (i32, i32, i32) {
    %c0_i32 = arith.constant 0 : i32
    %c0_i32_0 = arith.constant 0 : i32
    %c0_i32_1 = arith.constant 0 : i32
    %c0_i32_2 = arith.constant 0 : i32
    return %c0_i32, %c0_i32_0, %c0_i32_1 : i32, i32, i32
  }
  func.func @transform_10(%arg0: i32, %arg1: i32) -> (i32, i32) {
    %c0_i32 = arith.constant 0 : i32
    %c0_i32_0 = arith.constant 0 : i32
    %c0_i32_1 = arith.constant 0 : i32
    return %c0_i32, %c0_i32_0 : i32, i32
  }
  func.func @transform_11(%arg0: i32, %arg1: i32) -> (i32, i32) {
    %c0_i32 = arith.constant 0 : i32
    %c0_i32_0 = arith.constant 0 : i32
    %c0_i32_1 = arith.constant 0 : i32
    return %c0_i32, %c0_i32_0 : i32, i32
  }
  func.func @transform_12(%arg0: i32, %arg1: i32) -> (i32, i32, i32) {
    %c0_i32 = arith.constant 0 : i32
    %c0_i32_0 = arith.constant 0 : i32
    %c0_i32_1 = arith.constant 0 : i32
    %c0_i32_2 = arith.constant 0 : i32
    return %c0_i32, %c0_i32_0, %c0_i32_1 : i32, i32, i32
  }
  func.func @transform_13(%arg0: i32, %arg1: i32) -> (i32, i32, i32) {
    %c0_i32 = arith.constant 0 : i32
    %c0_i32_0 = arith.constant 0 : i32
    %c0_i32_1 = arith.constant 0 : i32
    %c0_i32_2 = arith.constant 0 : i32
    return %c0_i32, %c0_i32_0, %c0_i32_1 : i32, i32, i32
  }
  func.func @transform_14(%arg0: i32, %arg1: i32) -> (i32, i32, i32, i32) {
    %c0_i32 = arith.constant 0 : i32
    %c0_i32_0 = arith.constant 0 : i32
    %c0_i32_1 = arith.constant 0 : i32
    return %arg0, %c0_i32, %arg1, %c0_i32_0 : i32, i32, i32, i32
  }
}

</mosaic_0001>

<bundles_post_ra>
// kernel: tpu_custom_call.1
= control target key start
LH: loop header
LB: loop body
LE: loop exit
PB: predicated region body
PF: predicated region fallthrough
CT: control target
= control target key end

     0   :  { %s6521_s0 = inlined_call_operand.vmem [shape: s32[2,24,8], index: 0, kind: input, shape index: {}]   ;;  %s6522_s1 = inlined_call_operand.vmem [shape: f32[8,256,32], index: 1, kind: input, shape index: {}]   ;;  %s6523_s2 = inlined_call_operand.vmem [shape: f32[2,1,32], index: 2, kind: input, shape index: {}]   ;;  %s6524_s3 = inlined_call_operand.vmem [shape: f32[4,1,32], index: 3, kind: input, shape index: {}]   ;;  %s6525_s4 = inlined_call_operand.vmem [shape: f32[4,1,32], index: 4, kind: input, shape index: {}]   ;;  %s6526_s5 = inlined_call_operand.vmem [shape: f32[4,32,128], index: 5, kind: input, shape index: {}]   ;;  %s6527_s6 = inlined_call_operand.vmem [shape: f32[4,3,128], index: 6, kind: input, shape index: {}]   ;;  %s6528_s7 = inlined_call_operand.vmem [shape: f32[4,128,64], index: 7, kind: input, shape index: {}]   ;;  %s6529_s8 = inlined_call_operand.vmem [shape: f32[4,1,64], index: 8, kind: input, shape index: {}]   ;;  %s6530_s9 = inlined_call_operand.vmem [shape: f32[4,64,32], index: 9, kind: input, shape index: {}]   ;;  %s6531_s10 = inlined_call_operand.vmem [shape: f32[32,128], index: 10, kind: input, shape index: {}]   ;;  %s6532_s11 = inlined_call_operand.vmem [shape: f32[1,128], index: 11, kind: input, shape index: {}]   ;;  %s6533_s12 = inlined_call_operand.vmem [shape: f32[8,16,256], index: 12, kind: input, shape index: {}]   ;;  %s6534_s13 = inlined_call_operand.vmem [shape: f32[8,1,256], index: 13, kind: input, shape index: {}]   ;;  %s6535_s14 = inlined_call_operand.hbm [shape: f32[2,8,8,256], index: 14, kind: output, shape index: {}]  }
   0x1   :  { %6540 = sst [smem:[#allocation10_spill]] %s6521_s0 }
   0x2   :  { %19 = vsyncpa [#allocation3], 0 }
   0x3   :  { %21 = vsyncpa [#allocation3 + $0x1], 0  ;;  %s4573_s29 = smov 0   ;;  %s4575_s30 = smov 0  }
   0x4   :  { %s4577_s15 = smov 0   ;;  %s4579_s16 = smov 0  }
   0x5   :  { %s4581_s17 = smov 0   ;;  %s4583_s18 = smov 0  }
   0x6 LB: > { %6541 = sst [smem:[#allocation5_spill]] %s4465_s15  ;;  %s3632_s19 = sadd.s32 4294967295, %s4477_s18   ;;  %s4477_s18 = sphi %s4583_s18, %s27_s18   ;;  %s4473_s17 = sphi %s4581_s17, %s6553_s17   ;;  %s4469_s16 = sphi %s4579_s16, %s6552_s16   ;;  %s4465_s15 = sphi %s4577_s15, %s6556_s15   ;;  %s4461_s30 = sphi %s4575_s30, %s6555_s30   ;;  %s4457_s29 = sphi %s4573_s29, %s6554_s29  }
   0x7   : > { %6542 = sst [smem:[#allocation6_spill]] %s4473_s17  ;;  %s3633_s20 = sadd.s32 4294967294, %s4477_s18  }
   0x8   : > { %s39_s21 = sadd.s32 1, %s4473_s17  ;;  %s352_s22 = sadd.s32 1, %s4465_s15 }
   0x9   : > { %p41_p0 = scmp.ge.s32.totalorder %s39_s21, 2  ;;  %p362_p1 = scmp.ne.s32.totalorder %s4465_s15, %s4461_s30 }
   0xa   : > { %p363_p2 = scmp.eq.s32.totalorder %s3632_s19, 1  ;;  %p368_p3 = scmp.ne.s32.totalorder %s4461_s30, %s4457_s29 }
   0xb   : > { %s6558_s21 = smov (%p41_p0, %s39_s21), 0  ;;  %p369_p5 = scmp.eq.s32.totalorder %s3633_s20, 1 }
   0xc   : > { %6543 = sst [smem:[#allocation7_spill]] %s6558_s21  ;;  %p4613_p4 = por %p363_p2, %p362_p1 }
   0xd   : > { %s347_s24 = ssub.s32 %s4473_s17, %s6558_s21  ;;  %p3636_p6 = scmp.ge.s32.totalorder %s4477_s18, 1 }
   0xe   : > { %p350_p7 = scmp.eq.s32.totalorder %s347_s24, 0  ;;  %p4620_p8 = por %p369_p5, %p368_p3 }
   0xf   : > { %p437_p9 = scmp.lt.s32.totalorder %s4477_s18, 3 }
  0x10   : > { %s6545_s25 = scalar_select %p4620_p8, 1, 0 }
  0x11   : > { %s4626_s26 = scalar_select %p350_p7, %s4465_s15, %s352_s22  }
  0x12   : > { %6546 = sst [smem:[#allocation8_spill]] %s6545_s25  ;;  %p438_p10 = pnand %p3636_p6, %p437_p9 }
  0x13   : > { %6547 = sst [smem:[#allocation9_spill]] %s4626_s26  ;;  %p486_p11 = scmp.lt.s32.totalorder (!%p438_p10), %s4469_s16, 1 }
  0x14   : > { %441 = sbr.rel (%p438_p10) target bundleno = 4079 (0xfef), region = 76  ;;  %s6548_s0 = sld [smem:[#allocation10_spill]] (!%p438_p10) }
  0x15   : > { %s4491_s24 = smov (!%p438_p10), 96   ;;  %s4494_s21 = smov (!%p438_p10), 32  }
  0x16   : > { %s4496_s26 = smov (!%p438_p10), 16   ;;  %s483_s20 = sand.u32 (!%p438_p10), 1, %s4461_s30  }
  0x17   : > { %s4153_s19 = sshll.u32 (!%p438_p10), %s4469_s16, 7 }
  0x19   : > { %v4479_v0 = vmov 0   ;;  %s4632_s27 = scalar_select %p486_p11, %s4469_s16, 1  ;;  %v4480_v4 = vmov 1   ;;  %v4481_v5 = vmov 3   ;;  %v4482_v6 = vmov 2   ;;  %v553_v7 = vld [vmem:[%s6522_s1 + $0x78] sm:$0xff] }
  0x1a   : > { %4229 = vset.pattern.permute.xlu0 %v4479_v0  ;;  %4231 = vset.pattern.permute.xlu1 %v4479_v0  ;;  %v569_v8 = vld [vmem:[%s6522_s1 + $0xf8] sm:$0xff]  ;;  %v552_v9 = vld [vmem:[%s6522_s1 + $0x70] sm:$0xff]  ;;  %v551_v11 = vld [vmem:[%s6522_s1 + $0x68] sm:$0xff]  ;;  %v4483_v14 = vmov 4   ;;  %v4484_v28 = vmov 7   ;;  %v4485_v32 = vmov 5  }
  0x1b   : > { %4233 = vset.pattern.permute.xlu2 %v4479_v0  ;;  %s4154_s28 = smul.u32 24, %s4632_s27  ;;  %682 = vmatpush.msra.mxu2 %v553_v7  ;;  %v568_v10 = vld [vmem:[%s6522_s1 + $0xf0] sm:$0xff]  ;;  %v567_v12 = vld [vmem:[%s6522_s1 + $0xe8] sm:$0xff]  ;;  %v550_v13 = vld [vmem:[%s6522_s1 + $0x60] sm:$0xff]  ;;  %s493_s17 = scalar_lea.vmem %s6523_s2, %s4632_s27 }
  0x1c   : > { %708 = vmatpush.msra.mxu3 %v569_v8  ;;  %v566_v15 = vld [vmem:[%s6522_s1 + $0xe0] sm:$0xff]  ;;  %v549_v16 = vld [vmem:[%s6522_s1 + $0x58] sm:$0xff]  ;;  %v548_v20 = vld [vmem:[%s6522_s1 + $0x50] sm:$0xff]  ;;  %s3531_s16 = scalar_lea.sflag [#allocation3], %s483_s20 }
  0x1d   : > { %s4639_s22 = scalar_lea.vmem %s6548_s0, %s4154_s28  ;;  %683 = vmatpush.msra.mxu2 %v552_v9  ;;  %v565_v17 = vld [vmem:[%s6522_s1 + $0xd8] sm:$0xff]  ;;  %v3668_v21 = vld [vmem:[%s6522_s1 + $0x170] sm:$0xff]  ;;  %v547_v24 = vld [vmem:[%s6522_s1 + $0x48] sm:$0xff]  ;;  %s4492_s28 = smov 112  }
  0x1e   : > { %v4642_v1 = vld [vmem:[%s4639_s22] sm:$0xff]  ;;  %v4645_v2 = vld [vmem:[%s4639_s22 + $0x8] sm:$0xff]  ;;  %v4648_v3 = vld [vmem:[%s4639_s22 + $0x10] sm:$0xff]  ;;  %709 = vmatpush.msra.mxu3 %v568_v10  ;;  %v4486_v10 = vmov 6   ;;  %s4493_s0 = smov 80  }
  0x1f   : > { %512 = vperm.xlu0 %4229, %v4642_v1   ;;  %515 = vperm.xlu1 %4231, %v4645_v2   ;;  %v3669_v18 = vld [vmem:[%s6522_s1 + $0x178] sm:$0xff]  ;;  %v564_v22 = vld [vmem:[%s6522_s1 + $0xd0] sm:$0xff]  ;;  %v3667_v25 = vld [vmem:[%s6522_s1 + $0x168] sm:$0xff] }
  0x20   : > { %518 = vperm.xlu2 %4233, %v4648_v3   ;;  %684 = vmatpush.msra.mxu2 %v551_v11  ;;  %v3685_v19 = vld [vmem:[%s6522_s1 + $0x1f8] sm:$0xff]  ;;  %v3684_v23 = vld [vmem:[%s6522_s1 + $0x1f0] sm:$0xff]  ;;  %v563_v26 = vld [vmem:[%s6522_s1 + $0xc8] sm:$0xff] }
  0x21   : > { %710 = vmatpush.msra.mxu3 %v567_v12  ;;  %630 = vmatpush.msra.mxu0 %v3669_v18  ;;  %v3683_v27 = vld [vmem:[%s6522_s1 + $0x1e8] sm:$0xff]  ;;  %v546_v29 = vld [vmem:[%s6522_s1 + $0x40] sm:$0xff]  ;;  %v545_v34 = vld [vmem:[%s6522_s1 + $0x38] sm:$0xff] }
  0x22   : > { %685 = vmatpush.msra.mxu2 %v550_v13  ;;  %656 = vmatpush.msra.mxu1 %v3685_v19  ;;  %v562_v30 = vld [vmem:[%s6522_s1 + $0xc0] sm:$0xff]  ;;  %v561_v35 = vld [vmem:[%s6522_s1 + $0xb8] sm:$0xff]  ;;  %v544_v38 = vld [vmem:[%s6522_s1 + $0x30] sm:$0xff] }
  0x23   : > { %711 = vmatpush.msra.mxu3 %v566_v15  ;;  %631 = vmatpush.msra.mxu0 %v3668_v21  ;;  %v3666_v31 = vld [vmem:[%s6522_s1 + $0x160] sm:$0xff]  ;;  %v3665_v36 = vld [vmem:[%s6522_s1 + $0x158] sm:$0xff]  ;;  %v560_v39 = vld [vmem:[%s6522_s1 + $0xb0] sm:$0xff] }
  0x24   : > { %686 = vmatpush.msra.mxu2 %v549_v16  ;;  %657 = vmatpush.msra.mxu1 %v3684_v23  ;;  %v3682_v33 = vld [vmem:[%s6522_s1 + $0x1e0] sm:$0xff]  ;;  %v3681_v37 = vld [vmem:[%s6522_s1 + $0x1d8] sm:$0xff]  ;;  %v3664_v40 = vld [vmem:[%s6522_s1 + $0x150] sm:$0xff] }
  0x25   : > { %712 = vmatpush.msra.mxu3 %v565_v17  ;;  %632 = vmatpush.msra.mxu0 %v3667_v25  ;;  %v3680_v41 = vld [vmem:[%s6522_s1 + $0x1d0] sm:$0xff]  ;;  %v543_v42 = vld [vmem:[%s6522_s1 + $0x28] sm:$0xff]  ;;  %v542_v46 = vld [vmem:[%s6522_s1 + $0x20] sm:$0xff] }
  0x26   : > { %687 = vmatpush.msra.mxu2 %v548_v20  ;;  %658 = vmatpush.msra.mxu1 %v3683_v27  ;;  %v559_v43 = vld [vmem:[%s6522_s1 + $0xa8] sm:$0xff]  ;;  %v558_v47 = vld [vmem:[%s6522_s1 + $0xa0] sm:$0xff]  ;;  %v541_v50 = vld [vmem:[%s6522_s1 + $0x18] sm:$0xff] }
  0x27   : > { %4230 = vset.pattern.permute.xlu0 %v4480_v4  ;;  %4232 = vset.pattern.permute.xlu1 %v4480_v4  ;;  %v3663_v44 = vld [vmem:[%s6522_s1 + $0x148] sm:$0xff]  ;;  %v3662_v48 = vld [vmem:[%s6522_s1 + $0x140] sm:$0xff]  ;;  %v557_v51 = vld [vmem:[%s6522_s1 + $0x98] sm:$0xff] }
  0x28   : > { %571 = vperm.xlu0 %4230, %v4642_v1   ;;  %574 = vperm.xlu1 %4232, %v4645_v2   ;;  %v3679_v45 = vld [vmem:[%s6522_s1 + $0x1c8] sm:$0xff]  ;;  %v3678_v49 = vld [vmem:[%s6522_s1 + $0x1c0] sm:$0xff]  ;;  %v3661_v52 = vld [vmem:[%s6522_s1 + $0x138] sm:$0xff] }
  0x29   : > { %4234 = vset.pattern.permute.xlu2 %v4480_v4  ;;  %713 = vmatpush.msra.mxu3 %v564_v22  ;;  %v3677_v53 = vld [vmem:[%s6522_s1 + $0x1b8] sm:$0xff]  ;;  %v540_v54 = vld [vmem:[%s6522_s1 + $0x10] sm:$0xff]  ;;  %v539_v58 = vld [vmem:[%s6522_s1 + $0x8] sm:$0xff] }
  0x2a   : > { %577 = vperm.xlu2 %4234, %v4648_v3   ;;  %688 = vmatpush.msra.mxu2 %v547_v24  ;;  %v556_v55 = vld [vmem:[%s6522_s1 + $0x90] sm:$0xff]  ;;  %v555_v59 = vld [vmem:[%s6522_s1 + $0x88] sm:$0xff]  ;;  %v538_v62 = vld [vmem:[%s6522_s1] sm:$0xff] }
  0x2b   : > { %714 = vmatpush.msra.mxu3 %v563_v26  ;;  %633 = vmatpush.msra.mxu0 %v3666_v31  ;;  %v3660_v56 = vld [vmem:[%s6522_s1 + $0x130] sm:$0xff]  ;;  %v3659_v60 = vld [vmem:[%s6522_s1 + $0x128] sm:$0xff]  ;;  %v554_v63 = vld [vmem:[%s6522_s1 + $0x80] sm:$0xff] }
  0x2c   : > { %689 = vmatpush.msra.mxu2 %v546_v29  ;;  %659 = vmatpush.msra.mxu1 %v3682_v33  ;;  %v3676_v57 = vld [vmem:[%s6522_s1 + $0x1b0] sm:$0xff]  ;;  %v3675_v61 = vld [vmem:[%s6522_s1 + $0x1a8] sm:$0xff]  ;;  %v3658_v4 = vld [vmem:[%s6522_s1 + $0x120] sm:$0xff] }
  0x2d   : > { %715 = vmatpush.msra.mxu3 %v562_v30  ;;  %634 = vmatpush.msra.mxu0 %v3665_v36  ;;  %v3779_v7 = vld [vmem:[%s6522_s1 + $0x3f8] sm:$0xff]  ;;  %v3762_v11 = vld [vmem:[%s6522_s1 + $0x370] sm:$0xff]  ;;  %v3761_v15 = vld [vmem:[%s6522_s1 + $0x368] sm:$0xff] }
  0x2e   : > { %690 = vmatpush.msra.mxu2 %v545_v34  ;;  %660 = vmatpush.msra.mxu1 %v3681_v37  ;;  %v3657_v8 = vld [vmem:[%s6522_s1 + $0x118] sm:$0xff]  ;;  %v3778_v12 = vld [vmem:[%s6522_s1 + $0x3f0] sm:$0xff]  ;;  %v3655_v16 = vld [vmem:[%s6522_s1 + $0x108] sm:$0xff] }
  0x2f   : > { %716 = vmatpush.msra.mxu3 %v561_v35  ;;  %635 = vmatpush.msra.mxu0 %v3664_v40  ;;  %v3673_v9 = vld [vmem:[%s6522_s1 + $0x198] sm:$0xff]  ;;  %v3656_v13 = vld [vmem:[%s6522_s1 + $0x110] sm:$0xff]  ;;  %v3671_v17 = vld [vmem:[%s6522_s1 + $0x188] sm:$0xff] }
  0x30   : > { %4235 = vset.pattern.permute.xlu1 %v4481_v5  ;;  %4237 = vset.pattern.permute.xlu0 %v4481_v5  ;;  %v3760_v18 = vld [vmem:[%s6522_s1 + $0x360] sm:$0xff]  ;;  %v3759_v22 = vld [vmem:[%s6522_s1 + $0x358] sm:$0xff]  ;;  %v3758_v26 = vld [vmem:[%s6522_s1 + $0x350] sm:$0xff] }
  0x31   : > { %850 = vperm.xlu1 %4235, %v4642_v1   ;;  %853 = vperm.xlu0 %4237, %v4645_v2   ;;  %v3776_v19 = vld [vmem:[%s6522_s1 + $0x3e0] sm:$0xff]  ;;  %v3775_v23 = vld [vmem:[%s6522_s1 + $0x3d8] sm:$0xff]  ;;  %v3774_v27 = vld [vmem:[%s6522_s1 + $0x3d0] sm:$0xff] }
  0x32   : > { %4236 = vset.pattern.permute.xlu2 %v4482_v6  ;;  %691 = vmatpush.msra.mxu2 %v544_v38  ;;  %v3654_v20 = vld [vmem:[%s6522_s1 + $0x100] sm:$0xff]  ;;  %v3719_v24 = vld [vmem:[%s6522_s1 + $0x278] sm:$0xff]  ;;  %v3757_v29 = vld [vmem:[%s6522_s1 + $0x348] sm:$0xff] }
  0x33   : > { %735 = vperm.xlu2 %4236, %v4642_v1   ;;  %717 = vmatpush.msra.mxu3 %v560_v39  ;;  %v3670_v21 = vld [vmem:[%s6522_s1 + $0x180] sm:$0xff]  ;;  %v3735_v25 = vld [vmem:[%s6522_s1 + $0x2f8] sm:$0xff]  ;;  %v3773_v30 = vld [vmem:[%s6522_s1 + $0x3c8] sm:$0xff] }
  0x34   : > { %661 = vmatpush.msra.mxu1 %v3680_v41  ;;  %692 = vmatpush.msra.mxu2 %v543_v42  ;;  %v3717_v31 = vld [vmem:[%s6522_s1 + $0x268] sm:$0xff]  ;;  %v3756_v33 = vld [vmem:[%s6522_s1 + $0x340] sm:$0xff]  ;;  %v3755_v37 = vld [vmem:[%s6522_s1 + $0x338] sm:$0xff] }
  0x35   : > { %718 = vmatpush.msra.mxu3 %v559_v43  ;;  %636 = vmatpush.msra.mxu0 %v3663_v44  ;;  %v3772_v34 = vld [vmem:[%s6522_s1 + $0x3c0] sm:$0xff]  ;;  %v3771_v38 = vld [vmem:[%s6522_s1 + $0x3b8] sm:$0xff]  ;;  %v3754_v41 = vld [vmem:[%s6522_s1 + $0x330] sm:$0xff] }
  0x36   : > { %662 = vmatpush.msra.mxu1 %v3679_v45  ;;  %693 = vmatpush.msra.mxu2 %v542_v46  ;;  %v3716_v35 = vld [vmem:[%s6522_s1 + $0x260] sm:$0xff]  ;;  %v3715_v39 = vld [vmem:[%s6522_s1 + $0x258] sm:$0xff]  ;;  %v3770_v42 = vld [vmem:[%s6522_s1 + $0x3b0] sm:$0xff] }
  0x37   : > { %719 = vmatpush.msra.mxu3 %v558_v47  ;;  %637 = vmatpush.msra.mxu0 %v3662_v48  ;;  %v3732_v36 = vld [vmem:[%s6522_s1 + $0x2e0] sm:$0xff]  ;;  %v3731_v40 = vld [vmem:[%s6522_s1 + $0x2d8] sm:$0xff]  ;;  %v3714_v43 = vld [vmem:[%s6522_s1 + $0x250] sm:$0xff] }
  0x38   : > { %663 = vmatpush.msra.mxu1 %v3678_v49  ;;  %694 = vmatpush.msra.mxu2 %v541_v50  ;;  %v3753_v44 = vld [vmem:[%s6522_s1 + $0x328] sm:$0xff]  ;;  %v3752_v48 = vld [vmem:[%s6522_s1 + $0x320] sm:$0xff] }
  0x39   : > { %4238 = vset.pattern.permute.xlu1 %v4482_v6  ;;  %4241 = vset.pattern.permute.xlu0 %v4483_v14  ;;  %v3763_v6 = vld [vmem:[%s6522_s1 + $0x378] sm:$0xff]  ;;  %v3769_v45 = vld [vmem:[%s6522_s1 + $0x3a8] sm:$0xff]  ;;  %v3768_v49 = vld [vmem:[%s6522_s1 + $0x3a0] sm:$0xff] }
  0x3a   : > { %738 = vperm.xlu1 %4238, %v4645_v2   ;;  %965 = vperm.xlu0 %4241, %v4642_v1   ;;  %v3713_v46 = vld [vmem:[%s6522_s1 + $0x248] sm:$0xff]  ;;  %v3712_v50 = vld [vmem:[%s6522_s1 + $0x240] sm:$0xff] }
  0x3b   : > { %4239 = vset.pattern.permute.xlu2 %v4481_v5  ;;  %720 = vmatpush.msra.mxu3 %v557_v51  ;;  %v3674_v5 = vld [vmem:[%s6522_s1 + $0x1a0] sm:$0xff]  ;;  %v3729_v47 = vld [vmem:[%s6522_s1 + $0x2c8] sm:$0xff] }
  0x3c   : > { %856 = vperm.xlu2 %4239, %v4648_v3   ;;  %638 = vmatpush.msra.mxu0 %v3661_v52  ;;  %v3728_v51 = vld [vmem:[%s6522_s1 + $0x2c0] sm:$0xff]  ;;  %v3751_v52 = vld [vmem:[%s6522_s1 + $0x318] sm:$0xff] }
  0x3d   : > { %664 = vmatpush.msra.mxu1 %v3677_v53  ;;  %695 = vmatpush.msra.mxu2 %v540_v54  ;;  %v3767_v53 = vld [vmem:[%s6522_s1 + $0x398] sm:$0xff] }
  0x3e   : > { %721 = vmatpush.msra.mxu3 %v556_v55  ;;  %639 = vmatpush.msra.mxu0 %v3660_v56  ;;  %v3711_v54 = vld [vmem:[%s6522_s1 + $0x238] sm:$0xff]  ;;  %v3750_v56 = vld [vmem:[%s6522_s1 + $0x310] sm:$0xff] }
  0x3f   : > { %665 = vmatpush.msra.mxu1 %v3676_v57  ;;  %696 = vmatpush.msra.mxu2 %v539_v58  ;;  %v3727_v55 = vld [vmem:[%s6522_s1 + $0x2b8] sm:$0xff]  ;;  %v3766_v57 = vld [vmem:[%s6522_s1 + $0x390] sm:$0xff] }
  0x40   : > { %722 = vmatpush.msra.mxu3 %v555_v59  ;;  %640 = vmatpush.msra.mxu0 %v3659_v60  ;;  %v3710_v58 = vld [vmem:[%s6522_s1 + $0x230] sm:$0xff]  ;;  %v3749_v60 = vld [vmem:[%s6522_s1 + $0x308] sm:$0xff] }
  0x41   : > { %666 = vmatpush.msra.mxu1 %v3675_v61  ;;  %697 = vmatpush.msra.mxu2 %v538_v62  ;;  %v3726_v59 = vld [vmem:[%s6522_s1 + $0x2b0] sm:$0xff]  ;;  %v3765_v61 = vld [vmem:[%s6522_s1 + $0x388] sm:$0xff] }
  0x42   : > { %741 = vperm.xlu1 %4238, %v4648_v3   ;;  %4244 = vset.pattern.permute.xlu0 %v4484_v28  ;;  %v3709_v62 = vld [vmem:[%s6522_s1 + $0x228] sm:$0xff] }
  0x43   : > { %1310 = vperm.xlu0 %4244, %v4642_v1   ;;  %723 = vmatpush.msra.mxu3 %v554_v63  ;;  %v3725_v63 = vld [vmem:[%s6522_s1 + $0x2a8] sm:$0xff] }
  0x44   : > { %4240 = vset.pattern.permute.xlu2 %v4485_v32  ;;  %641 = vmatpush.msra.mxu0 %v3658_v4  ;;  %v3748_v4 = vld [vmem:[%s6522_s1 + $0x300] sm:$0xff] }
  0x45   : > { %1080 = vperm.xlu2 %4240, %v4642_v1   ;;  %667 = vmatpush.msra.mxu1 %v3674_v5  ;;  %v3764_v5 = vld [vmem:[%s6522_s1 + $0x380] sm:$0xff] }
  0x46   : > { %909 = vmatpush.msrb.mxu2 %v3763_v6  ;;  %935 = vmatpush.msrb.mxu3 %v3779_v7  ;;  %v3708_v6 = vld [vmem:[%s6522_s1 + $0x220] sm:$0xff] }
  0x47   : > { %642 = vmatpush.msra.mxu0 %v3657_v8  ;;  %668 = vmatpush.msra.mxu1 %v3673_v9  ;;  %v3724_v7 = vld [vmem:[%s6522_s1 + $0x2a0] sm:$0xff]  ;;  %v3707_v8 = vld [vmem:[%s6522_s1 + $0x218] sm:$0xff] }
  0x48   : > { %910 = vmatpush.msrb.mxu2 %v3762_v11  ;;  %936 = vmatpush.msrb.mxu3 %v3778_v12  ;;  %v3723_v9 = vld [vmem:[%s6522_s1 + $0x298] sm:$0xff]  ;;  %v3722_v11 = vld [vmem:[%s6522_s1 + $0x290] sm:$0xff]  ;;  %v3705_v12 = vld [vmem:[%s6522_s1 + $0x208] sm:$0xff] }
  0x49   : > { %643 = vmatpush.msra.mxu0 %v3656_v13  ;;  %v3721_v13 = vld [vmem:[%s6522_s1 + $0x288] sm:$0xff] }
  0x4a   : > { %4242 = vset.pattern.permute.xlu1 %v4485_v32  ;;  %911 = vmatpush.msrb.mxu2 %v3761_v15  ;;  %v3733_v32 = vld [vmem:[%s6522_s1 + $0x2e8] sm:$0xff]  ;;  %v508_v15 = vlaneseq }
  0x4b   : > { %1083 = vperm.xlu1 %4242, %v4645_v2   ;;  %4247 = vset.pattern.permute.xlu0 %v4486_v10 }
  0x4c   : > { %1201 = vperm.xlu0 %4247, %v4648_v3   ;;  %644 = vmatpush.msra.mxu0 %v3655_v16 }
  0x4d   : > { %4243 = vset.pattern.permute.xlu2 %v4483_v14  ;;  %v3672_v14 = vld [vmem:[%s6522_s1 + $0x190] sm:$0xff]  ;;  %912 = vmatpush.msrb.mxu2 %v3760_v18 }
  0x4e   : > { %968 = vperm.xlu2 %4243, %v4645_v2   ;;  %669 = vmatpush.msra.mxu1 %v3672_v14  ;;  %v3704_v14 = vld [vmem:[%s6522_s1 + $0x200] sm:$0xff] }
  0x4f   : > { %645 = vmatpush.msra.mxu0 %v3654_v20  ;;  %913 = vmatpush.msrb.mxu2 %v3759_v22  ;;  %v3867_v20 = vld [vmem:[%s6522_s1 + $0x5f8] sm:$0xff]  ;;  %v3850_v22 = vld [vmem:[%s6522_s1 + $0x570] sm:$0xff] }
  0x50   : > { %670 = vmatpush.msra.mxu1 %v3671_v17 }
  0x51   : > { %794 = vmatpush.msrb.mxu0 %v3719_v24  ;;  %914 = vmatpush.msrb.mxu2 %v3758_v26  ;;  %v3849_v24 = vld [vmem:[%s6522_s1 + $0x568] sm:$0xff] }
  0x52   : > { %671 = vmatpush.msra.mxu1 %v3670_v21  ;;  %v4487_v21 = vmov 1.0  }
  0x53   : > { %1086 = vperm.xlu1 %4242, %v4648_v3   ;;  %915 = vmatpush.msrb.mxu2 %v3757_v29  ;;  %v3847_v29 = vld [vmem:[%s6522_s1 + $0x558] sm:$0xff] }
  0x54   : > { %820 = vmatpush.msrb.mxu1 %v3735_v25  ;;  %4255 = vset.pattern.permute.xlu0 %v4479_v0  ;;  %v3865_v25 = vld [vmem:[%s6522_s1 + $0x5e8] sm:$0xff] }
  0x55   : > { %916 = vmatpush.msrb.mxu2 %v3756_v33  ;;  %v3823_v33 = vld [vmem:[%s6522_s1 + $0x4f8] sm:$0xff] }
  0x56   : > { %971 = vperm.xlu2 %4243, %v4648_v3  }
  0x57   : > { %917 = vmatpush.msrb.mxu2 %v3755_v37  ;;  %v3822_v37 = vld [vmem:[%s6522_s1 + $0x4f0] sm:$0xff] }
  0x59   : > { %918 = vmatpush.msrb.mxu2 %v3754_v41  ;;  %v3821_v41 = vld [vmem:[%s6522_s1 + $0x4e8] sm:$0xff] }
  0x5b   : > { %4245 = vset.pattern.permute.xlu1 %v4486_v10  ;;  %919 = vmatpush.msrb.mxu2 %v3753_v44  ;;  %v3706_v10 = vld [vmem:[%s6522_s1 + $0x210] sm:$0xff]  ;;  %v3804_v44 = vld [vmem:[%s6522_s1 + $0x460] sm:$0xff] }
  0x5c   : > { %1195 = vperm.xlu1 %4245, %v4642_v1   ;;  %v3777_v1 = vld [vmem:[%s6522_s1 + $0x3e8] sm:$0xff] }
  0x5d   : > { %937 = vmatpush.msrb.mxu3 %v3777_v1  ;;  %920 = vmatpush.msrb.mxu2 %v3752_v48  ;;  %v5066_v1 = vand.u32 127, %v508_v15 }
  0x5e   : > { %4246 = vset.pattern.permute.xlu2 %v4484_v28  ;;  %v3734_v28 = vld [vmem:[%s6522_s1 + $0x2f0] sm:$0xff] }
  0x5f   : > { %938 = vmatpush.msrb.mxu3 %v3776_v19  ;;  %1313 = vperm.xlu2 %4246, %v4645_v2   ;;  %v5069_v16 = vadd.s32 128, %v5066_v1  ;;  %v3851_v19 = vld [vmem:[%s6522_s1 + $0x578] sm:$0xff] }
  0x60   : > { %821 = vmatpush.msrb.mxu1 %v3734_v28  ;;  %921 = vmatpush.msrb.mxu2 %v3751_v52  ;;  %v3858_v52 = vld [vmem:[%s6522_s1 + $0x5b0] sm:$0xff] }
  0x61   : > { %939 = vmatpush.msrb.mxu3 %v3775_v23  ;;  %v3866_v23 = vld [vmem:[%s6522_s1 + $0x5f0] sm:$0xff] }
  0x62   : > { %822 = vmatpush.msrb.mxu1 %v3733_v32  ;;  %922 = vmatpush.msrb.mxu2 %v3750_v56  ;;  %v3807_v32 = vld [vmem:[%s6522_s1 + $0x478] sm:$0xff]  ;;  %v3841_v56 = vld [vmem:[%s6522_s1 + $0x528] sm:$0xff] }
  0x63   : > { %940 = vmatpush.msrb.mxu3 %v3774_v27  ;;  %v3848_v27 = vld [vmem:[%s6522_s1 + $0x560] sm:$0xff] }
  0x64   : > { %1198 = vperm.xlu1 %4245, %v4645_v2   ;;  %v3718_v2 = vld [vmem:[%s6522_s1 + $0x270] sm:$0xff]  ;;  %823 = vmatpush.msrb.mxu1 %v3732_v36 }
  0x65   : > { %795 = vmatpush.msrb.mxu0 %v3718_v2  ;;  %941 = vmatpush.msrb.mxu3 %v3773_v30  ;;  %v3864_v2 = vld [vmem:[%s6522_s1 + $0x5e0] sm:$0xff]  ;;  %v3863_v30 = vld [vmem:[%s6522_s1 + $0x5d8] sm:$0xff]  ;;  %v3806_v36 = vld [vmem:[%s6522_s1 + $0x470] sm:$0xff] }
  0x66   : > { %824 = vmatpush.msrb.mxu1 %v3731_v40  ;;  %923 = vmatpush.msrb.mxu2 %v3749_v60  ;;  %v3805_v40 = vld [vmem:[%s6522_s1 + $0x468] sm:$0xff]  ;;  %v3840_v60 = vld [vmem:[%s6522_s1 + $0x520] sm:$0xff] }
  0x67   : > { %796 = vmatpush.msrb.mxu0 %v3717_v31  ;;  %942 = vmatpush.msrb.mxu3 %v3772_v34  ;;  %v3846_v34 = vld [vmem:[%s6522_s1 + $0x550] sm:$0xff] }
  0x68   : > { %1316 = vperm.xlu2 %4246, %v4648_v3   ;;  %v3730_v3 = vld [vmem:[%s6522_s1 + $0x2d0] sm:$0xff]  ;;  %924 = vmatpush.msrb.mxu2 %v3748_v4  ;;  %v3816_v4 = vld [vmem:[%s6522_s1 + $0x4c0] sm:$0xff] }
  0x69   : > { %797 = vmatpush.msrb.mxu0 %v3716_v35  ;;  %943 = vmatpush.msrb.mxu3 %v3771_v38  ;;  %v3862_v35 = vld [vmem:[%s6522_s1 + $0x5d0] sm:$0xff]  ;;  %v3845_v38 = vld [vmem:[%s6522_s1 + $0x548] sm:$0xff] }
  0x6a   : > { %825 = vmatpush.msrb.mxu1 %v3730_v3  ;;  %v3860_v3 = vld [vmem:[%s6522_s1 + $0x5c0] sm:$0xff] }
  0x6b   : > { %798 = vmatpush.msrb.mxu0 %v3715_v39  ;;  %944 = vmatpush.msrb.mxu3 %v3770_v42  ;;  %v3861_v39 = vld [vmem:[%s6522_s1 + $0x5c8] sm:$0xff] }
  0x6c   : > { %826 = vmatpush.msrb.mxu1 %v3729_v47  ;;  %4248 = vset.pattern.permute.xlu1 %v4479_v0  ;;  %v3859_v47 = vld [vmem:[%s6522_s1 + $0x5b8] sm:$0xff] }
  0x6d   : > { %799 = vmatpush.msrb.mxu0 %v3714_v43  ;;  %945 = vmatpush.msrb.mxu3 %v3769_v45  ;;  %v3844_v43 = vld [vmem:[%s6522_s1 + $0x540] sm:$0xff] }
  0x6e   : > { %827 = vmatpush.msrb.mxu1 %v3728_v51  ;;  %v3820_v45 = vld [vmem:[%s6522_s1 + $0x4e0] sm:$0xff]  ;;  %v3842_v51 = vld [vmem:[%s6522_s1 + $0x530] sm:$0xff] }
  0x6f   : > { %800 = vmatpush.msrb.mxu0 %v3713_v46  ;;  %946 = vmatpush.msrb.mxu3 %v3768_v49  ;;  %v3843_v46 = vld [vmem:[%s6522_s1 + $0x538] sm:$0xff] }
  0x70   : > { %828 = vmatpush.msrb.mxu1 %v3727_v55  ;;  %4254 = vset.pattern.permute.xlu2 %v4479_v0  ;;  %v3720_v0 = vld [vmem:[%s6522_s1 + $0x280] sm:$0xff]  ;;  %v3803_v49 = vld [vmem:[%s6522_s1 + $0x458] sm:$0xff] }
  0x71   : > { %801 = vmatpush.msrb.mxu0 %v3712_v50  ;;  %947 = vmatpush.msrb.mxu3 %v3767_v53  ;;  %v3819_v50 = vld [vmem:[%s6522_s1 + $0x4d8] sm:$0xff]  ;;  %v3802_v53 = vld [vmem:[%s6522_s1 + $0x450] sm:$0xff] }
  0x72   : > { %829 = vmatpush.msrb.mxu1 %v3726_v59  ;;  %v3817_v59 = vld [vmem:[%s6522_s1 + $0x4c8] sm:$0xff] }
  0x73   : > { %802 = vmatpush.msrb.mxu0 %v3711_v54  ;;  %948 = vmatpush.msrb.mxu3 %v3766_v57  ;;  %v3818_v54 = vld [vmem:[%s6522_s1 + $0x4d0] sm:$0xff]  ;;  %v3857_v57 = vld [vmem:[%s6522_s1 + $0x5a8] sm:$0xff] }
  0x74   : > { %830 = vmatpush.msrb.mxu1 %v3725_v63  ;;  %v3800_v63 = vld [vmem:[%s6522_s1 + $0x440] sm:$0xff] }
  0x75   : > { %803 = vmatpush.msrb.mxu0 %v3710_v58  ;;  %949 = vmatpush.msrb.mxu3 %v3765_v61  ;;  %v3801_v58 = vld [vmem:[%s6522_s1 + $0x448] sm:$0xff]  ;;  %v3856_v61 = vld [vmem:[%s6522_s1 + $0x5a0] sm:$0xff] }
  0x76   : > { %831 = vmatpush.msrb.mxu1 %v3724_v7  ;;  %v3799_v7 = vld [vmem:[%s6522_s1 + $0x438] sm:$0xff] }
  0x77   : > { %804 = vmatpush.msrb.mxu0 %v3709_v62  ;;  %950 = vmatpush.msrb.mxu3 %v3764_v5  ;;  %v3839_v5 = vld [vmem:[%s6522_s1 + $0x518] sm:$0xff] }
  0x78   : > { %832 = vmatpush.msrb.mxu1 %v3723_v9  ;;  %v3838_v9 = vld [vmem:[%s6522_s1 + $0x510] sm:$0xff] }
  0x79   : > { %805 = vmatpush.msrb.mxu0 %v3708_v6  ;;  %v3855_v6 = vld [vmem:[%s6522_s1 + $0x598] sm:$0xff] }
  0x7a   : > { %833 = vmatpush.msrb.mxu1 %v3722_v11  ;;  %v519_v26 = vpop.permute.xlu2 %518  ;;  %v3798_v11 = vld [vmem:[%s6522_s1 + $0x430] sm:$0xff] }
  0x7b   : > { %806 = vmatpush.msrb.mxu0 %v3707_v8  ;;  %vm524_vm6 = vcmp.eq.s32.totalorder %v5066_v1, %v519_v26  ;;  %vm525_vm7 = vcmp.eq.s32.totalorder %v5069_v16, %v519_v26  ;;  %v3815_v8 = vld [vmem:[%s6522_s1 + $0x4b8] sm:$0xff] }
  0x7c   : > { %834 = vmatpush.msrb.mxu1 %v3721_v13  ;;  %v3955_v26 = vld [vmem:[%s6522_s1 + $0x7f8] sm:$0xff] }
  0x7d   : > { %807 = vmatpush.msrb.mxu0 %v3706_v10  ;;  %v3854_v10 = vld [vmem:[%s6522_s1 + $0x590] sm:$0xff] }
  0x7e   : > { %835 = vmatpush.msrb.mxu1 %v3720_v0  ;;  %v3853_v0 = vld [vmem:[%s6522_s1 + $0x588] sm:$0xff] }
  0x7f   : > { %808 = vmatpush.msrb.mxu0 %v3705_v12  ;;  %v3814_v12 = vld [vmem:[%s6522_s1 + $0x4b0] sm:$0xff] }
  0x81   : > { %809 = vmatpush.msrb.mxu0 %v3704_v14  ;;  %v3837_v14 = vld [vmem:[%s6522_s1 + $0x508] sm:$0xff] }
  0x84   : > { %v578_v42 = vpop.permute.xlu2 %577 }
  0x85   : > { %vm583_vm12 = vcmp.eq.s32.totalorder %v5066_v1, %v578_v42  ;;  %vm584_vm13 = vcmp.eq.s32.totalorder %v5069_v16, %v578_v42  ;;  %v3935_v42 = vld [vmem:[%s6522_s1 + $0x758] sm:$0xff] }
  0x8d   : > { %v736_v55 = vpop.permute.xlu2 %735 }
  0x91   : > { %v513_v17 = vpop.permute.xlu0 %512  ;;  %v516_v18 = vpop.permute.xlu1 %515 }
  0x92   : > { %vm520_vm0 = vcmp.eq.s32.totalorder %v5066_v1, %v513_v17  ;;  %vm521_vm1 = vcmp.eq.s32.totalorder %v5069_v16, %v513_v17  ;;  %vm522_vm2 = vcmp.eq.s32.totalorder %v5066_v1, %v516_v18  ;;  %vm523_vm3 = vcmp.eq.s32.totalorder %v5069_v16, %v516_v18  ;;  %v3797_v17 = vld [vmem:[%s6522_s1 + $0x428] sm:$0xff] }
  0x93   : > { %3692 = vmatmul.msk.f32.vlgmr.msra.gmra.mxu2 %vm520_vm0, %v4487_v21  ;;  %3695 = vmatmul.msk.f32.vlgmr.msra.gmra.mxu3 %vm521_vm1, %v4487_v21  ;;  %vm743_vm0 = vcmp.eq.s32.totalorder %v5066_v1, %v736_v55  ;;  %vm744_vm1 = vcmp.eq.s32.totalorder %v5069_v16, %v736_v55  ;;  %v3813_v18 = vld [vmem:[%s6522_s1 + $0x4a8] sm:$0xff]  ;;  %v3948_v55 = vld [vmem:[%s6522_s1 + $0x7c0] sm:$0xff] }
  0x94   : > { %1139 = vmatpush.msra.mxu2 %v3851_v19  ;;  %1165 = vmatpush.msra.mxu3 %v3867_v20  ;;  %v3836_v19 = vld [vmem:[%s6522_s1 + $0x500] sm:$0xff] }
  0x95   : > { %v3852_v20 = vld [vmem:[%s6522_s1 + $0x580] sm:$0xff] }
  0x96   : > { %1140 = vmatpush.msra.mxu2 %v3850_v22  ;;  %1166 = vmatpush.msra.mxu3 %v3866_v23  ;;  %v857_v13 = vpop.permute.xlu2 %856  ;;  %v3796_v23 = vld [vmem:[%s6522_s1 + $0x420] sm:$0xff] }
  0x98   : > { %1141 = vmatpush.msra.mxu2 %v3849_v24  ;;  %1167 = vmatpush.msra.mxu3 %v3865_v25  ;;  %v3812_v24 = vld [vmem:[%s6522_s1 + $0x4a0] sm:$0xff]  ;;  %v3939_v25 = vld [vmem:[%s6522_s1 + $0x778] sm:$0xff] }
  0x9a   : > { %v572_v28 = vpop.permute.xlu0 %571  ;;  %1142 = vmatpush.msra.mxu2 %v3848_v27  ;;  %1168 = vmatpush.msra.mxu3 %v3864_v2  ;;  %v575_v31 = vpop.permute.xlu1 %574  ;;  %v3795_v27 = vld [vmem:[%s6522_s1 + $0x418] sm:$0xff] }
  0x9b   : > { %3693 = vmatmul.msk.f32.gmra.mxu2 %vm522_vm2, %v4487_v21  ;;  %3696 = vmatmul.msk.f32.gmra.mxu3 %vm523_vm3, %v4487_v21  ;;  %vm579_vm4 = vcmp.eq.s32.totalorder %v5066_v1, %v572_v28  ;;  %vm580_vm5 = vcmp.eq.s32.totalorder %v5069_v16, %v572_v28  ;;  %vm581_vm8 = vcmp.eq.s32.totalorder %v5066_v1, %v575_v31  ;;  %v3811_v2 = vld [vmem:[%s6522_s1 + $0x498] sm:$0xff]  ;;  %v3938_v28 = vld [vmem:[%s6522_s1 + $0x770] sm:$0xff] }
  0x9c   : > { %3686 = vmatmul.msk.f32.vlgmr.msra.gmra.mxu0 %vm579_vm4, %v4487_v21  ;;  %3689 = vmatmul.msk.f32.vlgmr.msra.gmra.mxu1 %vm580_vm5, %v4487_v21  ;;  %vm582_vm9 = vcmp.eq.s32.totalorder %v5069_v16, %v575_v31  ;;  %vm862_vm2 = vcmp.eq.s32.totalorder %v5066_v1, %v857_v13  ;;  %vm863_vm3 = vcmp.eq.s32.totalorder %v5069_v16, %v857_v13  ;;  %v3810_v31 = vld [vmem:[%s6522_s1 + $0x490] sm:$0xff]  ;;  %v3928_v13 = vld [vmem:[%s6522_s1 + $0x720] sm:$0xff] }
  0x9d   : > { %1143 = vmatpush.msra.mxu2 %v3847_v29  ;;  %1169 = vmatpush.msra.mxu3 %v3863_v30  ;;  %v3954_v29 = vld [vmem:[%s6522_s1 + $0x7f0] sm:$0xff] }
  0x9e   : > { %1024 = vmatpush.msra.mxu0 %v3807_v32  ;;  %1050 = vmatpush.msra.mxu1 %v3823_v33  ;;  %v3794_v30 = vld [vmem:[%s6522_s1 + $0x410] sm:$0xff]  ;;  %v3937_v32 = vld [vmem:[%s6522_s1 + $0x768] sm:$0xff] }
  0x9f   : > { %1144 = vmatpush.msra.mxu2 %v3846_v34  ;;  %1170 = vmatpush.msra.mxu3 %v3862_v35  ;;  %v3953_v33 = vld [vmem:[%s6522_s1 + $0x7e8] sm:$0xff]  ;;  %v1081_v34 = vpop.permute.xlu2 %1080 }
  0xa0   : > { %1025 = vmatpush.msra.mxu0 %v3806_v36  ;;  %1051 = vmatpush.msra.mxu1 %v3822_v37  ;;  %v3793_v35 = vld [vmem:[%s6522_s1 + $0x408] sm:$0xff]  ;;  %v3936_v37 = vld [vmem:[%s6522_s1 + $0x760] sm:$0xff] }
  0xa1   : > { %1145 = vmatpush.msra.mxu2 %v3845_v38  ;;  %1171 = vmatpush.msra.mxu3 %v3861_v39  ;;  %v3809_v36 = vld [vmem:[%s6522_s1 + $0x488] sm:$0xff]  ;;  %v3952_v38 = vld [vmem:[%s6522_s1 + $0x7e0] sm:$0xff] }
  0xa2   : > { %1026 = vmatpush.msra.mxu0 %v3805_v40  ;;  %1052 = vmatpush.msra.mxu1 %v3821_v41  ;;  %v3792_v40 = vld [vmem:[%s6522_s1 + $0x400] sm:$0xff] }
  0xa3   : > { %3694 = vmatmul.msk.f32.gmra.mxu2 %vm524_vm6, %v4487_v21  ;;  %3697 = vmatmul.msk.f32.gmra.mxu3 %vm525_vm7, %v4487_v21  ;;  %v851_v48 = vpop.permute.xlu1 %850  ;;  %v854_v62 = vpop.permute.xlu0 %853  ;;  %vm1088_vm6 = vcmp.eq.s32.totalorder %v5066_v1, %v1081_v34  ;;  %vm1089_vm7 = vcmp.eq.s32.totalorder %v5069_v16, %v1081_v34  ;;  %v3808_v41 = vld [vmem:[%s6522_s1 + $0x480] sm:$0xff] }
  0xa4   : > { %3687 = vmatmul.msk.f32.gmra.mxu0 %vm581_vm8, %v4487_v21  ;;  %3690 = vmatmul.msk.f32.gmra.mxu1 %vm582_vm9, %v4487_v21  ;;  %vm858_vm10 = vcmp.eq.s32.totalorder %v5066_v1, %v851_v48  ;;  %vm859_vm11 = vcmp.eq.s32.totalorder %v5069_v16, %v851_v48  ;;  %vm860_vm14 = vcmp.eq.s32.totalorder %v5066_v1, %v854_v62  ;;  %v3910_v48 = vld [vmem:[%s6522_s1 + $0x6f0] sm:$0xff]  ;;  %v3884_v34 = vld [vmem:[%s6522_s1 + $0x620] sm:$0xff] }
  0xa5   : > { %1146 = vmatpush.msra.mxu2 %v3844_v43  ;;  %1172 = vmatpush.msra.mxu3 %v3860_v3  ;;  %vm861_vm15 = vcmp.eq.s32.totalorder %v5069_v16, %v854_v62  ;;  %v3951_v43 = vld [vmem:[%s6522_s1 + $0x7d8] sm:$0xff] }
  0xa6   : > { %1027 = vmatpush.msra.mxu0 %v3804_v44  ;;  %1053 = vmatpush.msra.mxu1 %v3820_v45  ;;  %v3895_v3 = vld [vmem:[%s6522_s1 + $0x678] sm:$0xff]  ;;  %v3934_v45 = vld [vmem:[%s6522_s1 + $0x750] sm:$0xff] }
  0xa7   : > { %1147 = vmatpush.msra.mxu2 %v3843_v46  ;;  %1173 = vmatpush.msra.mxu3 %v3859_v47  ;;  %v3911_v44 = vld [vmem:[%s6522_s1 + $0x6f8] sm:$0xff]  ;;  %v3950_v46 = vld [vmem:[%s6522_s1 + $0x7d0] sm:$0xff] }
  0xa8   : > { %1028 = vmatpush.msra.mxu0 %v3803_v49  ;;  %1054 = vmatpush.msra.mxu1 %v3819_v50  ;;  %v3894_v47 = vld [vmem:[%s6522_s1 + $0x670] sm:$0xff]  ;;  %v3933_v49 = vld [vmem:[%s6522_s1 + $0x748] sm:$0xff]  ;;  %v3907_v62 = vld [vmem:[%s6522_s1 + $0x6d8] sm:$0xff] }
  0xa9   : > { %1148 = vmatpush.msra.mxu2 %v3842_v51  ;;  %1174 = vmatpush.msra.mxu3 %v3858_v52  ;;  %v3949_v50 = vld [vmem:[%s6522_s1 + $0x7c8] sm:$0xff] }
  0xaa   : > { %1029 = vmatpush.msra.mxu0 %v3802_v53  ;;  %1055 = vmatpush.msra.mxu1 %v3818_v54  ;;  %v3893_v51 = vld [vmem:[%s6522_s1 + $0x668] sm:$0xff]  ;;  %v3932_v54 = vld [vmem:[%s6522_s1 + $0x740] sm:$0xff] }
  0xab   : > { %3780 = vmatmul.msk.f32.vlgmr.msrb.gmra.mxu2 %vm858_vm10, %v4487_v21  ;;  %3783 = vmatmul.msk.f32.vlgmr.msrb.gmra.mxu3 %vm859_vm11, %v4487_v21  ;;  %v3909_v52 = vld [vmem:[%s6522_s1 + $0x6e8] sm:$0xff] }
  0xac   : > { %3688 = vmatmul.msk.f32.gmra.mxu0 %vm583_vm12, %v4487_v21  ;;  %3691 = vmatmul.msk.f32.gmra.mxu1 %vm584_vm13, %v4487_v21  ;;  %v739_v22 = vpop.permute.xlu1 %738 }
  0xad   : > { %1149 = vmatpush.msra.mxu2 %v3841_v56  ;;  %1175 = vmatpush.msra.mxu3 %v3857_v57  ;;  %vm745_vm4 = vcmp.eq.s32.totalorder %v5066_v1, %v739_v22  ;;  %vm746_vm5 = vcmp.eq.s32.totalorder %v5069_v16, %v739_v22  ;;  %v966_v56 = vpop.permute.xlu0 %965  ;;  %v3892_v57 = vld [vmem:[%s6522_s1 + $0x660] sm:$0xff]  ;;  %v3903_v22 = vld [vmem:[%s6522_s1 + $0x6b8] sm:$0xff] }
  0xae   : > { %1030 = vmatpush.msra.mxu0 %v3801_v58  ;;  %1056 = vmatpush.msra.mxu1 %v3817_v59  ;;  %v3908_v58 = vld [vmem:[%s6522_s1 + $0x6e0] sm:$0xff]  ;;  %vm973_vm12 = vcmp.eq.s32.totalorder %v5066_v1, %v966_v56  ;;  %vm974_vm13 = vcmp.eq.s32.totalorder %v5069_v16, %v966_v56  ;;  %v3931_v59 = vld [vmem:[%s6522_s1 + $0x738] sm:$0xff] }
  0xaf   : > { %1150 = vmatpush.msra.mxu2 %v3840_v60  ;;  %1176 = vmatpush.msra.mxu3 %v3856_v61  ;;  %v3947_v60 = vld [vmem:[%s6522_s1 + $0x7b8] sm:$0xff] }
  0xb0   : > { %1031 = vmatpush.msra.mxu0 %v3800_v63  ;;  %1057 = vmatpush.msra.mxu1 %v3816_v4  ;;  %v3891_v61 = vld [vmem:[%s6522_s1 + $0x658] sm:$0xff]  ;;  %v3930_v63 = vld [vmem:[%s6522_s1 + $0x730] sm:$0xff] }
  0xb1   : > { %1151 = vmatpush.msra.mxu2 %v3839_v5  ;;  %1177 = vmatpush.msra.mxu3 %v3855_v6  ;;  %v3946_v4 = vld [vmem:[%s6522_s1 + $0x7b0] sm:$0xff] }
  0xb2   : > { %1032 = vmatpush.msra.mxu0 %v3799_v7  ;;  %1058 = vmatpush.msra.mxu1 %v3815_v8  ;;  %v3890_v5 = vld [vmem:[%s6522_s1 + $0x650] sm:$0xff]  ;;  %v3929_v7 = vld [vmem:[%s6522_s1 + $0x728] sm:$0xff] }
  0xb3   : > { %3781 = vmatmul.msk.f32.gmra.mxu2 %vm860_vm14, %v4487_v21  ;;  %3784 = vmatmul.msk.f32.gmra.mxu3 %vm861_vm15, %v4487_v21  ;;  %v3906_v6 = vld [vmem:[%s6522_s1 + $0x6d0] sm:$0xff]  ;;  %v3945_v8 = vld [vmem:[%s6522_s1 + $0x7a8] sm:$0xff] }
  0xb4   : > { %3736 = vmatmul.msk.f32.vlgmr.msrb.gmra.mxu0 %vm743_vm0, %v4487_v21  ;;  %3739 = vmatmul.msk.f32.vlgmr.msrb.gmra.mxu1 %vm744_vm1, %v4487_v21  ;;  %v742_v39 = vpop.permute.xlu1 %741 }
  0xb5   : > { %1152 = vmatpush.msra.mxu2 %v3838_v9  ;;  %1178 = vmatpush.msra.mxu3 %v3854_v10  ;;  %vm747_vm8 = vcmp.eq.s32.totalorder %v5066_v1, %v742_v39  ;;  %vm748_vm9 = vcmp.eq.s32.totalorder %v5069_v16, %v742_v39  ;;  %v3889_v9 = vld [vmem:[%s6522_s1 + $0x648] sm:$0xff]  ;;  %v3898_v39 = vld [vmem:[%s6522_s1 + $0x690] sm:$0xff] }
  0xb6   : > { %1033 = vmatpush.msra.mxu0 %v3798_v11  ;;  %1059 = vmatpush.msra.mxu1 %v3814_v12  ;;  %v3905_v10 = vld [vmem:[%s6522_s1 + $0x6c8] sm:$0xff]  ;;  %v969_v11 = vpop.permute.xlu2 %968 }
  0xb7   : > { %1153 = vmatpush.msra.mxu2 %v3837_v14  ;;  %1179 = vmatpush.msra.mxu3 %v3853_v0  ;;  %v3944_v14 = vld [vmem:[%s6522_s1 + $0x7a0] sm:$0xff]  ;;  %vm975_vm14 = vcmp.eq.s32.totalorder %v5066_v1, %v969_v11  ;;  %vm976_vm1 = vcmp.eq.s32.totalorder %v5069_v16, %v969_v11 }
  0xb8   : > { %1034 = vmatpush.msra.mxu0 %v3797_v17  ;;  %1060 = vmatpush.msra.mxu1 %v3813_v18  ;;  %v3888_v0 = vld [vmem:[%s6522_s1 + $0x640] sm:$0xff]  ;;  %v3927_v18 = vld [vmem:[%s6522_s1 + $0x718] sm:$0xff] }
  0xb9   : > { %1154 = vmatpush.msra.mxu2 %v3836_v19  ;;  %1180 = vmatpush.msra.mxu3 %v3852_v20  ;;  %v3904_v17 = vld [vmem:[%s6522_s1 + $0x6c0] sm:$0xff]  ;;  %v3943_v19 = vld [vmem:[%s6522_s1 + $0x798] sm:$0xff] }
  0xba   : > { %1035 = vmatpush.msra.mxu0 %v3796_v23  ;;  %1061 = vmatpush.msra.mxu1 %v3812_v24  ;;  %v3887_v20 = vld [vmem:[%s6522_s1 + $0x638] sm:$0xff]  ;;  %v3926_v23 = vld [vmem:[%s6522_s1 + $0x710] sm:$0xff] }
  0xbb   : > { %3782 = vmatmul.msk.f32.gmra.mxu2 %vm862_vm2, %v4487_v21  ;;  %3785 = vmatmul.msk.f32.gmra.mxu3 %vm863_vm3, %v4487_v21  ;;  %v3942_v24 = vld [vmem:[%s6522_s1 + $0x790] sm:$0xff] }
  0xbc   : > { %3737 = vmatmul.msk.f32.gmra.mxu0 %vm745_vm4, %v4487_v21  ;;  %3740 = vmatmul.msk.f32.gmra.mxu1 %vm746_vm5, %v4487_v21 }
  0xbd   : > { %1369 = vmatpush.msrb.mxu2 %v3939_v25  ;;  %1395 = vmatpush.msrb.mxu3 %v3955_v26  ;;  %v1084_v53 = vpop.permute.xlu1 %1083  ;;  %v3886_v25 = vld [vmem:[%s6522_s1 + $0x630] sm:$0xff] }
  0xbe   : > { %1036 = vmatpush.msra.mxu0 %v3795_v27  ;;  %1062 = vmatpush.msra.mxu1 %v3811_v2  ;;  %vm1090_vm10 = vcmp.eq.s32.totalorder %v5066_v1, %v1084_v53  ;;  %vm1091_vm11 = vcmp.eq.s32.totalorder %v5069_v16, %v1084_v53  ;;  %v3902_v26 = vld [vmem:[%s6522_s1 + $0x6b0] sm:$0xff]  ;;  %v3925_v27 = vld [vmem:[%s6522_s1 + $0x708] sm:$0xff] }
  0xbf   : > { %1370 = vmatpush.msrb.mxu2 %v3938_v28  ;;  %1396 = vmatpush.msrb.mxu3 %v3954_v29  ;;  %v3941_v2 = vld [vmem:[%s6522_s1 + $0x788] sm:$0xff] }
  0xc0   : > { %1037 = vmatpush.msra.mxu0 %v3794_v30  ;;  %1063 = vmatpush.msra.mxu1 %v3810_v31  ;;  %v3885_v28 = vld [vmem:[%s6522_s1 + $0x628] sm:$0xff]  ;;  %v1311_v30 = vpop.permute.xlu0 %1310  ;;  %v972_v31 = vpop.permute.xlu2 %971 }
  0xc1   : > { %1371 = vmatpush.msrb.mxu2 %v3937_v32  ;;  %1397 = vmatpush.msrb.mxu3 %v3953_v33  ;;  %v3901_v29 = vld [vmem:[%s6522_s1 + $0x6a8] sm:$0xff]  ;;  %v3924_v32 = vld [vmem:[%s6522_s1 + $0x700] sm:$0xff]  ;;  %vm1318_vm2 = vcmp.eq.s32.totalorder %v5066_v1, %v1311_v30  ;;  %vm1319_vm3 = vcmp.eq.s32.totalorder %v5069_v16, %v1311_v30  ;;  %vm977_vm4 = vcmp.eq.s32.totalorder %v5066_v1, %v972_v31 }
  0xc2   : > { %1038 = vmatpush.msra.mxu0 %v3793_v35  ;;  %1064 = vmatpush.msra.mxu1 %v3809_v36  ;;  %v3940_v33 = vld [vmem:[%s6522_s1 + $0x780] sm:$0xff]  ;;  %v3883_v36 = vld [vmem:[%s6522_s1 + $0x618] sm:$0xff]  ;;  %vm978_vm5 = vcmp.eq.s32.totalorder %v5069_v16, %v972_v31 }
  0xc3   : > { %1372 = vmatpush.msrb.mxu2 %v3936_v37  ;;  %1398 = vmatpush.msrb.mxu3 %v3952_v38  ;;  %v3900_v35 = vld [vmem:[%s6522_s1 + $0x6a0] sm:$0xff]  ;;  %v3899_v37 = vld [vmem:[%s6522_s1 + $0x698] sm:$0xff]  ;;  %v3882_v38 = vld [vmem:[%s6522_s1 + $0x610] sm:$0xff] }
  0xc4   : > { %3868 = vmatmul.msk.f32.vlgmr.msra.gmra.mxu2 %vm1088_vm6, %v4487_v21  ;;  %3871 = vmatmul.msk.f32.vlgmr.msra.gmra.mxu3 %vm1089_vm7, %v4487_v21 }
  0xc5   : > { %3738 = vmatmul.msk.f32.gmra.mxu0 %vm747_vm8, %v4487_v21  ;;  %3741 = vmatmul.msk.f32.gmra.mxu1 %vm748_vm9, %v4487_v21  ;;  %v1087_v12 = vpop.permute.xlu1 %1086 }
  0xc6   : > { %1039 = vmatpush.msra.mxu0 %v3792_v40  ;;  %1065 = vmatpush.msra.mxu1 %v3808_v41  ;;  %vm1092_vm15 = vcmp.eq.s32.totalorder %v5066_v1, %v1087_v12  ;;  %vm1093_vm0 = vcmp.eq.s32.totalorder %v5069_v16, %v1087_v12  ;;  %v3881_v41 = vld [vmem:[%s6522_s1 + $0x608] sm:$0xff] }
  0xc7   : > { %1373 = vmatpush.msrb.mxu2 %v3935_v42  ;;  %1399 = vmatpush.msrb.mxu3 %v3951_v43  ;;  %v3897_v42 = vld [vmem:[%s6522_s1 + $0x688] sm:$0xff] }
  0xc8   : > { %1254 = vmatpush.msrb.mxu0 %v3895_v3  ;;  %1280 = vmatpush.msrb.mxu1 %v3911_v44  ;;  %v1314_v40 = vpop.permute.xlu2 %1313  ;;  %v3880_v3 = vld [vmem:[%s6522_s1 + $0x600] sm:$0xff] }
  0xc9   : > { %1374 = vmatpush.msrb.mxu2 %v3934_v45  ;;  %1400 = vmatpush.msrb.mxu3 %v3950_v46  ;;  %v3896_v44 = vld [vmem:[%s6522_s1 + $0x680] sm:$0xff]  ;;  %vm1320_vm6 = vcmp.eq.s32.totalorder %v5066_v1, %v1314_v40  ;;  %vm1321_vm7 = vcmp.eq.s32.totalorder %v5069_v16, %v1314_v40 }
  0xca   : > { %1255 = vmatpush.msrb.mxu0 %v3894_v47  ;;  %1281 = vmatpush.msrb.mxu1 %v3910_v48  ;;  %v1202_v47 = vpop.permute.xlu0 %1201 }
  0xcb   : > { %1375 = vmatpush.msrb.mxu2 %v3933_v49  ;;  %1401 = vmatpush.msrb.mxu3 %v3949_v50 }
  0xcc   : > { %1256 = vmatpush.msrb.mxu0 %v3893_v51  ;;  %1282 = vmatpush.msrb.mxu1 %v3909_v52 }
  0xcd   : > { %1376 = vmatpush.msrb.mxu2 %v3932_v54  ;;  %1402 = vmatpush.msrb.mxu3 %v3948_v55 }
  0xce   : > { %3869 = vmatmul.msk.f32.gmra.mxu2 %vm1090_vm10, %v4487_v21  ;;  %3872 = vmatmul.msk.f32.gmra.mxu3 %vm1091_vm11, %v4487_v21  ;;  %v1196_v43 = vpop.permute.xlu1 %1195 }
  0xcf   : > { %1257 = vmatpush.msrb.mxu0 %v3892_v57  ;;  %1283 = vmatpush.msrb.mxu1 %v3908_v58  ;;  %vm1203_vm8 = vcmp.eq.s32.totalorder %v5066_v1, %v1196_v43  ;;  %vm1204_vm9 = vcmp.eq.s32.totalorder %v5069_v16, %v1196_v43 }
  0xd0   : > { %3824 = vmatmul.msk.f32.vlgmr.msra.gmra.mxu0 %vm973_vm12, %v4487_v21  ;;  %3827 = vmatmul.msk.f32.vlgmr.msra.gmra.mxu1 %vm974_vm13, %v4487_v21  ;;  %v1317_v45 = vpop.permute.xlu2 %1316 }
  0xd1   : > { %1377 = vmatpush.msrb.mxu2 %v3931_v59  ;;  %1403 = vmatpush.msrb.mxu3 %v3947_v60  ;;  %vm1322_vm10 = vcmp.eq.s32.totalorder %v5066_v1, %v1317_v45  ;;  %vm1323_vm11 = vcmp.eq.s32.totalorder %v5069_v16, %v1317_v45 }
  0xd2   : > { %1258 = vmatpush.msrb.mxu0 %v3891_v61  ;;  %1284 = vmatpush.msrb.mxu1 %v3907_v62 }
  0xd3   : > { %1378 = vmatpush.msrb.mxu2 %v3930_v63  ;;  %1404 = vmatpush.msrb.mxu3 %v3946_v4 }
  0xd4   : > { %1259 = vmatpush.msrb.mxu0 %v3890_v5  ;;  %1285 = vmatpush.msrb.mxu1 %v3906_v6 }
  0xd5   : > { %1379 = vmatpush.msrb.mxu2 %v3929_v7  ;;  %1405 = vmatpush.msrb.mxu3 %v3945_v8 }
  0xd6   : > { %1260 = vmatpush.msrb.mxu0 %v3889_v9  ;;  %1286 = vmatpush.msrb.mxu1 %v3905_v10  ;;  %v1199_v46 = vpop.permute.xlu1 %1198 }
  0xd7   : > { %1380 = vmatpush.msrb.mxu2 %v3928_v13  ;;  %1406 = vmatpush.msrb.mxu3 %v3944_v14  ;;  %vm1205_vm12 = vcmp.eq.s32.totalorder %v5066_v1, %v1199_v46  ;;  %vm1206_vm13 = vcmp.eq.s32.totalorder %v5069_v16, %v1199_v46 }
  0xd8   : > { %3870 = vmatmul.msk.f32.gmra.mxu2 %vm1092_vm15, %v4487_v21  ;;  %3873 = vmatmul.msk.f32.gmra.mxu3 %vm1093_vm0, %v4487_v21  ;;  %vm1208_vm15 = vcmp.eq.s32.totalorder %v5069_v16, %v1202_v47  ;;  %vm1434_vm0 = vcmask 261120  }
  0xd9   : > { %1261 = vmatpush.msrb.mxu0 %v3888_v0  ;;  %1287 = vmatpush.msrb.mxu1 %v3904_v17 }
  0xda   : > { %3825 = vmatmul.msk.f32.gmra.mxu0 %vm975_vm14, %v4487_v21  ;;  %3828 = vmatmul.msk.f32.gmra.mxu1 %vm976_vm1, %v4487_v21  ;;  %vm1207_vm14 = vcmp.eq.s32.totalorder %v5066_v1, %v1202_v47 }
  0xdb   : > { %1381 = vmatpush.msrb.mxu2 %v3927_v18  ;;  %1407 = vmatpush.msrb.mxu3 %v3943_v19 }
  0xdc   : > { %1262 = vmatpush.msrb.mxu0 %v3887_v20  ;;  %1288 = vmatpush.msrb.mxu1 %v3903_v22 }
  0xdd   : > { %1382 = vmatpush.msrb.mxu2 %v3926_v23  ;;  %1408 = vmatpush.msrb.mxu3 %v3942_v24 }
  0xde   : > { %1263 = vmatpush.msrb.mxu0 %v3886_v25  ;;  %1289 = vmatpush.msrb.mxu1 %v3902_v26 }
  0xdf   : > { %1383 = vmatpush.msrb.mxu2 %v3925_v27  ;;  %1409 = vmatpush.msrb.mxu3 %v3941_v2 }
  0xe0   : > { %1264 = vmatpush.msrb.mxu0 %v3885_v28  ;;  %1290 = vmatpush.msrb.mxu1 %v3901_v29 }
  0xe1   : > { %1384 = vmatpush.msrb.mxu2 %v3924_v32  ;;  %1410 = vmatpush.msrb.mxu3 %v3940_v33 }
  0xe2   : > { %1265 = vmatpush.msrb.mxu0 %v3884_v34  ;;  %1291 = vmatpush.msrb.mxu1 %v3900_v35 }
  0xe3   : > { %3956 = vmatmul.msk.f32.vlgmr.msrb.gmra.mxu2 %vm1318_vm2, %v4487_v21  ;;  %3959 = vmatmul.msk.f32.vlgmr.msrb.gmra.mxu3 %vm1319_vm3, %v4487_v21 }
  0xe4   : > { %3826 = vmatmul.msk.f32.gmra.mxu0 %vm977_vm4, %v4487_v21  ;;  %3829 = vmatmul.msk.f32.gmra.mxu1 %vm978_vm5, %v4487_v21 }
  0xe5   : > { %1266 = vmatpush.msrb.mxu0 %v3883_v36  ;;  %1292 = vmatpush.msrb.mxu1 %v3899_v37 }
  0xe7   : > { %1267 = vmatpush.msrb.mxu0 %v3882_v38  ;;  %1293 = vmatpush.msrb.mxu1 %v3898_v39 }
  0xe9   : > { %1268 = vmatpush.msrb.mxu0 %v3881_v41  ;;  %1294 = vmatpush.msrb.mxu1 %v3897_v42 }
  0xeb   : > { %1269 = vmatpush.msrb.mxu0 %v3880_v3  ;;  %1295 = vmatpush.msrb.mxu1 %v3896_v44 }
  0xec   : > { %3957 = vmatmul.msk.f32.gmra.mxu2 %vm1320_vm6, %v4487_v21  ;;  %3960 = vmatmul.msk.f32.gmra.mxu3 %vm1321_vm7, %v4487_v21 }
  0xed   : > { %3912 = vmatmul.msk.f32.vlgmr.msrb.gmra.mxu0 %vm1203_vm8, %v4487_v21  ;;  %3915 = vmatmul.msk.f32.vlgmr.msrb.gmra.mxu1 %vm1204_vm9, %v4487_v21 }
  0xf4   : > { %3958 = vmatmul.msk.f32.gmra.mxu2 %vm1322_vm10, %v4487_v21  ;;  %3961 = vmatmul.msk.f32.gmra.mxu3 %vm1323_vm11, %v4487_v21 }
  0xf5   : > { %3913 = vmatmul.msk.f32.gmra.mxu0 %vm1205_vm12, %v4487_v21  ;;  %3916 = vmatmul.msk.f32.gmra.mxu1 %vm1206_vm13, %v4487_v21 }
  0xfd   : > { %3914 = vmatmul.msk.f32.gmra.mxu0 %vm1207_vm14, %v4487_v21  ;;  %3917 = vmatmul.msk.f32.gmra.mxu1 %vm1208_vm15, %v4487_v21 }
 0x116   : > { %v699_v48 = vpop.f32.mrf.mxu2  ;;  %v725_v49 = vpop.f32.mrf.mxu3 }
 0x119   : > { %v647_v50 = vpop.f32.mrf.mxu0  ;;  %v673_v51 = vpop.f32.mrf.mxu1 }
 0x11a   : > { %v674_v17 = vadd.f32 %v673_v51, %v647_v50  ;;  %v4256_v51 = vld [vmem:[%s493_s17] ss:$0 sm:$0xff]  ;;  %s4495_s17 = smov 48  }
 0x11c   : > { %v700_v20 = vadd.f32 %v699_v48, %v674_v17 }
 0x11e   : > { %v702_v52 = vpop.f32.mrf.mxu2  ;;  %v728_v53 = vpop.f32.mrf.mxu3  ;;  %v726_v26 = vadd.f32 %v725_v49, %v700_v20 }
 0x121   : > { %v650_v54 = vpop.f32.mrf.mxu0  ;;  %v676_v55 = vpop.f32.mrf.mxu1 }
 0x122   : > { %v677_v25 = vadd.f32 %v676_v55, %v650_v54 }
 0x124   : > { %v703_v30 = vadd.f32 %v702_v52, %v677_v25 }
 0x126   : > { %v705_v56 = vpop.f32.mrf.mxu2  ;;  %v731_v57 = vpop.f32.mrf.mxu3  ;;  %v729_v34 = vadd.f32 %v728_v53, %v703_v30 }
 0x129   : > { %v653_v58 = vpop.f32.mrf.mxu0  ;;  %v679_v59 = vpop.f32.mrf.mxu1 }
 0x12a   : > { %v680_v37 = vadd.f32 %v679_v59, %v653_v58 }
 0x12c   : > { %v706_v44 = vadd.f32 %v705_v56, %v680_v37 }
 0x12e   : > { %v926_v60 = vpop.f32.mrf.mxu2  ;;  %v952_v61 = vpop.f32.mrf.mxu3  ;;  %v732_v54 = vadd.f32 %v731_v57, %v706_v44 }
 0x12f   : > { %v953_v27 = vadd.f32 %v952_v61, %v926_v60 }
 0x131   : > { %v811_v62 = vpop.f32.mrf.mxu0  ;;  %v837_v16 = vpop.f32.mrf.mxu1 }
 0x132   : > { %v838_v24 = vadd.f32 %v837_v16, %v811_v62 }
 0x134   : > { %v846_v2 = vadd.f32 %v838_v24, %v726_v26 }
 0x136   : > { %v929_v63 = vpop.f32.mrf.mxu2  ;;  %v955_v4 = vpop.f32.mrf.mxu3  ;;  %v961_v33 = vadd.f32 %v953_v27, %v846_v2 }
 0x137   : > { %v956_v40 = vadd.f32 %v955_v4, %v929_v63 }
 0x139   : > { %v814_v5 = vpop.f32.mrf.mxu0  ;;  %v840_v21 = vpop.f32.mrf.mxu1 }
 0x13a   : > { %v841_v32 = vadd.f32 %v840_v21, %v814_v5 }
 0x13c   : > { %v847_v41 = vadd.f32 %v841_v32, %v729_v34 }
 0x13e   : > { %v932_v6 = vpop.f32.mrf.mxu2  ;;  %v958_v7 = vpop.f32.mrf.mxu3  ;;  %v962_v48 = vadd.f32 %v956_v40, %v847_v41 }
 0x13f   : > { %v959_v60 = vadd.f32 %v958_v7, %v932_v6 }
 0x142   : > { %v817_v8 = vpop.f32.mrf.mxu0  ;;  %v843_v9 = vpop.f32.mrf.mxu1 }
 0x143   : > { %v844_v49 = vadd.f32 %v843_v9, %v817_v8 }
 0x145   : > { %v848_v56 = vadd.f32 %v844_v49, %v732_v54  ;;  %v1520_v49 = vld [vmem:[%s6526_s5] sm:$0xff] }
 0x147   : > { %v1156_v10 = vpop.f32.mrf.mxu2  ;;  %v1182_v11 = vpop.f32.mrf.mxu3  ;;  %v963_v9 = vadd.f32 %v959_v60, %v848_v56 }
 0x148   : > { %v1183_v38 = vadd.f32 %v1182_v11, %v1156_v10 }
 0x14d   : > { %v1041_v12 = vpop.f32.mrf.mxu0  ;;  %v1067_v13 = vpop.f32.mrf.mxu1 }
 0x14e   : > { %v1068_v31 = vadd.f32 %v1067_v13, %v1041_v12 }
 0x150   : > { %v1076_v39 = vadd.f32 %v1068_v31, %v961_v33 }
 0x151   : > { %v1159_v14 = vpop.f32.mrf.mxu2  ;;  %v1185_v0 = vpop.f32.mrf.mxu3 }
 0x152   : > { %v1191_v46 = vadd.f32 %v1183_v38, %v1076_v39  ;;  %v1186_v52 = vadd.f32 %v1185_v0, %v1159_v14 }
 0x157   : > { %v1044_v18 = vpop.f32.mrf.mxu0  ;;  %v1070_v19 = vpop.f32.mrf.mxu1 }
 0x158   : > { %v1071_v42 = vadd.f32 %v1070_v19, %v1044_v18 }
 0x15a   : > { %v1077_v53 = vadd.f32 %v1071_v42, %v962_v48  ;;  %v1521_v48 = vld [vmem:[%s6526_s5 + $0x8] sm:$0xff] }
 0x15b   : > { %v1162_v22 = vpop.f32.mrf.mxu2  ;;  %v1188_v23 = vpop.f32.mrf.mxu3 }
 0x15c   : > { %v1192_v16 = vadd.f32 %v1186_v52, %v1077_v53  ;;  %v1189_v12 = vadd.f32 %v1188_v23, %v1162_v22  ;;  %v4488_v23 = vmov 32.0   ;;  %v4396_v52 = vld [vmem:[%s4639_s22] sm:$0xff]  ;;  %v4397_v53 = vld [vmem:[%s4639_s22 + $0x10] sm:$0xff] }
 0x15d   : > { %4270 = vrcp.f32 %v4488_v23  ;;  %vm499_vm2 = vcmp.ge.s32.totalorder %v4396_v52, 0  ;;  %vm501_vm3 = vcmp.ge.s32.totalorder %v4397_v53, 0  ;;  %v5654_v53 = vshrl.u32 %v508_v15, 7  ;;  %v1680_v15 = vld [vmem:[%s6528_s7 + $0x28] sm:$0xff] }
 0x15f   : > { %vm1583_vm14 = vcmp.lt.s32.totalorder %v5654_v53, 1  ;;  %vm1590_vm15 = vcmp.lt.s32.totalorder %v5654_v53, 7 }
 0x161   : > { %v1047_v28 = vpop.f32.mrf.mxu0  ;;  %v1073_v29 = vpop.f32.mrf.mxu1 }
 0x162   : > { %v1074_v4 = vadd.f32 %v1073_v29, %v1047_v28 }
 0x163   : > { %v4271_v27 = vpop.eup %4270 }
 0x164   : > { %v1078_v10 = vadd.f32 %v1074_v4, %v963_v9  ;;  %v1445_v2 = vmul.f32 32.0, %v4271_v27  ;;  %vm1449_vm1 = vweird.f32 %v4271_v27 }
 0x166   : > { %v1386_v35 = vpop.f32.mrf.mxu2  ;;  %v1412_v36 = vpop.f32.mrf.mxu3  ;;  %v1193_v17 = vadd.f32 %v1189_v12, %v1078_v10  ;;  %v1446_v28 = vsub.f32 1.0, %v1445_v2 }
 0x167   : > { %v1413_v45 = vadd.f32 %v1412_v36, %v1386_v35 }
 0x168   : > { %v1447_v29 = vmul.f32 %v4271_v27, %v1446_v28 }
 0x16a   : > { %v1271_v43 = vpop.f32.mrf.mxu0  ;;  %v1297_v3 = vpop.f32.mrf.mxu1  ;;  %v1448_v30 = vadd.f32 %v4271_v27, %v1447_v29 }
 0x16b   : > { %v1298_v47 = vadd.f32 %v1297_v3, %v1271_v43 }
 0x16c   : > { %v5572_v31 = vsel %vm1449_vm1, %v4271_v27, %v1448_v30 }
 0x16d   : > { %v1306_v50 = vadd.f32 %v1298_v47, %v1191_v46  ;;  %v1523_v46 = vld [vmem:[%s6526_s5 + $0x18] sm:$0xff]  ;;  %v1522_v47 = vld [vmem:[%s6526_s5 + $0x10] sm:$0xff] }
 0x16e   : > { %1545 = vmatpush.msra.mxu0 %v1523_v46 }
 0x16f   : > { %v1421_v55 = vadd.f32 %v1413_v45, %v1306_v50  ;;  %v1389_v58 = vpop.f32.mrf.mxu2  ;;  %v1415_v59 = vpop.f32.mrf.mxu3 }
 0x170   : > { %v1416_v5 = vadd.f32 %v1415_v59, %v1389_v58  ;;  %1546 = vmatpush.msra.mxu0 %v1522_v47 }
 0x171   : > { %v5560_v61 = vadd.f32 %v4256_v51, %v1421_v55  ;;  %v4489_v55 = vmov 0.0  }
 0x172   : > { %v1274_v62 = vpop.f32.mrf.mxu0  ;;  %v1300_v63 = vpop.f32.mrf.mxu1  ;;  %1547 = vmatpush.msra.mxu0 %v1521_v48  ;;  %v3639_v58 = vsel %vm499_vm2, 1.0, %v4489_v55  ;;  %v3641_v59 = vsel %vm501_vm3, 1.0, %v4489_v55  ;;  %v1685_v48 = vld [vmem:[%s6528_s7 + $0x50] sm:$0xff] }
 0x173   : > { %v1301_v21 = vadd.f32 %v1300_v63, %v1274_v62  ;;  %v1435_v8 = vsel %vm1434_vm0, %v5560_v61, 0.0  ;;  %v4249_v60 = vpack.i.bf16 %v3641_v59, %v3639_v58  ;;  %v1681_v59 = vld [vmem:[%s6528_s7 + $0x30] sm:$0xff] }
 0x174   : > { %1436 = vadd.xlane.f32.xlu1 %v1435_v8  ;;  %1548 = vmatpush.msra.mxu0 %v1520_v49  ;;  %v1684_v49 = vld [vmem:[%s6528_s7 + $0x48] sm:$0xff] }
 0x175   : > { %v1307_v57 = vadd.f32 %v1301_v21, %v1192_v16 }
 0x177   : > { %v1422_v11 = vadd.f32 %v1416_v5, %v1307_v57  ;;  %v1392_v13 = vpop.f32.mrf.mxu2  ;;  %v1418_v6 = vpop.f32.mrf.mxu3  ;;  %v4398_v5 = vld [vmem:[%s4639_s22 + $0x8] sm:$0xff]  ;;  %s4490_s22 = smov 64  }
 0x178   : > { %v1419_v20 = vadd.f32 %v1418_v6, %v1392_v13  ;;  %vm500_vm4 = vcmp.ge.s32.totalorder %v4398_v5, 0 }
 0x179   : > { %v5564_v7 = vadd.f32 %v4256_v51, %v1422_v11  ;;  %v3640_v8 = vsel %vm500_vm4, 1.0, %v4489_v55 }
 0x17a   : > { %v1277_v14 = vpop.f32.mrf.mxu0  ;;  %v1303_v0 = vpop.f32.mrf.mxu1 }
 0x17b   : > { %v1304_v18 = vadd.f32 %v1303_v0, %v1277_v14  ;;  %v1438_v19 = vsel %vm1434_vm0, %v5564_v7, 0.0  ;;  %v4257_v0 = vld [vmem:[%s6524_s3] ss:$0 sm:$0xff] }
 0x17c   : > { %1439 = vadd.xlane.f32.xlu2 %v1438_v19 }
 0x17d   : > { %v1308_v24 = vadd.f32 %v1304_v18, %v1193_v17 }
 0x17f   : > { %v1423_v25 = vadd.f32 %v1419_v20, %v1308_v24  ;;  %v4258_v20 = vld [vmem:[%s6525_s4] ss:$0 sm:$0xff] }
 0x181   : > { %v5568_v26 = vadd.f32 %v4256_v51, %v1423_v25 }
 0x183   : > { %v1441_v22 = vsel %vm1434_vm0, %v5568_v26, 0.0 }
 0x184   : > { %1442 = vadd.xlane.f32.xlu0 %v1441_v22 }
 0x1e7   : > { %v1437_v32 = vpop.xlane.xlu1 %1436 }
 0x1e8   : > { %v1451_v33 = vmul.f32 %v5572_v31, %v1437_v32 }
 0x1ea   : > { %v5576_v34 = vsub.f32 %v5560_v61, %v1451_v33 }
 0x1ec   : > { %v1457_v35 = vmul.f32 %v5576_v34, %v5576_v34 }
 0x1ee   : > { %v1460_v36 = vsel %vm1434_vm0, %v1457_v35, 0.0 }
 0x1ef   : > { %1461 = vadd.xlane.f32.xlu2 %v1460_v36  ;;  %v1440_v37 = vpop.xlane.xlu2 %1439 }
 0x1f0   : > { %v1452_v38 = vmul.f32 %v5572_v31, %v1440_v37 }
 0x1f2   : > { %v5583_v39 = vsub.f32 %v5564_v7, %v1452_v38 }
 0x1f4   : > { %v1458_v40 = vmul.f32 %v5583_v39, %v5583_v39 }
 0x1f6   : > { %v1463_v41 = vsel %vm1434_vm0, %v1458_v40, 0.0 }
 0x1f7   : > { %1464 = vadd.xlane.f32.xlu1 %v1463_v41  ;;  %v1443_v42 = vpop.xlane.xlu0 %1442 }
 0x1f8   : > { %v1453_v43 = vmul.f32 %v5572_v31, %v1443_v42 }
 0x1fa   : > { %v5590_v3 = vsub.f32 %v5568_v26, %v1453_v43  ;;  %v1689_v43 = vld [vmem:[%s6528_s7 + $0x70] sm:$0xff] }
 0x1fc   : > { %v1459_v44 = vmul.f32 %v5590_v3, %v5590_v3 }
 0x1fe   : > { %v1466_v45 = vsel %vm1434_vm0, %v1459_v44, 0.0  ;;  %v1688_v44 = vld [vmem:[%s6528_s7 + $0x68] sm:$0xff] }
 0x1ff   : > { %1467 = vadd.xlane.f32.xlu2 %v1466_v45  ;;  %v1686_v45 = vld [vmem:[%s6528_s7 + $0x58] sm:$0xff] }
 0x210   : > { %4250 = vperm.xlu1 %4248, %v4249_v60  }
 0x217   : > { %1566 = vperm.xlu2 %4254, %v3640_v8   ;;  %v1678_v8 = vld [vmem:[%s6528_s7 + $0x18] sm:$0xff] }
 0x262   : > { %v1462_v50 = vpop.xlane.xlu2 %1461 }
 0x263   : > { %v1469_v51 = vmul.f32 %v1462_v50, %v5572_v31 }
 0x265   : > { %v1472_v54 = vadd.f32 1e-05, %v1469_v51  ;;  %v1683_v51 = vld [vmem:[%s6528_s7 + $0x40] sm:$0xff] }
 0x267   : > { %4272 = vrsqrt.f32 %v1472_v54  ;;  %vm1481_vm6 = vweird.f32 %v1472_v54 }
 0x26a   : > { %v1465_v56 = vpop.xlane.xlu1 %1464 }
 0x26b   : > { %v1470_v62 = vmul.f32 %v1465_v56, %v5572_v31  ;;  %v1577_v56 = vld [vmem:[%s6527_s6] sm:$0x7] }
 0x26d   : > { %v4273_v16 = vpop.eup %4272  ;;  %v1473_v63 = vadd.f32 1e-05, %v1470_v62 }
 0x26e   : > { %v1476_v4 = vmul.f32 %v4273_v16, %v1472_v54  ;;  %vm1482_vm5 = vweird.f32 %v4273_v16  ;;  %v1682_v54 = vld [vmem:[%s6528_s7 + $0x38] sm:$0xff] }
 0x26f   : > { %4274 = vrsqrt.f32 %v1473_v63  ;;  %vm1483_vm7 = vmor %vm1481_vm6, %vm1482_vm5  ;;  %vm1491_vm9 = vweird.f32 %v1473_v63  ;;  %vm1431_vm5 = vcmp.lt.s32.totalorder %v5066_v1, 64  ;;  %v4075_v1 = vld [vmem:[%s6530_s9 + $0xe0] sm:$0xff] }
 0x270   : > { %v1477_v21 = vmul.f32 %v4273_v16, %v1476_v4  ;;  %v1679_v4 = vld [vmem:[%s6528_s7 + $0x20] sm:$0xff] }
 0x272   : > { %v1478_v9 = vmul.f32 0.5, %v1477_v21  ;;  %v1468_v57 = vpop.xlane.xlu2 %1467 }
 0x273   : > { %v1471_v10 = vmul.f32 %v1468_v57, %v5572_v31 }
 0x274   : > { %v1479_v11 = vsub.f32 1.5, %v1478_v9  ;;  %v1598_v9 = vperm.slane %v1577_v56, 1 }
 0x275   : > { %v4275_v12 = vpop.eup %4274  ;;  %v1474_v13 = vadd.f32 1e-05, %v1471_v10 }
 0x276   : > { %v1480_v6 = vmul.f32 %v4273_v16, %v1479_v11  ;;  %v1486_v14 = vmul.f32 %v4275_v12, %v1473_v63  ;;  %vm1492_vm8 = vweird.f32 %v4275_v12  ;;  %v1594_v63 = vperm.slane %v1577_v56, 0  ;;  %v1677_v11 = vld [vmem:[%s6528_s7 + $0x10] sm:$0xff] }
 0x277   : > { %4276 = vrsqrt.f32 %v1474_v13  ;;  %vm1493_vm10 = vmor %vm1491_vm9, %vm1492_vm8  ;;  %vm1501_vm12 = vweird.f32 %v1474_v13 }
 0x278   : > { %v1484_v17 = vsel %vm1483_vm7, %v4273_v16, %v1480_v6  ;;  %v1487_v18 = vmul.f32 %v4275_v12, %v1486_v14 }
 0x279   : > { %v1505_v19 = vmul.f32 %v1484_v17, %v5576_v34 }
 0x27a   : > { %v1488_v24 = vmul.f32 0.5, %v1487_v18  ;;  %v5651_v52 = vpop.permute.xlu2 %1566 }
 0x27b   : > { %v1511_v25 = vmul.f32 %v4257_v0, %v1505_v19  ;;  %v1605_v19 = vperm.slane %v1577_v56, 2 }
 0x27c   : > { %v1489_v22 = vsub.f32 1.5, %v1488_v24 }
 0x27d   : > { %v4277_v23 = vpop.eup %4276  ;;  %v1517_v27 = vadd.f32 %v4258_v20, %v1511_v25 }
 0x27e   : > { %v1490_v2 = vmul.f32 %v4275_v12, %v1489_v22  ;;  %v1496_v28 = vmul.f32 %v4277_v23, %v1474_v13  ;;  %vm1502_vm11 = vweird.f32 %v4277_v23 }
 0x27f   : > { %3962 = vmatmul.msk.f32.vlgmr.msra.gmra.mxu0 %vm1434_vm0, %v1517_v27  ;;  %vm1503_vm13 = vmor %vm1501_vm12, %vm1502_vm11 }
 0x280   : > { %v1494_v29 = vsel %vm1493_vm10, %v4275_v12, %v1490_v2  ;;  %v1497_v30 = vmul.f32 %v4277_v23, %v1496_v28 }
 0x281   : > { %v1506_v32 = vmul.f32 %v1494_v29, %v5583_v39  ;;  %v1690_v39 = vld [vmem:[%s6528_s7 + $0x78] sm:$0xff] }
 0x282   : > { %v1498_v33 = vmul.f32 0.5, %v1497_v30  ;;  %1695 = vmatpush.msra.mxu1 %v1690_v39  ;;  %v4251_v46 = vpop.permute.xlu1 %4250 }
 0x283   : > { %v1512_v34 = vmul.f32 %v4257_v0, %v1506_v32  ;;  %v5646_v50 = vunpack.i.l.bf16 %v4251_v46  ;;  %v5674_v5 = vunpack.i.h.bf16 %v4251_v46 }
 0x284   : > { %v1499_v35 = vsub.f32 1.5, %v1498_v33  ;;  %1696 = vmatpush.msra.mxu1 %v1689_v43 }
 0x285   : > { %v1518_v36 = vadd.f32 %v4258_v20, %v1512_v34 }
 0x286   : > { %v1500_v37 = vmul.f32 %v4277_v23, %v1499_v35  ;;  %1697 = vmatpush.msra.mxu1 %v1688_v44 }
 0x287   : > { %3963 = vmatmul.msk.f32.gmra.mxu0 %vm1434_vm0, %v1518_v36 }
 0x288   : > { %v1504_v38 = vsel %vm1503_vm13, %v4277_v23, %v1500_v37 }
 0x289   : > { %v1507_v40 = vmul.f32 %v1504_v38, %v5590_v3  ;;  %v1687_v3 = vld [vmem:[%s6528_s7 + $0x60] sm:$0xff] }
 0x28a   : > { %1698 = vmatpush.msra.mxu1 %v1687_v3 }
 0x28b   : > { %v1513_v41 = vmul.f32 %v4257_v0, %v1507_v40  ;;  %v1676_v0 = vld [vmem:[%s6528_s7 + $0x8] sm:$0xff] }
 0x28c   : > { %1699 = vmatpush.msra.mxu1 %v1686_v45 }
 0x28d   : > { %v1519_v42 = vadd.f32 %v4258_v20, %v1513_v41 }
 0x28e   : > { %1700 = vmatpush.msra.mxu1 %v1685_v48 }
 0x28f   : > { %3964 = vmatmul.msk.f32.gmra.mxu0 %vm1434_vm0, %v1519_v42  ;;  %v1675_v42 = vld [vmem:[%s6528_s7] sm:$0xff] }
 0x290   : > { %1701 = vmatpush.msra.mxu1 %v1684_v49 }
 0x292   : > { %1702 = vmatpush.msra.mxu1 %v1683_v51 }
 0x294   : > { %1703 = vmatpush.msra.mxu1 %v1682_v54 }
 0x296   : > { %1704 = vmatpush.msra.mxu1 %v1681_v59 }
 0x298   : > { %1705 = vmatpush.msra.mxu1 %v1680_v15 }
 0x29a   : > { %1706 = vmatpush.msra.mxu1 %v1679_v4 }
 0x29c   : > { %1707 = vmatpush.msra.mxu1 %v1678_v8 }
 0x29e   : > { %1708 = vmatpush.msra.mxu1 %v1677_v11 }
 0x2a0   : > { %1709 = vmatpush.msra.mxu1 %v1676_v0 }
 0x2a2   : > { %1710 = vmatpush.msra.mxu1 %v1675_v42 }
 0x2fc   : > { %v1550_v47 = vpop.f32.mrf.mxu0 }
 0x2fd   : > { %v1574_v55 = vmul.f32 %v5646_v50, %v1550_v47 }
 0x2ff   : > { %v1578_v62 = vrot.slane %v1574_v55, 7  ;;  %v1587_v6 = vrot.slane %v1574_v55, 1  ;;  %v1599_v20 = vmul.f32 %v1598_v9, %v1574_v55 }
 0x304   : > { %v1553_v58 = vpop.f32.mrf.mxu0 }
 0x305   : > { %v1575_v60 = vmul.f32 %v5651_v52, %v1553_v58 }
 0x307   : > { %v1579_v16 = vrot.slane %v1575_v60, 7  ;;  %v1588_v57 = vrot.slane %v1575_v60, 1  ;;  %v1600_v14 = vmul.f32 %v1598_v9, %v1575_v60 }
 0x309   : > { %v1585_v21 = vsel %vm1583_vm14, %v1578_v62, %v1579_v16  ;;  %v1592_v25 = vsel %vm1590_vm15, %v1587_v6, %v1588_v57 }
 0x30a   : > { %v1596_v12 = vmul.f32 %v1594_v63, %v1585_v21  ;;  %v1606_v33 = vmul.f32 %v1605_v19, %v1592_v25 }
 0x30c   : > { %v1556_v10 = vpop.f32.mrf.mxu0  ;;  %v1603_v24 = vadd.f32 %v1600_v14, %v1596_v12 }
 0x30d   : > { %v1576_v13 = vmul.f32 %v5674_v5, %v1556_v10 }
 0x30f   : > { %v1580_v17 = vrot.slane %v1576_v13, 7  ;;  %v1589_v18 = vrot.slane %v1576_v13, 1  ;;  %v1601_v30 = vmul.f32 %v1598_v9, %v1576_v13 }
 0x311   : > { %v1584_v22 = vsel %vm1583_vm14, %v1579_v16, %v1580_v17  ;;  %v1586_v23 = vsel %vm1583_vm14, %v1580_v17, %v1578_v62  ;;  %v1591_v27 = vsel %vm1590_vm15, %v1588_v57, %v1589_v18  ;;  %v1593_v2 = vsel %vm1590_vm15, %v1589_v18, %v1587_v6 }
 0x312   : > { %v1595_v28 = vmul.f32 %v1594_v63, %v1586_v23  ;;  %v1597_v29 = vmul.f32 %v1594_v63, %v1584_v22  ;;  %v1607_v32 = vmul.f32 %v1605_v19, %v1591_v27  ;;  %v1608_v37 = vmul.f32 %v1605_v19, %v1593_v2 }
 0x314   : > { %v1604_v34 = vadd.f32 %v1601_v30, %v1597_v29  ;;  %v1610_v35 = vadd.f32 %v1607_v32, %v1603_v24  ;;  %v1602_v36 = vadd.f32 %v1599_v20, %v1595_v28 }
 0x316   : > { %v1613_v38 = vsub.f32 0.0, %v1610_v35  ;;  %v5699_v40 = vadd.f32 %v1606_v33, %v1602_v36  ;;  %v5701_v41 = vadd.f32 %v1608_v37, %v1604_v34  ;;  %v1803_v34 = vld [vmem:[%s6530_s9 + $0x38] sm:$0xff]  ;;  %v1801_v36 = vld [vmem:[%s6530_s9 + $0x28] sm:$0xff]  ;;  %v1800_v37 = vld [vmem:[%s6530_s9 + $0x20] sm:$0xff] }
 0x317   : > { %1822 = vmatpush.msra.mxu2 %v1803_v34 }
 0x318   : > { %v1617_v39 = vmul.f32 1.442695, %v1613_v38  ;;  %v1612_v43 = vsub.f32 0.0, %v5699_v40  ;;  %v1614_v44 = vsub.f32 0.0, %v5701_v41  ;;  %v1799_v38 = vld [vmem:[%s6530_s9 + $0x18] sm:$0xff] }
 0x31a   : > { %4278 = vpow2.f32 %v1617_v39  ;;  %v1615_v3 = vmul.f32 1.442695, %v1612_v43  ;;  %v1619_v45 = vmul.f32 1.442695, %v1614_v44  ;;  %v1797_v39 = vld [vmem:[%s6530_s9 + $0x8] sm:$0xff]  ;;  %v1796_v44 = vld [vmem:[%s6530_s9] sm:$0xff] }
 0x31c   : > { %4280 = vpow2.f32 %v1615_v3 }
 0x31d   : > { %4282 = vpow2.f32 %v1619_v45 }
 0x320   : > { %v4279_v46 = vpop.eup %4278 }
 0x321   : > { %v1622_v47 = vadd.f32 1.0, %v4279_v46 }
 0x322   : > { %v4281_v48 = vpop.eup %4280 }
 0x323   : > { %v4283_v49 = vpop.eup %4282  ;;  %4284 = vrcp.f32 %v1622_v47  ;;  %v1621_v51 = vadd.f32 1.0, %v4281_v48  ;;  %v1650_v56 = vand.u32 2147483648, %v1622_v47  ;;  %v1648_v63 = vand.u32 2147483647, %v1622_v47 }
 0x324   : > { %v1623_v54 = vadd.f32 1.0, %v4283_v49  ;;  %vm1644_vm2 = vweird.f32 %v1622_v47 }
 0x325   : > { %4286 = vrcp.f32 %v1621_v51  ;;  %v1635_v9 = vand.u32 2147483648, %v1621_v51  ;;  %v1651_v10 = vor.u32 1.1754944e-38, %v1650_v56  ;;  %v1633_v12 = vand.u32 2147483647, %v1621_v51 }
 0x326   : > { %4288 = vrcp.f32 %v1623_v54  ;;  %vm1649_vm6 = vcmp.eq.f32.partialorder %v1648_v63, 8.507059e+37  ;;  %vm1629_vm7 = vweird.f32 %v1621_v51  ;;  %v1665_v20 = vand.u32 2147483648, %v1623_v54 }
 0x327   : > { %v1636_v18 = vor.u32 1.1754944e-38, %v1635_v9  ;;  %vm1634_vm10 = vcmp.eq.f32.partialorder %v1633_v12, 8.507059e+37  ;;  %vm1659_vm11 = vweird.f32 %v1623_v54  ;;  %v1663_v25 = vand.u32 2147483647, %v1623_v54 }
 0x328   : > { %v1666_v28 = vor.u32 1.1754944e-38, %v1665_v20 }
 0x329   : > { %v4285_v55 = vpop.eup %4284  ;;  %vm1664_vm13 = vcmp.eq.f32.partialorder %v1663_v25, 8.507059e+37 }
 0x32a   : > { %v1640_v58 = vmul.f32 %v4285_v55, %v1622_v47  ;;  %vm1645_vm1 = vweird.f32 %v4285_v55 }
 0x32b   : > { %v4287_v59 = vpop.eup %4286  ;;  %vm1646_vm3 = vmor %vm1644_vm2, %vm1645_vm1 }
 0x32c   : > { %v1641_v60 = vsub.f32 1.0, %v1640_v58  ;;  %v4289_v15 = vpop.eup %4288  ;;  %v1625_v62 = vmul.f32 %v4287_v59, %v1621_v51  ;;  %vm1630_vm4 = vweird.f32 %v4287_v59 }
 0x32d   : > { %v1655_v4 = vmul.f32 %v4289_v15, %v1623_v54  ;;  %vm1660_vm8 = vweird.f32 %v4289_v15  ;;  %vm1631_vm9 = vmor %vm1629_vm7, %vm1630_vm4 }
 0x32e   : > { %v1642_v16 = vmul.f32 %v4285_v55, %v1641_v60  ;;  %v1626_v21 = vsub.f32 1.0, %v1625_v62  ;;  %vm1661_vm12 = vmor %vm1659_vm11, %vm1660_vm8 }
 0x32f   : > { %v1656_v57 = vsub.f32 1.0, %v1655_v4 }
 0x330   : > { %v1643_v8 = vadd.f32 %v4285_v55, %v1642_v16  ;;  %v1627_v11 = vmul.f32 %v4287_v59, %v1626_v21 }
 0x331   : > { %v1657_v6 = vmul.f32 %v4289_v15, %v1656_v57 }
 0x332   : > { %v1647_v13 = vsel %vm1646_vm3, %v4285_v55, %v1643_v8  ;;  %v1628_v0 = vadd.f32 %v4287_v59, %v1627_v11 }
 0x333   : > { %v1652_v14 = vsel %vm1649_vm6, %v1651_v10, %v1647_v13  ;;  %v1658_v19 = vadd.f32 %v4289_v15, %v1657_v6  ;;  %vm1804_vm6 = vcmask 523264  }
 0x334   : > { %v1670_v17 = vmul.f32 %v1652_v14, %v1610_v35  ;;  %v1632_v24 = vsel %vm1631_vm9, %v4287_v59, %v1628_v0  ;;  %v1802_v35 = vld [vmem:[%s6530_s9 + $0x30] sm:$0xff] }
 0x335   : > { %v1637_v23 = vsel %vm1634_vm10, %v1636_v18, %v1632_v24  ;;  %v1662_v2 = vsel %vm1661_vm12, %v4289_v15, %v1658_v19  ;;  %1823 = vmatpush.msra.mxu2 %v1802_v35 }
 0x336   : > { %v5711_v22 = vsel %vm1431_vm5, %v1670_v17, %v1652_v14  ;;  %v1669_v27 = vmul.f32 %v1637_v23, %v5699_v40  ;;  %v1667_v30 = vsel %vm1664_vm13, %v1666_v28, %v1662_v2  ;;  %v4259_v40 = vld [vmem:[%s6529_s8] ss:$0 sm:$0xff] }
 0x337   : > { %1783 = vrot.lane.b32.xlu1 %v5711_v22, %s4490_s22  ;;  %v1671_v32 = vmul.f32 %v1667_v30, %v5701_v41  ;;  %1824 = vmatpush.msra.mxu2 %v1801_v36  ;;  %v1798_v41 = vld [vmem:[%s6530_s9 + $0x10] sm:$0xff] }
 0x338   : > { %v5718_v29 = vsel %vm1431_vm5, %v1669_v27, %v1637_v23 }
 0x339   : > { %1781 = vrot.lane.b32.xlu0 %v5718_v29, %s4490_s22  ;;  %1711 = vmatmul.f32.vlgmr.msra.gmra.mxu1 %v5718_v29  ;;  %v5726_v33 = vsel %vm1431_vm5, %v1671_v32, %v1667_v30 }
 0x33a   : > { %1825 = vmatpush.msra.mxu2 %v1800_v37 }
 0x33c   : > { %1826 = vmatpush.msra.mxu2 %v1799_v38 }
 0x33e   : > { %1827 = vmatpush.msra.mxu2 %v1798_v41 }
 0x340   : > { %1828 = vmatpush.msra.mxu2 %v1797_v39 }
 0x341   : > { %1785 = vrot.lane.b32.xlu0 %v5726_v33, %s4490_s22  ;;  %1714 = vmatmul.f32.gmra.mxu1 %v5711_v22 }
 0x342   : > { %1829 = vmatpush.msra.mxu2 %v1796_v44 }
 0x349   : > { %1717 = vmatmul.f32.gmra.mxu1 %v5726_v33 }
 0x3a9   : > { %v1784_v23 = vpop.permute.xlu1 %1783 }
 0x3aa   : > { %v1791_v30 = vmul.f32 %v1784_v23, %v5711_v22 }
 0x3ab   : > { %v1782_v9 = vpop.permute.xlu0 %1781 }
 0x3ac   : > { %v1790_v6 = vmul.f32 %v1782_v9, %v5718_v29 }
 0x3b3   : > { %v1786_v41 = vpop.permute.xlu0 %1785 }
 0x3b4   : > { %v1792_v44 = vmul.f32 %v1786_v41, %v5726_v33 }
 0x3b6   : > { %v1712_v42 = vpop.f32.mrf.mxu1 }
 0x3b7   : > { %v1713_v43 = vadd.f32 %v4259_v40, %v1712_v42 }
 0x3b9   : > { %v1721_v3 = vmul.f32 1.442695, %v1713_v43 }
 0x3bb   : > { %4290 = vpow2.f32 %v1721_v3 }
 0x3be   : > { %v1715_v45 = vpop.f32.mrf.mxu1 }
 0x3bf   : > { %v1716_v46 = vadd.f32 %v4259_v40, %v1715_v45 }
 0x3c1   : > { %v4291_v47 = vpop.eup %4290  ;;  %v1723_v48 = vmul.f32 1.442695, %v1716_v46 }
 0x3c2   : > { %v1727_v49 = vadd.f32 2.0, %v4291_v47 }
 0x3c3   : > { %4292 = vpow2.f32 %v1723_v48 }
 0x3c4   : > { %4294 = vrcp.f32 %v1727_v49  ;;  %v1741_v62 = vand.u32 2147483648, %v1727_v49  ;;  %v1739_v63 = vand.u32 2147483647, %v1727_v49  ;;  %vm1735_vm2 = vweird.f32 %v1727_v49 }
 0x3c6   : > { %v1718_v51 = vpop.f32.mrf.mxu1  ;;  %v1742_v57 = vor.u32 1.1754944e-38, %v1741_v62  ;;  %vm1740_vm4 = vcmp.eq.f32.partialorder %v1739_v63, 8.507059e+37 }
 0x3c7   : > { %v1719_v54 = vadd.f32 %v4259_v40, %v1718_v51 }
 0x3c9   : > { %v4293_v55 = vpop.eup %4292  ;;  %v1725_v58 = vmul.f32 1.442695, %v1719_v54 }
 0x3ca   : > { %v4295_v59 = vpop.eup %4294  ;;  %v1728_v60 = vadd.f32 2.0, %v4293_v55 }
 0x3cb   : > { %v1731_v15 = vmul.f32 %v4295_v59, %v1727_v49  ;;  %4296 = vpow2.f32 %v1725_v58  ;;  %vm1736_vm1 = vweird.f32 %v4295_v59 }
 0x3cc   : > { %4298 = vrcp.f32 %v1728_v60  ;;  %vm1737_vm3 = vmor %vm1735_vm2, %vm1736_vm1  ;;  %v1756_v17 = vand.u32 2147483648, %v1728_v60  ;;  %v1754_v20 = vand.u32 2147483647, %v1728_v60  ;;  %vm1750_vm8 = vweird.f32 %v1728_v60 }
 0x3cd   : > { %v1732_v56 = vsub.f32 1.0, %v1731_v15 }
 0x3ce   : > { %v1757_v27 = vor.u32 1.1754944e-38, %v1756_v17  ;;  %vm1755_vm10 = vcmp.eq.f32.partialorder %v1754_v20, 8.507059e+37 }
 0x3cf   : > { %v1733_v16 = vmul.f32 %v4295_v59, %v1732_v56 }
 0x3d1   : > { %v4297_v4 = vpop.eup %4296  ;;  %v1734_v21 = vadd.f32 %v4295_v59, %v1733_v16 }
 0x3d2   : > { %v4299_v8 = vpop.eup %4298  ;;  %v1729_v10 = vadd.f32 2.0, %v4297_v4 }
 0x3d3   : > { %v1746_v11 = vmul.f32 %v4299_v8, %v1728_v60  ;;  %v1738_v12 = vsel %vm1737_vm3, %v4295_v59, %v1734_v21  ;;  %vm1751_vm7 = vweird.f32 %v4299_v8 }
 0x3d4   : > { %4300 = vrcp.f32 %v1729_v10  ;;  %v1743_v13 = vsel %vm1740_vm4, %v1742_v57, %v1738_v12  ;;  %vm1752_vm9 = vmor %vm1750_vm8, %vm1751_vm7  ;;  %v1771_v35 = vand.u32 2147483648, %v1729_v10  ;;  %v1769_v38 = vand.u32 2147483647, %v1729_v10  ;;  %v3973_v57 = vld [vmem:[%s6526_s5 + $0x38] sm:$0xff]  ;;  %v3970_v12 = vld [vmem:[%s6526_s5 + $0x20] sm:$0xff] }
 0x3d5   : > { %v1747_v14 = vsub.f32 1.0, %v1746_v11  ;;  %v1775_v0 = vsub.f32 1.0, %v1743_v13  ;;  %vm1765_vm12 = vweird.f32 %v1729_v10  ;;  %1948 = vmatpush.msra.mxu3 %v3973_v57  ;;  %v3971_v11 = vld [vmem:[%s6526_s5 + $0x28] sm:$0xff] }
 0x3d6   : > { %v1772_v42 = vor.u32 1.1754944e-38, %v1771_v35  ;;  %vm1770_vm1 = vcmp.eq.f32.partialorder %v1769_v38, 8.507059e+37  ;;  %v4261_v38 = vld [vmem:[%s6525_s4 + $0x1] ss:$0 sm:$0xff] }
 0x3d7   : > { %v1793_v18 = vmul.f32 %v1790_v6, %v1775_v0  ;;  %v1748_v19 = vmul.f32 %v4299_v8, %v1747_v14 }
 0x3d9   : > { %3965 = vmatmul.msk.f32.vlgmr.msra.gmra.mxu2 %vm1804_vm6, %v1793_v18  ;;  %v1749_v24 = vadd.f32 %v4299_v8, %v1748_v19 }
 0x3da   : > { %v4301_v25 = vpop.eup %4300 }
 0x3db   : > { %v1761_v2 = vmul.f32 %v4301_v25, %v1729_v10  ;;  %v1753_v28 = vsel %vm1752_vm9, %v4299_v8, %v1749_v24  ;;  %vm1766_vm11 = vweird.f32 %v4301_v25  ;;  %v3972_v10 = vld [vmem:[%s6526_s5 + $0x30] sm:$0xff] }
 0x3dc   : > { %v1758_v29 = vsel %vm1755_vm10, %v1757_v27, %v1753_v28  ;;  %vm1767_vm13 = vmor %vm1765_vm12, %vm1766_vm11  ;;  %1949 = vmatpush.msra.mxu3 %v3972_v10 }
 0x3dd   : > { %v1762_v32 = vsub.f32 1.0, %v1761_v2  ;;  %v1776_v34 = vsub.f32 1.0, %v1758_v29 }
 0x3de   : > { %1950 = vmatpush.msra.mxu3 %v3971_v11  ;;  %v3984_v11 = vld [vmem:[%s6528_s7 + $0xb0] sm:$0xff] }
 0x3df   : > { %v1794_v36 = vmul.f32 %v1791_v30, %v1776_v34  ;;  %v1763_v37 = vmul.f32 %v4301_v25, %v1762_v32  ;;  %v4260_v34 = vld [vmem:[%s6524_s3 + $0x1] ss:$0 sm:$0xff] }
 0x3e0   : > { %1951 = vmatpush.msra.mxu3 %v3970_v12 }
 0x3e1   : > { %3966 = vmatmul.msk.f32.gmra.mxu2 %vm1804_vm6, %v1794_v36  ;;  %v1764_v40 = vadd.f32 %v4301_v25, %v1763_v37 }
 0x3e3   : > { %v1768_v39 = vsel %vm1767_vm13, %v4301_v25, %v1764_v40 }
 0x3e4   : > { %v1773_v43 = vsel %vm1770_vm1, %v1772_v42, %v1768_v39 }
 0x3e5   : > { %v1777_v22 = vsub.f32 1.0, %v1773_v43 }
 0x3e7   : > { %v1795_v3 = vmul.f32 %v1792_v44, %v1777_v22 }
 0x3e9   : > { %3967 = vmatmul.msk.f32.gmra.mxu2 %vm1804_vm6, %v1795_v3 }
 0x45c   : > { %v1831_v45 = vpop.f32.mrf.mxu2 }
 0x45d   : > { %v5766_v46 = vadd.f32 %v1831_v45, %v5560_v61 }
 0x45f   : > { %v1844_v47 = vsel %vm1434_vm0, %v5766_v46, 0.0 }
 0x460   : > { %1845 = vadd.xlane.f32.xlu2 %v1844_v47 }
 0x464   : > { %v1834_v48 = vpop.f32.mrf.mxu2 }
 0x465   : > { %v5771_v49 = vadd.f32 %v1834_v48, %v5564_v7 }
 0x467   : > { %v1847_v51 = vsel %vm1434_vm0, %v5771_v49, 0.0 }
 0x468   : > { %1848 = vadd.xlane.f32.xlu1 %v1847_v51 }
 0x46c   : > { %v1837_v33 = vpop.f32.mrf.mxu2 }
 0x46d   : > { %v5776_v54 = vadd.f32 %v1837_v33, %v5568_v26 }
 0x46f   : > { %v1850_v61 = vsel %vm1434_vm0, %v5776_v54, 0.0 }
 0x470   : > { %1851 = vadd.xlane.f32.xlu0 %v1850_v61 }
 0x4d3   : > { %v1846_v55 = vpop.xlane.xlu2 %1845 }
 0x4d4   : > { %v1853_v58 = vmul.f32 %v1846_v55, %v5572_v31 }
 0x4d6   : > { %v1856_v59 = vsub.f32 %v5766_v46, %v1853_v58 }
 0x4d8   : > { %v1859_v60 = vmul.f32 %v1856_v59, %v1856_v59 }
 0x4da   : > { %v1862_v7 = vsel %vm1434_vm0, %v1859_v60, 0.0 }
 0x4db   : > { %1863 = vadd.xlane.f32.xlu2 %v1862_v7  ;;  %v1849_v15 = vpop.xlane.xlu1 %1848 }
 0x4dc   : > { %v1854_v56 = vmul.f32 %v1849_v15, %v5572_v31  ;;  %v3993_v15 = vld [vmem:[%s6528_s7 + $0xf8] sm:$0xff] }
 0x4dd   : > { %2082 = vmatpush.msrb.mxu0 %v3993_v15 }
 0x4de   : > { %v1857_v62 = vsub.f32 %v5771_v49, %v1854_v56  ;;  %v3992_v56 = vld [vmem:[%s6528_s7 + $0xf0] sm:$0xff] }
 0x4df   : > { %2083 = vmatpush.msrb.mxu0 %v3992_v56 }
 0x4e0   : > { %v1860_v26 = vmul.f32 %v1857_v62, %v1857_v62 }
 0x4e2   : > { %v1865_v16 = vsel %vm1434_vm0, %v1860_v26, 0.0  ;;  %v3990_v26 = vld [vmem:[%s6528_s7 + $0xe0] sm:$0xff] }
 0x4e3   : > { %v1852_v63 = vpop.xlane.xlu0 %1851  ;;  %1866 = vadd.xlane.f32.xlu1 %v1865_v16  ;;  %v3989_v16 = vld [vmem:[%s6528_s7 + $0xd8] sm:$0xff] }
 0x4e4   : > { %v1855_v4 = vmul.f32 %v1852_v63, %v5572_v31 }
 0x4e6   : > { %v5788_v21 = vsub.f32 %v5776_v54, %v1855_v4  ;;  %v3988_v4 = vld [vmem:[%s6528_s7 + $0xd0] sm:$0xff] }
 0x4e8   : > { %v1861_v8 = vmul.f32 %v5788_v21, %v5788_v21 }
 0x4ea   : > { %v1868_v9 = vsel %vm1434_vm0, %v1861_v8, 0.0  ;;  %v3986_v8 = vld [vmem:[%s6528_s7 + $0xc0] sm:$0xff] }
 0x4eb   : > { %1869 = vadd.xlane.f32.xlu0 %v1868_v9  ;;  %v3985_v9 = vld [vmem:[%s6528_s7 + $0xb8] sm:$0xff] }
 0x54e   : > { %v1864_v13 = vpop.xlane.xlu2 %1863 }
 0x54f   : > { %v1871_v6 = vmul.f32 %v1864_v13, %v5572_v31  ;;  %v3983_v13 = vld [vmem:[%s6528_s7 + $0xa8] sm:$0xff] }
 0x551   : > { %v1874_v14 = vadd.f32 1e-05, %v1871_v6  ;;  %v3977_v6 = vld [vmem:[%s6527_s6 + $0x4] sm:$0x7] }
 0x553   : > { %4302 = vrsqrt.f32 %v1874_v14  ;;  %vm1883_vm3 = vweird.f32 %v1874_v14 }
 0x556   : > { %v1867_v0 = vpop.xlane.xlu1 %1866 }
 0x557   : > { %v1872_v17 = vmul.f32 %v1867_v0, %v5572_v31 }
 0x559   : > { %v4303_v18 = vpop.eup %4302  ;;  %v1875_v19 = vadd.f32 1e-05, %v1872_v17  ;;  %v1979_v17 = vperm.slane %v3977_v6, 0 }
 0x55a   : > { %v1878_v20 = vmul.f32 %v4303_v18, %v1874_v14  ;;  %vm1884_vm2 = vweird.f32 %v4303_v18 }
 0x55b   : > { %4304 = vrsqrt.f32 %v1875_v19  ;;  %vm1885_vm4 = vmor %vm1883_vm3, %vm1884_vm2  ;;  %vm1893_vm8 = vweird.f32 %v1875_v19 }
 0x55c   : > { %v1879_v24 = vmul.f32 %v4303_v18, %v1878_v20  ;;  %v3981_v20 = vld [vmem:[%s6528_s7 + $0x98] sm:$0xff] }
 0x55e   : > { %v1880_v25 = vmul.f32 0.5, %v1879_v24  ;;  %v1870_v23 = vpop.xlane.xlu0 %1869  ;;  %v1983_v24 = vperm.slane %v3977_v6, 1 }
 0x55f   : > { %v1873_v27 = vmul.f32 %v1870_v23, %v5572_v31 }
 0x560   : > { %v1881_v2 = vsub.f32 1.5, %v1880_v25 }
 0x561   : > { %v4305_v28 = vpop.eup %4304  ;;  %v1876_v29 = vadd.f32 1e-05, %v1873_v27 }
 0x562   : > { %v1882_v30 = vmul.f32 %v4303_v18, %v1881_v2  ;;  %v1888_v32 = vmul.f32 %v4305_v28, %v1875_v19  ;;  %vm1894_vm7 = vweird.f32 %v4305_v28  ;;  %v3980_v2 = vld [vmem:[%s6528_s7 + $0x90] sm:$0xff] }
 0x563   : > { %4306 = vrsqrt.f32 %v1876_v29  ;;  %vm1895_vm9 = vmor %vm1893_vm8, %vm1894_vm7  ;;  %vm1903_vm11 = vweird.f32 %v1876_v29 }
 0x564   : > { %v1886_v35 = vsel %vm1885_vm4, %v4303_v18, %v1882_v30  ;;  %v1889_v36 = vmul.f32 %v4305_v28, %v1888_v32  ;;  %v3982_v18 = vld [vmem:[%s6528_s7 + $0xa0] sm:$0xff]  ;;  %v3979_v32 = vld [vmem:[%s6528_s7 + $0x88] sm:$0xff] }
 0x565   : > { %v1907_v37 = vmul.f32 %v1886_v35, %v1856_v59 }
 0x566   : > { %v1890_v40 = vmul.f32 0.5, %v1889_v36  ;;  %v1990_v36 = vperm.slane %v3977_v6, 2 }
 0x567   : > { %v1913_v41 = vmul.f32 %v4260_v34, %v1907_v37 }
 0x568   : > { %v1891_v42 = vsub.f32 1.5, %v1890_v40 }
 0x569   : > { %v4307_v39 = vpop.eup %4306  ;;  %v1919_v43 = vadd.f32 %v4261_v38, %v1913_v41 }
 0x56a   : > { %v1892_v44 = vmul.f32 %v4305_v28, %v1891_v42  ;;  %v1898_v22 = vmul.f32 %v4307_v39, %v1876_v29  ;;  %vm1904_vm10 = vweird.f32 %v4307_v39 }
 0x56b   : > { %3974 = vmatmul.msk.f32.vlgmr.msra.gmra.mxu3 %vm1434_vm0, %v1919_v43  ;;  %vm1905_vm12 = vmor %vm1903_vm11, %vm1904_vm10 }
 0x56c   : > { %v1896_v3 = vsel %vm1895_vm9, %v4305_v28, %v1892_v44  ;;  %v1899_v45 = vmul.f32 %v4307_v39, %v1898_v22 }
 0x56d   : > { %v1908_v47 = vmul.f32 %v1896_v3, %v1857_v62  ;;  %v3991_v62 = vld [vmem:[%s6528_s7 + $0xe8] sm:$0xff] }
 0x56e   : > { %v1900_v48 = vmul.f32 0.5, %v1899_v45  ;;  %2084 = vmatpush.msrb.mxu0 %v3991_v62 }
 0x56f   : > { %v1914_v51 = vmul.f32 %v4260_v34, %v1908_v47 }
 0x570   : > { %v1901_v33 = vsub.f32 1.5, %v1900_v48  ;;  %2085 = vmatpush.msrb.mxu0 %v3990_v26 }
 0x571   : > { %v1920_v61 = vadd.f32 %v4261_v38, %v1914_v51 }
 0x572   : > { %v1902_v55 = vmul.f32 %v4307_v39, %v1901_v33  ;;  %2086 = vmatpush.msrb.mxu0 %v3989_v16 }
 0x573   : > { %3975 = vmatmul.msk.f32.gmra.mxu3 %vm1434_vm0, %v1920_v61 }
 0x574   : > { %v1906_v58 = vsel %vm1905_vm12, %v4307_v39, %v1902_v55  ;;  %2087 = vmatpush.msrb.mxu0 %v3988_v4 }
 0x575   : > { %v1909_v59 = vmul.f32 %v1906_v58, %v5788_v21  ;;  %v3987_v21 = vld [vmem:[%s6528_s7 + $0xc8] sm:$0xff] }
 0x576   : > { %2088 = vmatpush.msrb.mxu0 %v3987_v21 }
 0x577   : > { %v1915_v60 = vmul.f32 %v4260_v34, %v1909_v59 }
 0x578   : > { %2089 = vmatpush.msrb.mxu0 %v3986_v8 }
 0x579   : > { %v1921_v7 = vadd.f32 %v4261_v38, %v1915_v60  ;;  %v3978_v60 = vld [vmem:[%s6528_s7 + $0x80] sm:$0xff] }
 0x57a   : > { %2090 = vmatpush.msrb.mxu0 %v3985_v9 }
 0x57b   : > { %3976 = vmatmul.msk.f32.gmra.mxu3 %vm1434_vm0, %v1921_v7 }
 0x57c   : > { %2091 = vmatpush.msrb.mxu0 %v3984_v11 }
 0x57e   : > { %2092 = vmatpush.msrb.mxu0 %v3983_v13 }
 0x580   : > { %2093 = vmatpush.msrb.mxu0 %v3982_v18 }
 0x582   : > { %2094 = vmatpush.msrb.mxu0 %v3981_v20 }
 0x584   : > { %2095 = vmatpush.msrb.mxu0 %v3980_v2 }
 0x586   : > { %2096 = vmatpush.msrb.mxu0 %v3979_v32 }
 0x588   : > { %2097 = vmatpush.msrb.mxu0 %v3978_v60 }
 0x5ee   : > { %v1953_v63 = vpop.f32.mrf.mxu3 }
 0x5ef   : > { %v1962_v57 = vmul.f32 %v5646_v50, %v1953_v63 }
 0x5f1   : > { %v1967_v14 = vrot.slane %v1962_v57, 7  ;;  %v1973_v29 = vrot.slane %v1962_v57, 1  ;;  %v1984_v37 = vmul.f32 %v1983_v24, %v1962_v57 }
 0x5f6   : > { %v1956_v10 = vpop.f32.mrf.mxu3 }
 0x5f7   : > { %v1963_v12 = vmul.f32 %v1956_v10, %v5651_v52 }
 0x5f9   : > { %v1968_v0 = vrot.slane %v1963_v12, 7  ;;  %v1974_v25 = vrot.slane %v1963_v12, 1  ;;  %v1985_v30 = vmul.f32 %v1983_v24, %v1963_v12 }
 0x5fb   : > { %v1971_v19 = vsel %vm1583_vm14, %v1967_v14, %v1968_v0  ;;  %v1977_v38 = vsel %vm1590_vm15, %v1973_v29, %v1974_v25 }
 0x5fc   : > { %v1981_v23 = vmul.f32 %v1979_v17, %v1971_v19  ;;  %v1991_v47 = vmul.f32 %v1990_v36, %v1977_v38 }
 0x5fe   : > { %v1959_v27 = vpop.f32.mrf.mxu3  ;;  %v1988_v40 = vadd.f32 %v1985_v30, %v1981_v23 }
 0x5ff   : > { %v1964_v28 = vmul.f32 %v5674_v5, %v1959_v27 }
 0x601   : > { %v1969_v34 = vrot.slane %v1964_v28, 7  ;;  %v1975_v35 = vrot.slane %v1964_v28, 1  ;;  %v1986_v3 = vmul.f32 %v1983_v24, %v1964_v28 }
 0x603   : > { %v1970_v41 = vsel %vm1583_vm14, %v1968_v0, %v1969_v34  ;;  %v1972_v42 = vsel %vm1583_vm14, %v1969_v34, %v1967_v14  ;;  %v1976_v39 = vsel %vm1590_vm15, %v1974_v25, %v1975_v35  ;;  %v1978_v43 = vsel %vm1590_vm15, %v1975_v35, %v1973_v29 }
 0x604   : > { %v1980_v44 = vmul.f32 %v1979_v17, %v1972_v42  ;;  %v1982_v22 = vmul.f32 %v1979_v17, %v1970_v41  ;;  %v1992_v45 = vmul.f32 %v1990_v36, %v1976_v39  ;;  %v1993_v61 = vmul.f32 %v1990_v36, %v1978_v43 }
 0x606   : > { %v1989_v48 = vadd.f32 %v1986_v3, %v1982_v22  ;;  %v1995_v51 = vadd.f32 %v1992_v45, %v1988_v40  ;;  %v1987_v33 = vadd.f32 %v1984_v37, %v1980_v44 }
 0x608   : > { %v1998_v55 = vsub.f32 0.0, %v1995_v51  ;;  %v5881_v58 = vadd.f32 %v1991_v47, %v1987_v33  ;;  %v5883_v59 = vadd.f32 %v1993_v61, %v1989_v48  ;;  %v4002_v48 = vld [vmem:[%s6530_s9 + $0x78] sm:$0xff]  ;;  %v4000_v33 = vld [vmem:[%s6530_s9 + $0x68] sm:$0xff]  ;;  %v3999_v61 = vld [vmem:[%s6530_s9 + $0x60] sm:$0xff] }
 0x609   : > { %2209 = vmatpush.msrb.mxu2 %v4002_v48 }
 0x60a   : > { %v2002_v7 = vmul.f32 1.442695, %v1998_v55  ;;  %v1997_v15 = vsub.f32 0.0, %v5881_v58  ;;  %v1999_v56 = vsub.f32 0.0, %v5883_v59  ;;  %v3998_v55 = vld [vmem:[%s6530_s9 + $0x58] sm:$0xff] }
 0x60c   : > { %4308 = vpow2.f32 %v2002_v7  ;;  %v2000_v62 = vmul.f32 1.442695, %v1997_v15  ;;  %v2004_v26 = vmul.f32 1.442695, %v1999_v56  ;;  %v3996_v7 = vld [vmem:[%s6530_s9 + $0x48] sm:$0xff]  ;;  %v3995_v56 = vld [vmem:[%s6530_s9 + $0x40] sm:$0xff] }
 0x60e   : > { %4310 = vpow2.f32 %v2000_v62 }
 0x60f   : > { %4312 = vpow2.f32 %v2004_v26 }
 0x612   : > { %v4309_v16 = vpop.eup %4308 }
 0x613   : > { %v2007_v63 = vadd.f32 1.0, %v4309_v16 }
 0x614   : > { %v4311_v4 = vpop.eup %4310 }
 0x615   : > { %v4313_v21 = vpop.eup %4312  ;;  %4314 = vrcp.f32 %v2007_v63  ;;  %v2006_v8 = vadd.f32 1.0, %v4311_v4  ;;  %v2033_v11 = vand.u32 2147483647, %v2007_v63  ;;  %v2035_v6 = vand.u32 2147483648, %v2007_v63 }
 0x616   : > { %v2008_v9 = vadd.f32 1.0, %v4313_v21  ;;  %vm2029_vm1 = vweird.f32 %v2007_v63 }
 0x617   : > { %4316 = vrcp.f32 %v2006_v8  ;;  %vm2034_vm2 = vcmp.eq.f32.partialorder %v2033_v11, 8.507059e+37  ;;  %v2036_v24 = vor.u32 1.1754944e-38, %v2035_v6  ;;  %v2020_v25 = vand.u32 2147483648, %v2006_v8 }
 0x618   : > { %4318 = vrcp.f32 %v2008_v9  ;;  %v2018_v2 = vand.u32 2147483647, %v2006_v8  ;;  %v2050_v28 = vand.u32 2147483648, %v2008_v9  ;;  %v2048_v32 = vand.u32 2147483647, %v2008_v9 }
 0x619   : > { %vm2014_vm8 = vweird.f32 %v2006_v8  ;;  %v2021_v37 = vor.u32 1.1754944e-38, %v2020_v25  ;;  %vm2044_vm10 = vweird.f32 %v2008_v9 }
 0x61a   : > { %vm2019_vm11 = vcmp.eq.f32.partialorder %v2018_v2, 8.507059e+37  ;;  %v2051_v41 = vor.u32 1.1754944e-38, %v2050_v28 }
 0x61b   : > { %v4315_v57 = vpop.eup %4314 }
 0x61c   : > { %v2025_v10 = vmul.f32 %v4315_v57, %v2007_v63  ;;  %vm2030_vm13 = vweird.f32 %v4315_v57 }
 0x61d   : > { %v4317_v12 = vpop.eup %4316  ;;  %vm2031_vm3 = vmor %vm2029_vm1, %vm2030_vm13  ;;  %vm2049_vm13 = vcmp.eq.f32.partialorder %v2048_v32, 8.507059e+37 }
 0x61e   : > { %v2026_v13 = vsub.f32 1.0, %v2025_v10  ;;  %v4319_v14 = vpop.eup %4318  ;;  %v2010_v0 = vmul.f32 %v4317_v12, %v2006_v8  ;;  %vm2015_vm4 = vweird.f32 %v4317_v12 }
 0x61f   : > { %v2040_v18 = vmul.f32 %v4319_v14, %v2008_v9  ;;  %vm2045_vm7 = vweird.f32 %v4319_v14  ;;  %vm2016_vm9 = vmor %vm2014_vm8, %vm2015_vm4 }
 0x620   : > { %v2027_v17 = vmul.f32 %v4315_v57, %v2026_v13  ;;  %v2011_v19 = vsub.f32 1.0, %v2010_v0  ;;  %vm2046_vm12 = vmor %vm2044_vm10, %vm2045_vm7 }
 0x621   : > { %v2041_v23 = vsub.f32 1.0, %v2040_v18 }
 0x622   : > { %v2028_v20 = vadd.f32 %v4315_v57, %v2027_v17  ;;  %v2012_v27 = vmul.f32 %v4317_v12, %v2011_v19 }
 0x623   : > { %v2042_v30 = vmul.f32 %v4319_v14, %v2041_v23 }
 0x624   : > { %v2032_v29 = vsel %vm2031_vm3, %v4315_v57, %v2028_v20  ;;  %v2013_v35 = vadd.f32 %v4317_v12, %v2012_v27 }
 0x625   : > { %v2037_v34 = vsel %vm2034_vm2, %v2036_v24, %v2032_v29  ;;  %v2043_v38 = vadd.f32 %v4319_v14, %v2042_v30 }
 0x626   : > { %v2055_v36 = vmul.f32 %v2037_v34, %v1995_v51  ;;  %v2017_v40 = vsel %vm2016_vm9, %v4317_v12, %v2013_v35  ;;  %v4001_v51 = vld [vmem:[%s6530_s9 + $0x70] sm:$0xff] }
 0x627   : > { %v2022_v39 = vsel %vm2019_vm11, %v2021_v37, %v2017_v40  ;;  %v2047_v43 = vsel %vm2046_vm12, %v4319_v14, %v2043_v38  ;;  %2210 = vmatpush.msrb.mxu2 %v4001_v51 }
 0x628   : > { %v5892_v42 = vsel %vm1431_vm5, %v2055_v36, %v2037_v34  ;;  %v2054_v44 = vmul.f32 %v2022_v39, %v5881_v58  ;;  %v2052_v22 = vsel %vm2049_vm13, %v2051_v41, %v2047_v43  ;;  %v4262_v58 = vld [vmem:[%s6529_s8 + $0x1] ss:$0 sm:$0xff] }
 0x629   : > { %2170 = vrot.lane.b32.xlu1 %v5892_v42, %s4490_s22  ;;  %v2056_v3 = vmul.f32 %v2052_v22, %v5883_v59  ;;  %2211 = vmatpush.msrb.mxu2 %v4000_v33  ;;  %v3997_v59 = vld [vmem:[%s6530_s9 + $0x50] sm:$0xff] }
 0x62a   : > { %v5900_v45 = vsel %vm1431_vm5, %v2054_v44, %v2022_v39 }
 0x62b   : > { %2168 = vrot.lane.b32.xlu2 %v5900_v45, %s4490_s22  ;;  %2098 = vmatmul.f32.vlgmr.msrb.gmra.mxu0 %v5900_v45  ;;  %v5907_v47 = vsel %vm1431_vm5, %v2056_v3, %v2052_v22 }
 0x62c   : > { %2172 = vrot.lane.b32.xlu0 %v5907_v47, %s4490_s22  ;;  %2212 = vmatpush.msrb.mxu2 %v3999_v61 }
 0x62e   : > { %2213 = vmatpush.msrb.mxu2 %v3998_v55 }
 0x630   : > { %2214 = vmatpush.msrb.mxu2 %v3997_v59 }
 0x632   : > { %2215 = vmatpush.msrb.mxu2 %v3996_v7 }
 0x633   : > { %2101 = vmatmul.f32.gmra.mxu0 %v5892_v42 }
 0x634   : > { %2216 = vmatpush.msrb.mxu2 %v3995_v56 }
 0x63b   : > { %2104 = vmatmul.f32.gmra.mxu0 %v5907_v47 }
 0x685   : > { %v2169_v24 = vpop.permute.xlu2 %2168 }
 0x686   : > { %v2177_v29 = vmul.f32 %v2169_v24, %v5900_v45 }
 0x69b   : > { %v2171_v41 = vpop.permute.xlu1 %2170 }
 0x69c   : > { %v2178_v3 = vmul.f32 %v2171_v41, %v5892_v42 }
 0x69e   : > { %v2173_v59 = vpop.permute.xlu0 %2172 }
 0x69f   : > { %v2179_v56 = vmul.f32 %v2173_v59, %v5907_v47 }
 0x6a8   : > { %v2099_v60 = vpop.f32.mrf.mxu0 }
 0x6a9   : > { %v2100_v15 = vadd.f32 %v4262_v58, %v2099_v60 }
 0x6ab   : > { %v2108_v62 = vmul.f32 1.442695, %v2100_v15 }
 0x6ad   : > { %4320 = vpow2.f32 %v2108_v62 }
 0x6b0   : > { %v2102_v26 = vpop.f32.mrf.mxu0 }
 0x6b1   : > { %v2103_v16 = vadd.f32 %v4262_v58, %v2102_v26 }
 0x6b3   : > { %v4321_v63 = vpop.eup %4320  ;;  %v2110_v4 = vmul.f32 1.442695, %v2103_v16 }
 0x6b4   : > { %v2114_v21 = vadd.f32 2.0, %v4321_v63 }
 0x6b5   : > { %4322 = vpow2.f32 %v2110_v4 }
 0x6b6   : > { %4324 = vrcp.f32 %v2114_v21  ;;  %v2128_v14 = vand.u32 2147483648, %v2114_v21  ;;  %v2126_v17 = vand.u32 2147483647, %v2114_v21  ;;  %vm2122_vm2 = vweird.f32 %v2114_v21 }
 0x6b8   : > { %v2105_v8 = vpop.f32.mrf.mxu0  ;;  %v2129_v25 = vor.u32 1.1754944e-38, %v2128_v14  ;;  %vm2127_vm4 = vcmp.eq.f32.partialorder %v2126_v17, 8.507059e+37 }
 0x6b9   : > { %v2106_v9 = vadd.f32 %v4262_v58, %v2105_v8 }
 0x6bb   : > { %v4323_v57 = vpop.eup %4322  ;;  %v2112_v10 = vmul.f32 1.442695, %v2106_v9 }
 0x6bc   : > { %v4325_v11 = vpop.eup %4324  ;;  %v2115_v12 = vadd.f32 2.0, %v4323_v57 }
 0x6bd   : > { %v2118_v13 = vmul.f32 %v4325_v11, %v2114_v21  ;;  %4326 = vpow2.f32 %v2112_v10  ;;  %vm2123_vm1 = vweird.f32 %v4325_v11 }
 0x6be   : > { %4328 = vrcp.f32 %v2115_v12  ;;  %vm2124_vm3 = vmor %vm2122_vm2, %vm2123_vm1  ;;  %v2143_v34 = vand.u32 2147483648, %v2115_v12  ;;  %v2141_v37 = vand.u32 2147483647, %v2115_v12  ;;  %vm2137_vm8 = vweird.f32 %v2115_v12 }
 0x6bf   : > { %v2119_v6 = vsub.f32 1.0, %v2118_v13 }
 0x6c0   : > { %v2144_v39 = vor.u32 1.1754944e-38, %v2143_v34  ;;  %vm2142_vm10 = vcmp.eq.f32.partialorder %v2141_v37, 8.507059e+37 }
 0x6c1   : > { %v2120_v0 = vmul.f32 %v4325_v11, %v2119_v6 }
 0x6c3   : > { %v4327_v18 = vpop.eup %4326  ;;  %v2121_v19 = vadd.f32 %v4325_v11, %v2120_v0 }
 0x6c4   : > { %v4329_v20 = vpop.eup %4328  ;;  %v2116_v23 = vadd.f32 2.0, %v4327_v18 }
 0x6c5   : > { %v2133_v27 = vmul.f32 %v4329_v20, %v2115_v12  ;;  %v2125_v2 = vsel %vm2124_vm3, %v4325_v11, %v2121_v19  ;;  %vm2138_vm7 = vweird.f32 %v4329_v20 }
 0x6c6   : > { %4330 = vrcp.f32 %v2116_v23  ;;  %v2130_v28 = vsel %vm2127_vm4, %v2129_v25, %v2125_v2  ;;  %vm2139_vm9 = vmor %vm2137_vm8, %vm2138_vm7  ;;  %v2158_v51 = vand.u32 2147483648, %v2116_v23  ;;  %v2156_v55 = vand.u32 2147483647, %v2116_v23  ;;  %v4011_v25 = vld [vmem:[%s6526_s5 + $0x58] sm:$0xff]  ;;  %v4008_v2 = vld [vmem:[%s6526_s5 + $0x40] sm:$0xff] }
 0x6c7   : > { %v2134_v30 = vsub.f32 1.0, %v2133_v27  ;;  %v2162_v32 = vsub.f32 1.0, %v2130_v28  ;;  %vm2152_vm12 = vweird.f32 %v2116_v23  ;;  %2335 = vmatpush.msrb.mxu3 %v4011_v25  ;;  %v4009_v27 = vld [vmem:[%s6526_s5 + $0x48] sm:$0xff] }
 0x6c8   : > { %v2159_v60 = vor.u32 1.1754944e-38, %v2158_v51  ;;  %vm2157_vm1 = vcmp.eq.f32.partialorder %v2156_v55, 8.507059e+37  ;;  %v4264_v55 = vld [vmem:[%s6525_s4 + $0x2] ss:$0 sm:$0xff] }
 0x6c9   : > { %v2180_v35 = vmul.f32 %v2177_v29, %v2162_v32  ;;  %v2135_v36 = vmul.f32 %v4329_v20, %v2134_v30 }
 0x6cb   : > { %4003 = vmatmul.msk.f32.vlgmr.msrb.gmra.mxu2 %vm1804_vm6, %v2180_v35  ;;  %v2136_v38 = vadd.f32 %v4329_v20, %v2135_v36 }
 0x6cc   : > { %v4331_v40 = vpop.eup %4330 }
 0x6cd   : > { %v2148_v43 = vmul.f32 %v4331_v40, %v2116_v23  ;;  %v2140_v44 = vsel %vm2139_vm9, %v4329_v20, %v2136_v38  ;;  %vm2153_vm11 = vweird.f32 %v4331_v40  ;;  %v4010_v23 = vld [vmem:[%s6526_s5 + $0x50] sm:$0xff] }
 0x6ce   : > { %v2145_v22 = vsel %vm2142_vm10, %v2144_v39, %v2140_v44  ;;  %vm2154_vm13 = vmor %vm2152_vm12, %vm2153_vm11  ;;  %2336 = vmatpush.msrb.mxu3 %v4010_v23 }
 0x6cf   : > { %v2149_v45 = vsub.f32 1.0, %v2148_v43  ;;  %v2163_v48 = vsub.f32 1.0, %v2145_v22 }
 0x6d0   : > { %2337 = vmatpush.msrb.mxu3 %v4009_v27  ;;  %v4022_v27 = vld [vmem:[%s6528_s7 + $0x130] sm:$0xff] }
 0x6d1   : > { %v2181_v33 = vmul.f32 %v2178_v3, %v2163_v48  ;;  %v2150_v61 = vmul.f32 %v4331_v40, %v2149_v45  ;;  %v4263_v48 = vld [vmem:[%s6524_s3 + $0x2] ss:$0 sm:$0xff] }
 0x6d2   : > { %2338 = vmatpush.msrb.mxu3 %v4008_v2 }
 0x6d3   : > { %4004 = vmatmul.msk.f32.gmra.mxu2 %vm1804_vm6, %v2181_v33  ;;  %v2151_v58 = vadd.f32 %v4331_v40, %v2150_v61 }
 0x6d5   : > { %v2155_v7 = vsel %vm2154_vm13, %v4331_v40, %v2151_v58 }
 0x6d6   : > { %v2160_v15 = vsel %vm2157_vm1, %v2159_v60, %v2155_v7 }
 0x6d7   : > { %v2164_v42 = vsub.f32 1.0, %v2160_v15 }
 0x6d9   : > { %v2182_v62 = vmul.f32 %v2179_v56, %v2164_v42 }
 0x6db   : > { %4005 = vmatmul.msk.f32.gmra.mxu2 %vm1804_vm6, %v2182_v62 }
 0x74e   : > { %v2218_v26 = vpop.f32.mrf.mxu2 }
 0x74f   : > { %v5947_v16 = vadd.f32 %v2218_v26, %v5766_v46 }
 0x751   : > { %v2231_v63 = vsel %vm1434_vm0, %v5947_v16, 0.0 }
 0x752   : > { %2232 = vadd.xlane.f32.xlu2 %v2231_v63 }
 0x756   : > { %v2221_v4 = vpop.f32.mrf.mxu2 }
 0x757   : > { %v5952_v21 = vadd.f32 %v2221_v4, %v5771_v49 }
 0x759   : > { %v2234_v8 = vsel %vm1434_vm0, %v5952_v21, 0.0 }
 0x75a   : > { %2235 = vadd.xlane.f32.xlu0 %v2234_v8 }
 0x75e   : > { %v2224_v47 = vpop.f32.mrf.mxu2 }
 0x75f   : > { %v5957_v9 = vadd.f32 %v2224_v47, %v5776_v54 }
 0x761   : > { %v2237_v46 = vsel %vm1434_vm0, %v5957_v9, 0.0 }
 0x762   : > { %2238 = vadd.xlane.f32.xlu1 %v2237_v46 }
 0x7c5   : > { %v2233_v57 = vpop.xlane.xlu2 %2232 }
 0x7c6   : > { %v2240_v10 = vmul.f32 %v2233_v57, %v5572_v31 }
 0x7c8   : > { %v2243_v11 = vsub.f32 %v5947_v16, %v2240_v10 }
 0x7ca   : > { %v2246_v12 = vmul.f32 %v2243_v11, %v2243_v11 }
 0x7cc   : > { %v2249_v49 = vsel %vm1434_vm0, %v2246_v12, 0.0 }
 0x7cd   : > { %2250 = vadd.xlane.f32.xlu2 %v2249_v49  ;;  %v2236_v13 = vpop.xlane.xlu0 %2235 }
 0x7ce   : > { %v2241_v6 = vmul.f32 %v2236_v13, %v5572_v31  ;;  %v4031_v13 = vld [vmem:[%s6528_s7 + $0x178] sm:$0xff] }
 0x7cf   : > { %2469 = vmatpush.msrb.mxu1 %v4031_v13 }
 0x7d0   : > { %v2244_v14 = vsub.f32 %v5952_v21, %v2241_v6  ;;  %v4030_v6 = vld [vmem:[%s6528_s7 + $0x170] sm:$0xff] }
 0x7d1   : > { %2470 = vmatpush.msrb.mxu1 %v4030_v6 }
 0x7d2   : > { %v2247_v54 = vmul.f32 %v2244_v14, %v2244_v14 }
 0x7d4   : > { %v2252_v0 = vsel %vm1434_vm0, %v2247_v54, 0.0  ;;  %v4028_v54 = vld [vmem:[%s6528_s7 + $0x160] sm:$0xff] }
 0x7d5   : > { %2253 = vadd.xlane.f32.xlu0 %v2252_v0  ;;  %v2239_v17 = vpop.xlane.xlu1 %2238  ;;  %v4027_v0 = vld [vmem:[%s6528_s7 + $0x158] sm:$0xff] }
 0x7d6   : > { %v2242_v18 = vmul.f32 %v2239_v17, %v5572_v31 }
 0x7d8   : > { %v5969_v19 = vsub.f32 %v5957_v9, %v2242_v18  ;;  %v4026_v18 = vld [vmem:[%s6528_s7 + $0x150] sm:$0xff] }
 0x7da   : > { %v2248_v20 = vmul.f32 %v5969_v19, %v5969_v19 }
 0x7dc   : > { %v2255_v24 = vsel %vm1434_vm0, %v2248_v20, 0.0  ;;  %v4024_v20 = vld [vmem:[%s6528_s7 + $0x140] sm:$0xff] }
 0x7dd   : > { %2256 = vadd.xlane.f32.xlu1 %v2255_v24  ;;  %v4023_v24 = vld [vmem:[%s6528_s7 + $0x138] sm:$0xff] }
 0x840   : > { %v2251_v28 = vpop.xlane.xlu2 %2250 }
 0x841   : > { %v2258_v29 = vmul.f32 %v2251_v28, %v5572_v31  ;;  %v4021_v28 = vld [vmem:[%s6528_s7 + $0x128] sm:$0xff] }
 0x843   : > { %v2261_v30 = vadd.f32 1e-05, %v2258_v29  ;;  %v4015_v29 = vld [vmem:[%s6527_s6 + $0x8] sm:$0x7] }
 0x845   : > { %4332 = vrsqrt.f32 %v2261_v30  ;;  %vm2270_vm3 = vweird.f32 %v2261_v30 }
 0x848   : > { %v2254_v32 = vpop.xlane.xlu0 %2253 }
 0x849   : > { %v2259_v34 = vmul.f32 %v2254_v32, %v5572_v31 }
 0x84b   : > { %v4333_v35 = vpop.eup %4332  ;;  %v2262_v36 = vadd.f32 1e-05, %v2259_v34  ;;  %v2366_v34 = vperm.slane %v4015_v29, 0 }
 0x84c   : > { %v2265_v37 = vmul.f32 %v4333_v35, %v2261_v30  ;;  %vm2271_vm2 = vweird.f32 %v4333_v35 }
 0x84d   : > { %4334 = vrsqrt.f32 %v2262_v36  ;;  %vm2272_vm4 = vmor %vm2270_vm3, %vm2271_vm2  ;;  %vm2280_vm8 = vweird.f32 %v2262_v36 }
 0x84e   : > { %v2266_v38 = vmul.f32 %v4333_v35, %v2265_v37  ;;  %v4019_v37 = vld [vmem:[%s6528_s7 + $0x118] sm:$0xff] }
 0x850   : > { %v2267_v40 = vmul.f32 0.5, %v2266_v38  ;;  %v2257_v41 = vpop.xlane.xlu1 %2256  ;;  %v2370_v38 = vperm.slane %v4015_v29, 1 }
 0x851   : > { %v2260_v39 = vmul.f32 %v2257_v41, %v5572_v31 }
 0x852   : > { %v2268_v43 = vsub.f32 1.5, %v2267_v40 }
 0x853   : > { %v4335_v44 = vpop.eup %4334  ;;  %v2263_v22 = vadd.f32 1e-05, %v2260_v39 }
 0x854   : > { %v2269_v3 = vmul.f32 %v4333_v35, %v2268_v43  ;;  %v2275_v45 = vmul.f32 %v4335_v44, %v2262_v36  ;;  %vm2281_vm7 = vweird.f32 %v4335_v44  ;;  %v4018_v43 = vld [vmem:[%s6528_s7 + $0x110] sm:$0xff] }
 0x855   : > { %4336 = vrsqrt.f32 %v2263_v22  ;;  %vm2282_vm9 = vmor %vm2280_vm8, %vm2281_vm7  ;;  %vm2290_vm11 = vweird.f32 %v2263_v22 }
 0x856   : > { %v2273_v51 = vsel %vm2272_vm4, %v4333_v35, %v2269_v3  ;;  %v2276_v33 = vmul.f32 %v4335_v44, %v2275_v45  ;;  %v4020_v35 = vld [vmem:[%s6528_s7 + $0x120] sm:$0xff]  ;;  %v4017_v45 = vld [vmem:[%s6528_s7 + $0x108] sm:$0xff] }
 0x857   : > { %v2294_v61 = vmul.f32 %v2273_v51, %v2243_v11 }
 0x858   : > { %v2277_v58 = vmul.f32 0.5, %v2276_v33  ;;  %v2377_v33 = vperm.slane %v4015_v29, 2 }
 0x859   : > { %v2300_v59 = vmul.f32 %v4263_v48, %v2294_v61 }
 0x85a   : > { %v2278_v60 = vsub.f32 1.5, %v2277_v58 }
 0x85b   : > { %v4337_v7 = vpop.eup %4336  ;;  %v2306_v15 = vadd.f32 %v4264_v55, %v2300_v59 }
 0x85c   : > { %v2279_v56 = vmul.f32 %v4335_v44, %v2278_v60  ;;  %v2285_v42 = vmul.f32 %v4337_v7, %v2263_v22  ;;  %vm2291_vm10 = vweird.f32 %v4337_v7 }
 0x85d   : > { %4012 = vmatmul.msk.f32.vlgmr.msrb.gmra.mxu3 %vm1434_vm0, %v2306_v15  ;;  %vm2292_vm12 = vmor %vm2290_vm11, %vm2291_vm10 }
 0x85e   : > { %v2283_v62 = vsel %vm2282_vm9, %v4335_v44, %v2279_v56  ;;  %v2286_v26 = vmul.f32 %v4337_v7, %v2285_v42 }
 0x85f   : > { %v2295_v63 = vmul.f32 %v2283_v62, %v2244_v14  ;;  %v4029_v14 = vld [vmem:[%s6528_s7 + $0x168] sm:$0xff] }
 0x860   : > { %v2287_v4 = vmul.f32 0.5, %v2286_v26  ;;  %2471 = vmatpush.msrb.mxu1 %v4029_v14 }
 0x861   : > { %v2301_v8 = vmul.f32 %v4263_v48, %v2295_v63 }
 0x862   : > { %v2288_v47 = vsub.f32 1.5, %v2287_v4  ;;  %2472 = vmatpush.msrb.mxu1 %v4028_v54 }
 0x863   : > { %v2307_v46 = vadd.f32 %v4264_v55, %v2301_v8 }
 0x864   : > { %v2289_v57 = vmul.f32 %v4337_v7, %v2288_v47  ;;  %2473 = vmatpush.msrb.mxu1 %v4027_v0 }
 0x865   : > { %4013 = vmatmul.msk.f32.gmra.mxu3 %vm1434_vm0, %v2307_v46 }
 0x866   : > { %v2293_v10 = vsel %vm2292_vm12, %v4337_v7, %v2289_v57  ;;  %2474 = vmatpush.msrb.mxu1 %v4026_v18 }
 0x867   : > { %v2296_v11 = vmul.f32 %v2293_v10, %v5969_v19  ;;  %v4025_v19 = vld [vmem:[%s6528_s7 + $0x148] sm:$0xff] }
 0x868   : > { %2475 = vmatpush.msrb.mxu1 %v4025_v19 }
 0x869   : > { %v2302_v12 = vmul.f32 %v4263_v48, %v2296_v11 }
 0x86a   : > { %2476 = vmatpush.msrb.mxu1 %v4024_v20 }
 0x86b   : > { %v2308_v49 = vadd.f32 %v4264_v55, %v2302_v12  ;;  %v4016_v12 = vld [vmem:[%s6528_s7 + $0x100] sm:$0xff] }
 0x86c   : > { %2477 = vmatpush.msrb.mxu1 %v4023_v24 }
 0x86d   : > { %4014 = vmatmul.msk.f32.gmra.mxu3 %vm1434_vm0, %v2308_v49 }
 0x86e   : > { %2478 = vmatpush.msrb.mxu1 %v4022_v27 }
 0x870   : > { %2479 = vmatpush.msrb.mxu1 %v4021_v28 }
 0x872   : > { %2480 = vmatpush.msrb.mxu1 %v4020_v35 }
 0x874   : > { %2481 = vmatpush.msrb.mxu1 %v4019_v37 }
 0x876   : > { %2482 = vmatpush.msrb.mxu1 %v4018_v43 }
 0x878   : > { %2483 = vmatpush.msrb.mxu1 %v4017_v45 }
 0x87a   : > { %2484 = vmatpush.msrb.mxu1 %v4016_v12 }
 0x8e0   : > { %v2340_v17 = vpop.f32.mrf.mxu3 }
 0x8e1   : > { %v2349_v25 = vmul.f32 %v5646_v50, %v2340_v17 }
 0x8e3   : > { %v2354_v30 = vrot.slane %v2349_v25, 7  ;;  %v2360_v22 = vrot.slane %v2349_v25, 1  ;;  %v2371_v61 = vmul.f32 %v2370_v38, %v2349_v25 }
 0x8e8   : > { %v2343_v23 = vpop.f32.mrf.mxu3 }
 0x8e9   : > { %v2350_v2 = vmul.f32 %v2343_v23, %v5651_v52 }
 0x8eb   : > { %v2355_v32 = vrot.slane %v2350_v2, 7  ;;  %v2361_v40 = vrot.slane %v2350_v2, 1  ;;  %v2372_v3 = vmul.f32 %v2370_v38, %v2350_v2 }
 0x8ed   : > { %v2358_v36 = vsel %vm1583_vm14, %v2354_v30, %v2355_v32  ;;  %v2364_v55 = vsel %vm1590_vm15, %v2360_v22, %v2361_v40 }
 0x8ee   : > { %v2368_v41 = vmul.f32 %v2366_v34, %v2358_v36  ;;  %v2378_v63 = vmul.f32 %v2377_v33, %v2364_v55 }
 0x8f0   : > { %v2346_v39 = vpop.f32.mrf.mxu3  ;;  %v2375_v58 = vadd.f32 %v2372_v3, %v2368_v41 }
 0x8f1   : > { %v2351_v44 = vmul.f32 %v5674_v5, %v2346_v39 }
 0x8f3   : > { %v2356_v48 = vrot.slane %v2351_v44, 7  ;;  %v2362_v51 = vrot.slane %v2351_v44, 1  ;;  %v2373_v62 = vmul.f32 %v2370_v38, %v2351_v44 }
 0x8f5   : > { %v2357_v59 = vsel %vm1583_vm14, %v2355_v32, %v2356_v48  ;;  %v2359_v60 = vsel %vm1583_vm14, %v2356_v48, %v2354_v30  ;;  %v2363_v7 = vsel %vm1590_vm15, %v2361_v40, %v2362_v51  ;;  %v2365_v15 = vsel %vm1590_vm15, %v2362_v51, %v2360_v22 }
 0x8f6   : > { %v2367_v56 = vmul.f32 %v2366_v34, %v2359_v60  ;;  %v2369_v42 = vmul.f32 %v2366_v34, %v2357_v59  ;;  %v2379_v26 = vmul.f32 %v2377_v33, %v2363_v7  ;;  %v2380_v46 = vmul.f32 %v2377_v33, %v2365_v15 }
 0x8f8   : > { %v2376_v4 = vadd.f32 %v2373_v62, %v2369_v42  ;;  %v2382_v8 = vadd.f32 %v2379_v26, %v2375_v58  ;;  %v2374_v47 = vadd.f32 %v2371_v61, %v2367_v56 }
 0x8fa   : > { %v2385_v57 = vsub.f32 0.0, %v2382_v8  ;;  %v6062_v10 = vadd.f32 %v2378_v63, %v2374_v47  ;;  %v6064_v11 = vadd.f32 %v2380_v46, %v2376_v4  ;;  %v4040_v4 = vld [vmem:[%s6530_s9 + $0xb8] sm:$0xff]  ;;  %v4038_v47 = vld [vmem:[%s6530_s9 + $0xa8] sm:$0xff]  ;;  %v4037_v46 = vld [vmem:[%s6530_s9 + $0xa0] sm:$0xff] }
 0x8fb   : > { %2596 = vmatpush.msra.mxu2 %v4040_v4 }
 0x8fc   : > { %v2389_v49 = vmul.f32 1.442695, %v2385_v57  ;;  %v2384_v13 = vsub.f32 0.0, %v6062_v10  ;;  %v2386_v6 = vsub.f32 0.0, %v6064_v11  ;;  %v4036_v57 = vld [vmem:[%s6530_s9 + $0x98] sm:$0xff] }
 0x8fe   : > { %4338 = vpow2.f32 %v2389_v49  ;;  %v2387_v14 = vmul.f32 1.442695, %v2384_v13  ;;  %v2391_v54 = vmul.f32 1.442695, %v2386_v6  ;;  %v4034_v49 = vld [vmem:[%s6530_s9 + $0x88] sm:$0xff]  ;;  %v4033_v6 = vld [vmem:[%s6530_s9 + $0x80] sm:$0xff] }
 0x900   : > { %4340 = vpow2.f32 %v2387_v14 }
 0x901   : > { %4342 = vpow2.f32 %v2391_v54 }
 0x904   : > { %v4339_v0 = vpop.eup %4338 }
 0x905   : > { %v2394_v17 = vadd.f32 1.0, %v4339_v0 }
 0x906   : > { %v4341_v18 = vpop.eup %4340 }
 0x907   : > { %v4343_v19 = vpop.eup %4342  ;;  %4344 = vrcp.f32 %v2394_v17  ;;  %v2393_v20 = vadd.f32 1.0, %v4341_v18  ;;  %v2420_v27 = vand.u32 2147483647, %v2394_v17  ;;  %v2422_v29 = vand.u32 2147483648, %v2394_v17 }
 0x908   : > { %v2395_v24 = vadd.f32 1.0, %v4343_v19  ;;  %vm2416_vm1 = vweird.f32 %v2394_v17 }
 0x909   : > { %4346 = vrcp.f32 %v2393_v20  ;;  %vm2421_vm2 = vcmp.eq.f32.partialorder %v2420_v27, 8.507059e+37  ;;  %v2423_v38 = vor.u32 1.1754944e-38, %v2422_v29  ;;  %v2407_v40 = vand.u32 2147483648, %v2393_v20 }
 0x90a   : > { %4348 = vrcp.f32 %v2395_v24  ;;  %v2405_v43 = vand.u32 2147483647, %v2393_v20  ;;  %v2437_v44 = vand.u32 2147483648, %v2395_v24  ;;  %v2435_v45 = vand.u32 2147483647, %v2395_v24 }
 0x90b   : > { %vm2401_vm8 = vweird.f32 %v2393_v20  ;;  %v2408_v61 = vor.u32 1.1754944e-38, %v2407_v40  ;;  %vm2431_vm10 = vweird.f32 %v2395_v24 }
 0x90c   : > { %vm2406_vm11 = vcmp.eq.f32.partialorder %v2405_v43, 8.507059e+37  ;;  %v2438_v59 = vor.u32 1.1754944e-38, %v2437_v44 }
 0x90d   : > { %v4345_v25 = vpop.eup %4344 }
 0x90e   : > { %v2412_v23 = vmul.f32 %v4345_v25, %v2394_v17  ;;  %vm2417_vm13 = vweird.f32 %v4345_v25 }
 0x90f   : > { %v4347_v2 = vpop.eup %4346  ;;  %vm2418_vm3 = vmor %vm2416_vm1, %vm2417_vm13  ;;  %vm2436_vm13 = vcmp.eq.f32.partialorder %v2435_v45, 8.507059e+37 }
 0x910   : > { %v2413_v28 = vsub.f32 1.0, %v2412_v23  ;;  %v4349_v30 = vpop.eup %4348  ;;  %v2397_v32 = vmul.f32 %v4347_v2, %v2393_v20  ;;  %vm2402_vm4 = vweird.f32 %v4347_v2 }
 0x911   : > { %v2427_v35 = vmul.f32 %v4349_v30, %v2395_v24  ;;  %vm2432_vm7 = vweird.f32 %v4349_v30  ;;  %vm2403_vm9 = vmor %vm2401_vm8, %vm2402_vm4 }
 0x912   : > { %v2414_v34 = vmul.f32 %v4345_v25, %v2413_v28  ;;  %v2398_v36 = vsub.f32 1.0, %v2397_v32  ;;  %vm2433_vm12 = vmor %vm2431_vm10, %vm2432_vm7 }
 0x913   : > { %v2428_v41 = vsub.f32 1.0, %v2427_v35 }
 0x914   : > { %v2415_v37 = vadd.f32 %v4345_v25, %v2414_v34  ;;  %v2399_v39 = vmul.f32 %v4347_v2, %v2398_v36 }
 0x915   : > { %v2429_v3 = vmul.f32 %v4349_v30, %v2428_v41 }
 0x916   : > { %v2419_v22 = vsel %vm2418_vm3, %v4345_v25, %v2415_v37  ;;  %v2400_v51 = vadd.f32 %v4347_v2, %v2399_v39 }
 0x917   : > { %v2424_v48 = vsel %vm2421_vm2, %v2423_v38, %v2419_v22  ;;  %v2430_v55 = vadd.f32 %v4349_v30, %v2429_v3 }
 0x918   : > { %v2442_v33 = vmul.f32 %v2424_v48, %v2382_v8  ;;  %v2404_v58 = vsel %vm2403_vm9, %v4347_v2, %v2400_v51  ;;  %v4039_v8 = vld [vmem:[%s6530_s9 + $0xb0] sm:$0xff] }
 0x919   : > { %v2409_v7 = vsel %vm2406_vm11, %v2408_v61, %v2404_v58  ;;  %v2434_v15 = vsel %vm2433_vm12, %v4349_v30, %v2430_v55  ;;  %2597 = vmatpush.msra.mxu2 %v4039_v8 }
 0x91a   : > { %v6073_v60 = vsel %vm1431_vm5, %v2442_v33, %v2424_v48  ;;  %v2441_v56 = vmul.f32 %v2409_v7, %v6062_v10  ;;  %v2439_v42 = vsel %vm2436_vm13, %v2438_v59, %v2434_v15  ;;  %v4265_v10 = vld [vmem:[%s6529_s8 + $0x2] ss:$0 sm:$0xff] }
 0x91b   : > { %2557 = vrot.lane.b32.xlu0 %v6073_v60, %s4490_s22  ;;  %v2443_v62 = vmul.f32 %v2439_v42, %v6064_v11  ;;  %2598 = vmatpush.msra.mxu2 %v4038_v47  ;;  %v4035_v11 = vld [vmem:[%s6530_s9 + $0x90] sm:$0xff] }
 0x91c   : > { %v6081_v26 = vsel %vm1431_vm5, %v2441_v56, %v2409_v7 }
 0x91d   : > { %2555 = vrot.lane.b32.xlu2 %v6081_v26, %s4490_s22  ;;  %2485 = vmatmul.f32.vlgmr.msrb.gmra.mxu1 %v6081_v26  ;;  %v6088_v63 = vsel %vm1431_vm5, %v2443_v62, %v2439_v42 }
 0x91e   : > { %2559 = vrot.lane.b32.xlu1 %v6088_v63, %s4490_s22  ;;  %2599 = vmatpush.msra.mxu2 %v4037_v46 }
 0x920   : > { %2600 = vmatpush.msra.mxu2 %v4036_v57 }
 0x922   : > { %2601 = vmatpush.msra.mxu2 %v4035_v11 }
 0x924   : > { %2602 = vmatpush.msra.mxu2 %v4034_v49 }
 0x925   : > { %2488 = vmatmul.f32.gmra.mxu1 %v6073_v60 }
 0x926   : > { %2603 = vmatpush.msra.mxu2 %v4033_v6 }
 0x92d   : > { %2491 = vmatmul.f32.gmra.mxu1 %v6088_v63 }
 0x977   : > { %v2556_v38 = vpop.permute.xlu2 %2555 }
 0x978   : > { %v2564_v22 = vmul.f32 %v2556_v38, %v6081_v26 }
 0x98d   : > { %v2558_v59 = vpop.permute.xlu0 %2557 }
 0x98e   : > { %v2565_v62 = vmul.f32 %v2558_v59, %v6073_v60 }
 0x990   : > { %v2560_v11 = vpop.permute.xlu1 %2559 }
 0x991   : > { %v2566_v6 = vmul.f32 %v2560_v11, %v6088_v63 }
 0x99a   : > { %v2486_v12 = vpop.f32.mrf.mxu1 }
 0x99b   : > { %v2487_v13 = vadd.f32 %v4265_v10, %v2486_v12 }
 0x99d   : > { %v2495_v14 = vmul.f32 1.442695, %v2487_v13 }
 0x99f   : > { %4350 = vpow2.f32 %v2495_v14 }
 0x9a2   : > { %v2489_v54 = vpop.f32.mrf.mxu1 }
 0x9a3   : > { %v2490_v0 = vadd.f32 %v4265_v10, %v2489_v54 }
 0x9a5   : > { %v4351_v17 = vpop.eup %4350  ;;  %v2497_v18 = vmul.f32 1.442695, %v2490_v0 }
 0x9a6   : > { %v2501_v19 = vadd.f32 2.0, %v4351_v17 }
 0x9a7   : > { %4352 = vpow2.f32 %v2497_v18 }
 0x9a8   : > { %4354 = vrcp.f32 %v2501_v19  ;;  %v2515_v30 = vand.u32 2147483648, %v2501_v19  ;;  %v2513_v34 = vand.u32 2147483647, %v2501_v19  ;;  %vm2509_vm2 = vweird.f32 %v2501_v19 }
 0x9aa   : > { %v2492_v20 = vpop.f32.mrf.mxu1  ;;  %v2516_v40 = vor.u32 1.1754944e-38, %v2515_v30  ;;  %vm2514_vm4 = vcmp.eq.f32.partialorder %v2513_v34, 8.507059e+37 }
 0x9ab   : > { %v2493_v24 = vadd.f32 %v4265_v10, %v2492_v20 }
 0x9ad   : > { %v4353_v25 = vpop.eup %4352  ;;  %v2499_v23 = vmul.f32 1.442695, %v2493_v24 }
 0x9ae   : > { %v4355_v27 = vpop.eup %4354  ;;  %v2502_v2 = vadd.f32 2.0, %v4353_v25 }
 0x9af   : > { %v2505_v28 = vmul.f32 %v4355_v27, %v2501_v19  ;;  %4356 = vpow2.f32 %v2499_v23  ;;  %vm2510_vm1 = vweird.f32 %v4355_v27 }
 0x9b0   : > { %4358 = vrcp.f32 %v2502_v2  ;;  %vm2511_vm3 = vmor %vm2509_vm2, %vm2510_vm1  ;;  %v2530_v48 = vand.u32 2147483648, %v2502_v2  ;;  %v2528_v61 = vand.u32 2147483647, %v2502_v2  ;;  %vm2524_vm8 = vweird.f32 %v2502_v2 }
 0x9b1   : > { %v2506_v29 = vsub.f32 1.0, %v2505_v28 }
 0x9b2   : > { %v2531_v7 = vor.u32 1.1754944e-38, %v2530_v48  ;;  %vm2529_vm10 = vcmp.eq.f32.partialorder %v2528_v61, 8.507059e+37 }
 0x9b3   : > { %v2507_v32 = vmul.f32 %v4355_v27, %v2506_v29 }
 0x9b5   : > { %v4357_v35 = vpop.eup %4356  ;;  %v2508_v36 = vadd.f32 %v4355_v27, %v2507_v32 }
 0x9b6   : > { %v4359_v37 = vpop.eup %4358  ;;  %v2503_v41 = vadd.f32 2.0, %v4357_v35 }
 0x9b7   : > { %v2520_v39 = vmul.f32 %v4359_v37, %v2502_v2  ;;  %v2512_v43 = vsel %vm2511_vm3, %v4355_v27, %v2508_v36  ;;  %vm2525_vm7 = vweird.f32 %v4359_v37 }
 0x9b8   : > { %4360 = vrcp.f32 %v2503_v41  ;;  %v2517_v44 = vsel %vm2514_vm4, %v2516_v40, %v2512_v43  ;;  %vm2526_vm9 = vmor %vm2524_vm8, %vm2525_vm7  ;;  %v2545_v8 = vand.u32 2147483648, %v2503_v41  ;;  %v2543_v57 = vand.u32 2147483647, %v2503_v41  ;;  %v4049_v40 = vld [vmem:[%s6526_s5 + $0x78] sm:$0xff]  ;;  %v4046_v43 = vld [vmem:[%s6526_s5 + $0x60] sm:$0xff] }
 0x9b9   : > { %v2521_v3 = vsub.f32 1.0, %v2520_v39  ;;  %v2549_v45 = vsub.f32 1.0, %v2517_v44  ;;  %vm2539_vm12 = vweird.f32 %v2503_v41  ;;  %2722 = vmatpush.msra.mxu3 %v4049_v40  ;;  %v4047_v39 = vld [vmem:[%s6526_s5 + $0x68] sm:$0xff]  ;;  %v4060_v40 = vld [vmem:[%s6528_s7 + $0x1b0] sm:$0xff] }
 0x9ba   : > { %v2546_v12 = vor.u32 1.1754944e-38, %v2545_v8  ;;  %vm2544_vm1 = vcmp.eq.f32.partialorder %v2543_v57, 8.507059e+37  ;;  %v4267_v57 = vld [vmem:[%s6525_s4 + $0x3] ss:$0 sm:$0xff] }
 0x9bb   : > { %v2567_v51 = vmul.f32 %v2564_v22, %v2549_v45  ;;  %v2522_v33 = vmul.f32 %v4359_v37, %v2521_v3 }
 0x9bd   : > { %4041 = vmatmul.msk.f32.vlgmr.msra.gmra.mxu2 %vm1804_vm6, %v2567_v51  ;;  %v2523_v55 = vadd.f32 %v4359_v37, %v2522_v33 }
 0x9be   : > { %v4361_v58 = vpop.eup %4360 }
 0x9bf   : > { %v2535_v15 = vmul.f32 %v4361_v58, %v2503_v41  ;;  %v2527_v56 = vsel %vm2526_vm9, %v4359_v37, %v2523_v55  ;;  %vm2540_vm11 = vweird.f32 %v4361_v58  ;;  %v4048_v41 = vld [vmem:[%s6526_s5 + $0x70] sm:$0xff] }
 0x9c0   : > { %v2532_v42 = vsel %vm2529_vm10, %v2531_v7, %v2527_v56  ;;  %vm2541_vm13 = vmor %vm2539_vm12, %vm2540_vm11  ;;  %2723 = vmatpush.msra.mxu3 %v4048_v41 }
 0x9c1   : > { %v2536_v26 = vsub.f32 1.0, %v2535_v15  ;;  %v2550_v4 = vsub.f32 1.0, %v2532_v42 }
 0x9c2   : > { %2724 = vmatpush.msra.mxu3 %v4047_v39  ;;  %v4059_v39 = vld [vmem:[%s6528_s7 + $0x1a8] sm:$0xff] }
 0x9c3   : > { %v2568_v47 = vmul.f32 %v2565_v62, %v2550_v4  ;;  %v2537_v46 = vmul.f32 %v4361_v58, %v2536_v26  ;;  %v4266_v4 = vld [vmem:[%s6524_s3 + $0x3] ss:$0 sm:$0xff] }
 0x9c4   : > { %2725 = vmatpush.msra.mxu3 %v4046_v43  ;;  %v4053_v43 = vld [vmem:[%s6527_s6 + $0xc] sm:$0x7] }
 0x9c5   : > { %4042 = vmatmul.msk.f32.gmra.mxu2 %vm1804_vm6, %v2568_v47  ;;  %v2538_v10 = vadd.f32 %v4361_v58, %v2537_v46 }
 0x9c7   : > { %v2542_v49 = vsel %vm2541_vm13, %v4361_v58, %v2538_v10 }
 0x9c8   : > { %v2547_v13 = vsel %vm2544_vm1, %v2546_v12, %v2542_v49 }
 0x9c9   : > { %v2551_v60 = vsub.f32 1.0, %v2547_v13 }
 0x9cb   : > { %v2569_v14 = vmul.f32 %v2566_v6, %v2551_v60 }
 0x9cd   : > { %4043 = vmatmul.msk.f32.gmra.mxu2 %vm1804_vm6, %v2569_v14 }
 0xa40   : > { %v2605_v54 = vpop.f32.mrf.mxu2 }
 0xa41   : > { %v2606_v0 = vadd.f32 %v2605_v54, %v5947_v16 }
 0xa43   : > { %v2618_v17 = vsel %vm1434_vm0, %v2606_v0, 0.0 }
 0xa44   : > { %2619 = vadd.xlane.f32.xlu0 %v2618_v17 }
 0xa48   : > { %v2608_v18 = vpop.f32.mrf.mxu2 }
 0xa49   : > { %v6130_v19 = vadd.f32 %v2608_v18, %v5952_v21 }
 0xa4b   : > { %v2621_v20 = vsel %vm1434_vm0, %v6130_v19, 0.0 }
 0xa4c   : > { %2622 = vadd.xlane.f32.xlu2 %v2621_v20 }
 0xa50   : > { %v2611_v24 = vpop.f32.mrf.mxu2 }
 0xa51   : > { %v2612_v63 = vadd.f32 %v2611_v24, %v5957_v9 }
 0xa53   : > { %v2624_v25 = vsel %vm1434_vm0, %v2612_v63, 0.0 }
 0xa54   : > { %2625 = vadd.xlane.f32.xlu1 %v2624_v25 }
 0xab7   : > { %v2620_v23 = vpop.xlane.xlu0 %2619 }
 0xab8   : > { %v2627_v16 = vmul.f32 %v2620_v23, %v5572_v31 }
 0xaba   : > { %v2630_v27 = vsub.f32 %v2606_v0, %v2627_v16 }
 0xabc   : > { %v2633_v2 = vmul.f32 %v2630_v27, %v2630_v27 }
 0xabe   : > { %v2636_v28 = vsel %vm1434_vm0, %v2633_v2, 0.0  ;;  %v4069_v2 = vld [vmem:[%s6528_s7 + $0x1f8] sm:$0xff] }
 0xabf   : > { %v2623_v29 = vpop.xlane.xlu2 %2622  ;;  %2637 = vadd.xlane.f32.xlu0 %v2636_v28  ;;  %v4068_v28 = vld [vmem:[%s6528_s7 + $0x1f0] sm:$0xff]  ;;  %2856 = vmatpush.msra.mxu0 %v4069_v2 }
 0xac0   : > { %v2628_v21 = vmul.f32 %v2623_v29, %v5572_v31  ;;  %v4067_v29 = vld [vmem:[%s6528_s7 + $0x1e8] sm:$0xff] }
 0xac1   : > { %2857 = vmatpush.msra.mxu0 %v4068_v28 }
 0xac2   : > { %v2631_v30 = vsub.f32 %v6130_v19, %v2628_v21  ;;  %v4066_v21 = vld [vmem:[%s6528_s7 + $0x1e0] sm:$0xff] }
 0xac3   : > { %2858 = vmatpush.msra.mxu0 %v4067_v29 }
 0xac4   : > { %v2634_v32 = vmul.f32 %v2631_v30, %v2631_v30 }
 0xac5   : > { %2859 = vmatpush.msra.mxu0 %v4066_v21 }
 0xac6   : > { %v2639_v34 = vsel %vm1434_vm0, %v2634_v32, 0.0 }
 0xac7   : > { %2640 = vadd.xlane.f32.xlu2 %v2639_v34  ;;  %v2626_v9 = vpop.xlane.xlu1 %2625  ;;  %v4064_v34 = vld [vmem:[%s6528_s7 + $0x1d0] sm:$0xff] }
 0xac8   : > { %v2629_v35 = vmul.f32 %v2626_v9, %v5572_v31  ;;  %v4063_v9 = vld [vmem:[%s6528_s7 + $0x1c8] sm:$0xff] }
 0xaca   : > { %v6142_v36 = vsub.f32 %v2612_v63, %v2629_v35  ;;  %v4062_v35 = vld [vmem:[%s6528_s7 + $0x1c0] sm:$0xff] }
 0xacc   : > { %v2635_v37 = vmul.f32 %v6142_v36, %v6142_v36 }
 0xace   : > { %v2642_v38 = vsel %vm1434_vm0, %v2635_v37, 0.0 }
 0xacf   : > { %2643 = vadd.xlane.f32.xlu1 %v2642_v38 }
 0xb32   : > { %v2638_v44 = vpop.xlane.xlu0 %2637 }
 0xb33   : > { %v2645_v22 = vmul.f32 %v2638_v44, %v5572_v31 }
 0xb35   : > { %v2648_v3 = vadd.f32 1e-05, %v2645_v22 }
 0xb37   : > { %4362 = vrsqrt.f32 %v2648_v3  ;;  %vm2657_vm3 = vweird.f32 %v2648_v3 }
 0xb3a   : > { %v2641_v45 = vpop.xlane.xlu2 %2640 }
 0xb3b   : > { %v2646_v48 = vmul.f32 %v2641_v45, %v5572_v31  ;;  %v4057_v45 = vld [vmem:[%s6528_s7 + $0x198] sm:$0xff] }
 0xb3d   : > { %v4363_v51 = vpop.eup %4362  ;;  %v2649_v33 = vadd.f32 1e-05, %v2646_v48  ;;  %v2757_v48 = vperm.slane %v4053_v43, 1 }
 0xb3e   : > { %v2652_v61 = vmul.f32 %v4363_v51, %v2648_v3  ;;  %vm2658_vm2 = vweird.f32 %v4363_v51  ;;  %v4058_v3 = vld [vmem:[%s6528_s7 + $0x1a0] sm:$0xff] }
 0xb3f   : > { %4364 = vrsqrt.f32 %v2649_v33  ;;  %vm2659_vm4 = vmor %vm2657_vm3, %vm2658_vm2  ;;  %vm2667_vm8 = vweird.f32 %v2649_v33 }
 0xb40   : > { %v2653_v55 = vmul.f32 %v4363_v51, %v2652_v61 }
 0xb42   : > { %v2654_v58 = vmul.f32 0.5, %v2653_v55  ;;  %v2644_v59 = vpop.xlane.xlu1 %2643  ;;  %v4056_v55 = vld [vmem:[%s6528_s7 + $0x190] sm:$0xff] }
 0xb43   : > { %v2647_v7 = vmul.f32 %v2644_v59, %v5572_v31 }
 0xb44   : > { %v2655_v15 = vsub.f32 1.5, %v2654_v58 }
 0xb45   : > { %v4365_v56 = vpop.eup %4364  ;;  %v2650_v42 = vadd.f32 1e-05, %v2647_v7 }
 0xb46   : > { %v2656_v62 = vmul.f32 %v4363_v51, %v2655_v15  ;;  %v2662_v26 = vmul.f32 %v4365_v56, %v2649_v33  ;;  %vm2668_vm7 = vweird.f32 %v4365_v56  ;;  %v4055_v15 = vld [vmem:[%s6528_s7 + $0x188] sm:$0xff] }
 0xb47   : > { %4366 = vrsqrt.f32 %v2650_v42  ;;  %vm2669_vm9 = vmor %vm2667_vm8, %vm2668_vm7  ;;  %vm2677_vm11 = vweird.f32 %v2650_v42 }
 0xb48   : > { %v2660_v8 = vsel %vm2659_vm4, %v4363_v51, %v2656_v62  ;;  %v2663_v47 = vmul.f32 %v4365_v56, %v2662_v26  ;;  %v2764_v62 = vperm.slane %v4053_v43, 2 }
 0xb49   : > { %v2681_v46 = vmul.f32 %v2660_v8, %v2630_v27 }
 0xb4a   : > { %v2664_v10 = vmul.f32 0.5, %v2663_v47 }
 0xb4b   : > { %v2687_v11 = vmul.f32 %v4266_v4, %v2681_v46 }
 0xb4c   : > { %v2665_v12 = vsub.f32 1.5, %v2664_v10 }
 0xb4d   : > { %v4367_v49 = vpop.eup %4366  ;;  %v2693_v13 = vadd.f32 %v4267_v57, %v2687_v11 }
 0xb4e   : > { %v2666_v6 = vmul.f32 %v4365_v56, %v2665_v12  ;;  %v2672_v60 = vmul.f32 %v4367_v49, %v2650_v42  ;;  %vm2678_vm10 = vweird.f32 %v4367_v49 }
 0xb4f   : > { %4050 = vmatmul.msk.f32.vlgmr.msra.gmra.mxu3 %vm1434_vm0, %v2693_v13  ;;  %vm2679_vm12 = vmor %vm2677_vm11, %vm2678_vm10 }
 0xb50   : > { %v2670_v14 = vsel %vm2669_vm9, %v4365_v56, %v2666_v6  ;;  %v2673_v54 = vmul.f32 %v4367_v49, %v2672_v60 }
 0xb51   : > { %v2682_v0 = vmul.f32 %v2670_v14, %v2631_v30  ;;  %v4065_v30 = vld [vmem:[%s6528_s7 + $0x1d8] sm:$0xff] }
 0xb52   : > { %v2674_v17 = vmul.f32 0.5, %v2673_v54  ;;  %2860 = vmatpush.msra.mxu0 %v4065_v30 }
 0xb53   : > { %v2688_v18 = vmul.f32 %v4266_v4, %v2682_v0 }
 0xb54   : > { %v2675_v20 = vsub.f32 1.5, %v2674_v17  ;;  %2861 = vmatpush.msra.mxu0 %v4064_v34 }
 0xb55   : > { %v2694_v24 = vadd.f32 %v4267_v57, %v2688_v18 }
 0xb56   : > { %v2676_v63 = vmul.f32 %v4367_v49, %v2675_v20  ;;  %2862 = vmatpush.msra.mxu0 %v4063_v9  ;;  %v4054_v20 = vld [vmem:[%s6528_s7 + $0x180] sm:$0xff] }
 0xb57   : > { %4051 = vmatmul.msk.f32.gmra.mxu3 %vm1434_vm0, %v2694_v24 }
 0xb58   : > { %v2680_v25 = vsel %vm2679_vm12, %v4367_v49, %v2676_v63  ;;  %2863 = vmatpush.msra.mxu0 %v4062_v35 }
 0xb59   : > { %v2683_v23 = vmul.f32 %v2680_v25, %v6142_v36  ;;  %v4061_v36 = vld [vmem:[%s6528_s7 + $0x1b8] sm:$0xff] }
 0xb5a   : > { %2864 = vmatpush.msra.mxu0 %v4061_v36 }
 0xb5b   : > { %v2689_v16 = vmul.f32 %v4266_v4, %v2683_v23 }
 0xb5c   : > { %2865 = vmatpush.msra.mxu0 %v4060_v40 }
 0xb5d   : > { %v2695_v27 = vadd.f32 %v4267_v57, %v2689_v16 }
 0xb5e   : > { %2866 = vmatpush.msra.mxu0 %v4059_v39 }
 0xb5f   : > { %4052 = vmatmul.msk.f32.gmra.mxu3 %vm1434_vm0, %v2695_v27 }
 0xb60   : > { %2867 = vmatpush.msra.mxu0 %v4058_v3 }
 0xb62   : > { %2868 = vmatpush.msra.mxu0 %v4057_v45 }
 0xb64   : > { %2869 = vmatpush.msra.mxu0 %v4056_v55 }
 0xb66   : > { %2870 = vmatpush.msra.mxu0 %v4055_v15 }
 0xb68   : > { %2871 = vmatpush.msra.mxu0 %v4054_v20 }
 0xbd2   : > { %v2727_v32 = vpop.f32.mrf.mxu3 }
 0xbd3   : > { %v2736_v37 = vmul.f32 %v5646_v50, %v2727_v32  ;;  %v2753_v50 = vperm.slane %v4053_v43, 0 }
 0xbd5   : > { %v2741_v44 = vrot.slane %v2736_v37, 7  ;;  %v2747_v59 = vrot.slane %v2736_v37, 1  ;;  %v2758_v26 = vmul.f32 %v2757_v48, %v2736_v37 }
 0xbda   : > { %v2730_v38 = vpop.f32.mrf.mxu3 }
 0xbdb   : > { %v2737_v41 = vmul.f32 %v2730_v38, %v5651_v52 }
 0xbdd   : > { %v2742_v22 = vrot.slane %v2737_v41, 7  ;;  %v2748_v51 = vrot.slane %v2737_v41, 1  ;;  %v2759_v7 = vmul.f32 %v2757_v48, %v2737_v41 }
 0xbdf   : > { %v2745_v52 = vsel %vm1583_vm14, %v2741_v44, %v2742_v22  ;;  %v2751_v4 = vsel %vm1590_vm15, %v2747_v59, %v2748_v51 }
 0xbe0   : > { %v2755_v33 = vmul.f32 %v2753_v50, %v2745_v52  ;;  %v2765_v13 = vmul.f32 %v2764_v62, %v2751_v4 }
 0xbe2   : > { %v2733_v61 = vpop.f32.mrf.mxu3  ;;  %v2762_v8 = vadd.f32 %v2759_v7, %v2755_v33 }
 0xbe3   : > { %v2738_v58 = vmul.f32 %v5674_v5, %v2733_v61 }
 0xbe5   : > { %v2743_v56 = vrot.slane %v2738_v58, 7  ;;  %v2749_v42 = vrot.slane %v2738_v58, 1  ;;  %v2760_v12 = vmul.f32 %v2757_v48, %v2738_v58 }
 0xbe7   : > { %v2744_v47 = vsel %vm1583_vm14, %v2742_v22, %v2743_v56  ;;  %v2746_v5 = vsel %vm1583_vm14, %v2743_v56, %v2741_v44  ;;  %v2750_v46 = vsel %vm1590_vm15, %v2748_v51, %v2749_v42  ;;  %v2752_v57 = vsel %vm1590_vm15, %v2749_v42, %v2747_v59 }
 0xbe8   : > { %v2754_v10 = vmul.f32 %v2753_v50, %v2746_v5  ;;  %v2756_v11 = vmul.f32 %v2753_v50, %v2744_v47  ;;  %v2766_v49 = vmul.f32 %v2764_v62, %v2750_v46  ;;  %v2767_v54 = vmul.f32 %v2764_v62, %v2752_v57  ;;  %v4078_v57 = vld [vmem:[%s6530_s9 + $0xf8] sm:$0xff] }
 0xbe9   : > { %2983 = vmatpush.msra.mxu1 %v4078_v57 }
 0xbea   : > { %v2763_v6 = vadd.f32 %v2760_v12, %v2756_v11  ;;  %v2769_v60 = vadd.f32 %v2766_v49, %v2762_v8  ;;  %v2761_v14 = vadd.f32 %v2758_v26, %v2754_v10  ;;  %v4077_v10 = vld [vmem:[%s6530_s9 + $0xf0] sm:$0xff]  ;;  %v4076_v11 = vld [vmem:[%s6530_s9 + $0xe8] sm:$0xff]  ;;  %v4074_v12 = vld [vmem:[%s6530_s9 + $0xd8] sm:$0xff] }
 0xbeb   : > { %2984 = vmatpush.msra.mxu1 %v4077_v10  ;;  %v6279_v49 = vld [vmem:[%s6529_s8 + $0x3] ss:$0 sm:$0xff]  ;;  %v3022_v10 = vld [vmem:[%s6531_s10 + $0x8] sm:$0xff] }
 0xbec   : > { %v2772_v0 = vsub.f32 0.0, %v2769_v60  ;;  %v2768_v17 = vadd.f32 %v2765_v13, %v2761_v14  ;;  %v6235_v18 = vadd.f32 %v2767_v54, %v2763_v6  ;;  %v4073_v13 = vld [vmem:[%s6530_s9 + $0xd0] sm:$0xff]  ;;  %v4071_v54 = vld [vmem:[%s6530_s9 + $0xc0] sm:$0xff] }
 0xbed   : > { %2985 = vmatpush.msra.mxu1 %v4076_v11  ;;  %v3021_v11 = vld [vmem:[%s6531_s10] sm:$0xff] }
 0xbee   : > { %v2776_v53 = vmul.f32 1.442695, %v2772_v0  ;;  %v2771_v24 = vsub.f32 0.0, %v2768_v17  ;;  %v2773_v63 = vsub.f32 0.0, %v6235_v18 }
 0xbef   : > { %2986 = vmatpush.msra.mxu1 %v4075_v1 }
 0xbf0   : > { %4368 = vpow2.f32 %v2776_v53  ;;  %v2774_v25 = vmul.f32 1.442695, %v2771_v24  ;;  %v2778_v23 = vmul.f32 1.442695, %v2773_v63 }
 0xbf1   : > { %2987 = vmatpush.msra.mxu1 %v4074_v12 }
 0xbf2   : > { %4370 = vpow2.f32 %v2774_v25 }
 0xbf3   : > { %4372 = vpow2.f32 %v2778_v23  ;;  %2988 = vmatpush.msra.mxu1 %v4073_v13 }
 0xbf6   : > { %v4369_v16 = vpop.eup %4368 }
 0xbf7   : > { %v2781_v27 = vadd.f32 1.0, %v4369_v16 }
 0xbf8   : > { %v4371_v2 = vpop.eup %4370 }
 0xbf9   : > { %v4373_v28 = vpop.eup %4372  ;;  %4374 = vrcp.f32 %v2781_v27  ;;  %v2780_v29 = vadd.f32 1.0, %v4371_v2  ;;  %v2809_v36 = vand.u32 2147483648, %v2781_v27  ;;  %v2807_v40 = vand.u32 2147483647, %v2781_v27 }
 0xbfa   : > { %v2782_v21 = vadd.f32 1.0, %v4373_v28  ;;  %vm2803_vm15 = vweird.f32 %v2781_v27 }
 0xbfb   : > { %4376 = vrcp.f32 %v2780_v29  ;;  %v2794_v44 = vand.u32 2147483648, %v2780_v29  ;;  %v2810_v22 = vor.u32 1.1754944e-38, %v2809_v36  ;;  %v2792_v3 = vand.u32 2147483647, %v2780_v29 }
 0xbfc   : > { %4378 = vrcp.f32 %v2782_v21  ;;  %vm2808_vm2 = vcmp.eq.f32.partialorder %v2807_v40, 8.507059e+37  ;;  %vm2788_vm3 = vweird.f32 %v2780_v29  ;;  %v2824_v62 = vand.u32 2147483648, %v2782_v21 }
 0xbfd   : > { %v2795_v61 = vor.u32 1.1754944e-38, %v2794_v44  ;;  %vm2793_vm7 = vcmp.eq.f32.partialorder %v2792_v3, 8.507059e+37  ;;  %vm2818_vm9 = vweird.f32 %v2782_v21  ;;  %v2822_v26 = vand.u32 2147483647, %v2782_v21 }
 0xbfe   : > { %v2825_v8 = vor.u32 1.1754944e-38, %v2824_v62 }
 0xbff   : > { %v4375_v30 = vpop.eup %4374  ;;  %vm2823_vm11 = vcmp.eq.f32.partialorder %v2822_v26, 8.507059e+37 }
 0xc00   : > { %v2799_v32 = vmul.f32 %v4375_v30, %v2781_v27  ;;  %vm2804_vm14 = vweird.f32 %v4375_v30 }
 0xc01   : > { %v4377_v34 = vpop.eup %4376  ;;  %vm2805_vm13 = vmor %vm2803_vm15, %vm2804_vm14 }
 0xc02   : > { %v2800_v9 = vsub.f32 1.0, %v2799_v32  ;;  %v4379_v35 = vpop.eup %4378  ;;  %v2784_v37 = vmul.f32 %v4377_v34, %v2780_v29  ;;  %vm2789_vm1 = vweird.f32 %v4377_v34 }
 0xc03   : > { %v2814_v39 = vmul.f32 %v4379_v35, %v2782_v21  ;;  %vm2790_vm4 = vmor %vm2788_vm3, %vm2789_vm1  ;;  %vm2819_vm8 = vweird.f32 %v4379_v35 }
 0xc04   : > { %v2801_v38 = vmul.f32 %v4375_v30, %v2800_v9  ;;  %v2785_v41 = vsub.f32 1.0, %v2784_v37  ;;  %vm2820_vm10 = vmor %vm2818_vm9, %vm2819_vm8 }
 0xc05   : > { %v2815_v51 = vsub.f32 1.0, %v2814_v39 }
 0xc06   : > { %v2802_v43 = vadd.f32 %v4375_v30, %v2801_v38  ;;  %v2786_v50 = vmul.f32 %v4377_v34, %v2785_v41 }
 0xc07   : > { %v2816_v15 = vmul.f32 %v4379_v35, %v2815_v51 }
 0xc08   : > { %v2806_v52 = vsel %vm2805_vm13, %v4375_v30, %v2802_v43  ;;  %v2787_v48 = vadd.f32 %v4377_v34, %v2786_v50 }
 0xc09   : > { %v2811_v45 = vsel %vm2808_vm2, %v2810_v22, %v2806_v52  ;;  %v2817_v42 = vadd.f32 %v4379_v35, %v2816_v15 }
 0xc0a   : > { %v2829_v33 = vmul.f32 %v2811_v45, %v2769_v60  ;;  %v2791_v55 = vsel %vm2790_vm4, %v4377_v34, %v2787_v48  ;;  %v4072_v60 = vld [vmem:[%s6530_s9 + $0xc8] sm:$0xff] }
 0xc0b   : > { %v2796_v59 = vsel %vm2793_vm7, %v2795_v61, %v2791_v55  ;;  %v2821_v4 = vsel %vm2820_vm10, %v4379_v35, %v2817_v42  ;;  %2989 = vmatpush.msra.mxu1 %v4072_v60 }
 0xc0c   : > { %v6243_v58 = vsel %vm1431_vm5, %v2829_v33, %v2811_v45  ;;  %v2828_v7 = vmul.f32 %v2796_v59, %v2768_v17  ;;  %v2826_v47 = vsel %vm2823_vm11, %v2825_v8, %v2821_v4 }
 0xc0d   : > { %2944 = vrot.lane.b32.xlu2 %v6243_v58, %s4490_s22  ;;  %v2830_v5 = vmul.f32 %v2826_v47, %v6235_v18  ;;  %2990 = vmatpush.msra.mxu1 %v4071_v54 }
 0xc0e   : > { %v6249_v56 = vsel %vm1431_vm5, %v2828_v7, %v2796_v59 }
 0xc0f   : > { %2942 = vrot.lane.b32.xlu0 %v6249_v56, %s4490_s22  ;;  %2872 = vmatmul.f32.vlgmr.msra.gmra.mxu0 %v6249_v56  ;;  %v6258_v46 = vsel %vm1431_vm5, %v2830_v5, %v2826_v47  ;;  %v3023_v5 = vld [vmem:[%s6531_s10 + $0x10] sm:$0xff] }
 0xc17   : > { %2875 = vmatmul.f32.gmra.mxu0 %v6243_v58 }
 0xc1f   : > { %2878 = vmatmul.f32.gmra.mxu0 %v6258_v46 }
 0xc67   : > { %v2945_v50 = vpop.permute.xlu2 %2944 }
 0xc68   : > { %v2952_v48 = vmul.f32 %v2945_v50, %v6243_v58  ;;  %v4097_v50 = vld [vmem:[%s6533_s12 + $0x58] sm:$0xff] }
 0xc81   : > { %v2943_v32 = vpop.permute.xlu0 %2942 }
 0xc82   : > { %v2951_v37 = vmul.f32 %v2943_v32, %v6249_v56  ;;  %v3063_v32 = vld [vmem:[%s6533_s12 + $0x10] sm:$0xff] }
 0xc83   : > { %3089 = vmatpush.msrb.mxu3 %v3063_v32 }
 0xc8c   : > { %v2873_v6 = vpop.f32.mrf.mxu0 }
 0xc8d   : > { %v2874_v14 = vadd.f32 %v6279_v49, %v2873_v6 }
 0xc8f   : > { %v2882_v0 = vmul.f32 1.442695, %v2874_v14 }
 0xc91   : > { %4380 = vpow2.f32 %v2882_v0 }
 0xc94   : > { %v2876_v17 = vpop.f32.mrf.mxu0 }
 0xc95   : > { %v2877_v18 = vadd.f32 %v6279_v49, %v2876_v17 }
 0xc97   : > { %v4381_v20 = vpop.eup %4380  ;;  %v2884_v53 = vmul.f32 1.442695, %v2877_v18 }
 0xc98   : > { %v2888_v24 = vadd.f32 2.0, %v4381_v20 }
 0xc99   : > { %4382 = vpow2.f32 %v2884_v53 }
 0xc9a   : > { %4384 = vrcp.f32 %v2888_v24  ;;  %v2902_v2 = vand.u32 2147483648, %v2888_v24  ;;  %v2900_v29 = vand.u32 2147483647, %v2888_v24  ;;  %vm2896_vm12 = vweird.f32 %v2888_v24 }
 0xc9c   : > { %v2903_v34 = vor.u32 1.1754944e-38, %v2902_v2  ;;  %vm2901_vm15 = vcmp.eq.f32.partialorder %v2900_v29, 8.507059e+37  ;;  %v2879_v58 = vpop.f32.mrf.mxu0 }
 0xc9d   : > { %v2880_v4 = vadd.f32 %v6279_v49, %v2879_v58  ;;  %v4103_v58 = vld [vmem:[%s6533_s12 + $0x60] sm:$0xff] }
 0xc9f   : > { %v4383_v63 = vpop.eup %4382  ;;  %v2886_v8 = vmul.f32 1.442695, %v2880_v4  ;;  %v4106_v4 = vld [vmem:[%s6533_s12 + $0x78] sm:$0xff] }
 0xca0   : > { %v4385_v25 = vpop.eup %4384  ;;  %v2889_v23 = vadd.f32 2.0, %v4383_v63 }
 0xca1   : > { %v2892_v16 = vmul.f32 %v4385_v25, %v2888_v24  ;;  %vm2897_vm5 = vweird.f32 %v4385_v25 }
 0xca2   : > { %4386 = vrcp.f32 %v2889_v23  ;;  %vm2898_vm14 = vmor %vm2896_vm12, %vm2897_vm5  ;;  %v2917_v41 = vand.u32 2147483648, %v2889_v23  ;;  %v2915_v44 = vand.u32 2147483647, %v2889_v23  ;;  %vm2911_vm1 = vweird.f32 %v2889_v23 }
 0xca3   : > { %v2893_v27 = vsub.f32 1.0, %v2892_v16  ;;  %4388 = vpow2.f32 %v2886_v8  ;;  %v4104_v8 = vld [vmem:[%s6533_s12 + $0x68] sm:$0xff] }
 0xca4   : > { %v2918_v3 = vor.u32 1.1754944e-38, %v2917_v41  ;;  %vm2916_vm3 = vcmp.eq.f32.partialorder %v2915_v44, 8.507059e+37 }
 0xca5   : > { %v2894_v28 = vmul.f32 %v4385_v25, %v2893_v27 }
 0xca7   : > { %v2895_v21 = vadd.f32 %v4385_v25, %v2894_v28 }
 0xca8   : > { %v4387_v30 = vpop.eup %4386 }
 0xca9   : > { %v2907_v9 = vmul.f32 %v4387_v30, %v2889_v23  ;;  %v2899_v35 = vsel %vm2898_vm14, %v4385_v25, %v2895_v21  ;;  %vm2912_vm13 = vweird.f32 %v4387_v30  ;;  %v4389_v47 = vpop.eup %4388 }
 0xcaa   : > { %v2904_v36 = vsel %vm2901_vm15, %v2903_v34, %v2899_v35  ;;  %vm2913_vm2 = vmor %vm2911_vm1, %vm2912_vm13  ;;  %v2890_v57 = vadd.f32 2.0, %v4389_v47  ;;  %v3064_v34 = vld [vmem:[%s6533_s12 + $0x18] sm:$0xff]  ;;  %v4269_v35 = vld [vmem:[%s6532_s11] ss:$0 sm:$0xff] }
 0xcab   : > { %v2908_v38 = vsub.f32 1.0, %v2907_v9  ;;  %v2936_v40 = vsub.f32 1.0, %v2904_v36  ;;  %v3061_v9 = vld [vmem:[%s6533_s12] sm:$0xff]  ;;  %v4133_v47 = vld [vmem:[%s6533_s12 + $0xd8] sm:$0xff] }
 0xcac   : > { %4390 = vrcp.f32 %v2890_v57  ;;  %v2932_v53 = vand.u32 2147483648, %v2890_v57  ;;  %vm2926_vm7 = vweird.f32 %v2890_v57  ;;  %v2930_v24 = vand.u32 2147483647, %v2890_v57  ;;  %3090 = vmatpush.msrb.mxu3 %v3061_v9 }
 0xcad   : > { %v2954_v39 = vmul.f32 %v2951_v37, %v2936_v40  ;;  %v2909_v43 = vmul.f32 %v4387_v30, %v2908_v38 }
 0xcae   : > { %vm2931_vm5 = vcmp.eq.f32.partialorder %v2930_v24, 8.507059e+37 }
 0xcaf   : > { %4079 = vmatmul.msk.f32.vlgmr.msra.gmra.mxu1 %vm1804_vm6, %v2954_v39  ;;  %v2910_v22 = vadd.f32 %v4387_v30, %v2909_v43 }
 0xcb1   : > { %v2914_v52 = vsel %vm2913_vm2, %v4387_v30, %v2910_v22  ;;  %v4096_v22 = vld [vmem:[%s6533_s12 + $0x50] sm:$0xff] }
 0xcb2   : > { %v2919_v45 = vsel %vm2916_vm3, %v2918_v3, %v2914_v52  ;;  %v4391_v1 = vpop.eup %4390  ;;  %v4094_v3 = vld [vmem:[%s6533_s12 + $0x40] sm:$0xff]  ;;  %3206 = vmatpush.msrb.mxu1 %v4096_v22  ;;  %v4095_v52 = vld [vmem:[%s6533_s12 + $0x48] sm:$0xff] }
 0xcb3   : > { %v2937_v51 = vsub.f32 1.0, %v2919_v45  ;;  %v2922_v13 = vmul.f32 %v4391_v1, %v2890_v57  ;;  %vm2927_vm4 = vweird.f32 %v4391_v1  ;;  %v4130_v57 = vld [vmem:[%s6533_s12 + $0xc0] sm:$0xff] }
 0xcb4   : > { %vm2928_vm9 = vmor %vm2926_vm7, %vm2927_vm4  ;;  %3207 = vmatpush.msrb.mxu1 %v4094_v3  ;;  %v4089_v22 = vld [vmem:[%s6534_s13 + $0x2] sm:$0x3] }
 0xcb5   : > { %v2955_v33 = vmul.f32 %v2952_v48, %v2937_v51  ;;  %v2923_v60 = vsub.f32 1.0, %v2922_v13  ;;  %v3126_v3 = vperm.slane %v4089_v22, 1 }
 0xcb7   : > { %4080 = vmatmul.msk.f32.gmra.mxu1 %vm1804_vm6, %v2955_v33  ;;  %v2924_v54 = vmul.f32 %v4391_v1, %v2923_v60  ;;  %v4122_v60 = vld [vmem:[%s6533_s12 + $0xa8] sm:$0xff] }
 0xcb9   : > { %v2925_v18 = vadd.f32 %v4391_v1, %v2924_v54  ;;  %v4142_v54 = vld [vmem:[%s6533_s12 + $0xf8] sm:$0xff] }
 0xcbb   : > { %v2929_v25 = vsel %vm2928_vm9, %v4391_v1, %v2925_v18  ;;  %v4140_v18 = vld [vmem:[%s6533_s12 + $0xe8] sm:$0xff] }
 0xd2c   : > { %v2992_v61 = vpop.f32.mrf.mxu1 }
 0xd2d   : > { %v4114_v61 = vld [vmem:[%s6533_s12 + $0x90] sm:$0xff] }
 0xd2e   : > { %3324 = vmatpush.msra.mxu1 %v4114_v61  ;;  %v3125_v61 = vperm.slane %v4089_v22, 0 }
 0xd34   : > { %v2994_v55 = vpop.f32.mrf.mxu1 }
 0xd35   : > { %v2995_v59 = vadd.f32 %v2994_v55, %v6130_v19  ;;  %v3024_v19 = vld [vmem:[%s6531_s10 + $0x18] sm:$0xff] }
 0xd36   : > { %3044 = vmatpush.msrb.mxu2 %v3024_v19  ;;  %v4115_v55 = vld [vmem:[%s6533_s12 + $0x98] sm:$0xff]  ;;  %v4132_v19 = vld [vmem:[%s6533_s12 + $0xd0] sm:$0xff] }
 0xd37   : > { %v2999_v7 = vsel %vm1434_vm0, %v2995_v59, 0.0 }
 0xd38   : > { %3000 = vadd.xlane.f32.xlu1 %v2999_v7  ;;  %3045 = vmatpush.msrb.mxu2 %v3023_v5  ;;  %v4112_v7 = vld [vmem:[%s6533_s12 + $0x80] sm:$0xff] }
 0xd39   : > { %3325 = vmatpush.msra.mxu1 %v4112_v7 }
 0xd3a   : > { %3046 = vmatpush.msrb.mxu2 %v3022_v10  ;;  %v4131_v10 = vld [vmem:[%s6533_s12 + $0xc8] sm:$0xff] }
 0xd3c   : > { %3047 = vmatpush.msrb.mxu2 %v3021_v11 }
 0xd3e   : > { %3109 = vmatpush.msra.mxu2 %v3064_v34 }
 0xdab   : > { %v3001_v15 = vpop.xlane.xlu1 %3000 }
 0xdac   : > { %v3002_v56 = vmul.f32 %v3001_v15, %v5572_v31  ;;  %v4113_v15 = vld [vmem:[%s6533_s12 + $0x88] sm:$0xff] }
 0xdae   : > { %v3003_v42 = vsub.f32 %v2995_v59, %v3002_v56  ;;  %v4088_v59 = vld [vmem:[%s6533_s12 + $0x38] sm:$0xff]  ;;  %v4087_v56 = vld [vmem:[%s6533_s12 + $0x30] sm:$0xff] }
 0xdaf   : > { %3167 = vmatpush.msrb.mxu0 %v4088_v59  ;;  %3147 = vmatpush.msra.mxu3 %v4087_v56 }
 0xdb0   : > { %v3004_v62 = vmul.f32 %v3003_v42, %v3003_v42 }
 0xdb2   : > { %v3005_v26 = vsel %vm1434_vm0, %v3004_v62, 0.0  ;;  %v4085_v62 = vld [vmem:[%s6533_s12 + $0x20] sm:$0xff] }
 0xdb3   : > { %3006 = vadd.xlane.f32.xlu1 %v3005_v26  ;;  %3148 = vmatpush.msra.mxu3 %v4085_v62  ;;  %v4105_v26 = vld [vmem:[%s6533_s12 + $0x70] sm:$0xff] }
 0xdcc   : > { %2946 = vrot.lane.b32.xlu1 %v6258_v46, %s4490_s22 }
 0xe26   : > { %v3007_v12 = vpop.xlane.xlu1 %3006 }
 0xe27   : > { %v3008_v49 = vmul.f32 %v3007_v12, %v5572_v31  ;;  %v2933_v31 = vor.u32 1.1754944e-38, %v2932_v53  ;;  %v4123_v12 = vld [vmem:[%s6533_s12 + $0xb0] sm:$0xff] }
 0xe29   : > { %v3009_v6 = vadd.f32 1e-05, %v3008_v49  ;;  %v2934_v27 = vsel %vm2931_vm5, %v2933_v31, %v2929_v25  ;;  %v4124_v49 = vld [vmem:[%s6533_s12 + $0xb8] sm:$0xff] }
 0xe2a   : > { %v2938_v29 = vsub.f32 1.0, %v2934_v27 }
 0xe2b   : > { %4392 = vrsqrt.f32 %v3009_v6  ;;  %vm3016_vm10 = vweird.f32 %v3009_v6 }
 0xe31   : > { %v4393_v14 = vpop.eup %4392 }
 0xe32   : > { %v3011_v0 = vmul.f32 %v4393_v14, %v3009_v6  ;;  %vm3017_vm8 = vweird.f32 %v4393_v14  ;;  %v4121_v6 = vld [vmem:[%s6533_s12 + $0xa0] sm:$0xff] }
 0xe33   : > { %vm3018_vm11 = vmor %vm3016_vm10, %vm3017_vm8 }
 0xe34   : > { %v3012_v17 = vmul.f32 %v4393_v14, %v3011_v0 }
 0xe36   : > { %v3013_v20 = vmul.f32 0.5, %v3012_v17  ;;  %v4139_v17 = vld [vmem:[%s6533_s12 + $0xe0] sm:$0xff] }
 0xe38   : > { %v3014_v63 = vsub.f32 1.5, %v3013_v20  ;;  %v3065_v20 = vld [vmem:[%s6534_s13] sm:$0x3] }
 0xe39   : > { %v3067_v53 = vperm.slane %v3065_v20, 0  ;;  %v3068_v24 = vperm.slane %v3065_v20, 1 }
 0xe3a   : > { %v3015_v23 = vmul.f32 %v4393_v14, %v3014_v63 }
 0xe3c   : > { %v3019_v16 = vsel %vm3018_vm11, %v4393_v14, %v3015_v23  ;;  %v4141_v14 = vld [vmem:[%s6533_s12 + $0xf0] sm:$0xff] }
 0xe3d   : > { %v3020_v2 = vmul.f32 %v3019_v16, %v3003_v42  ;;  %v4086_v42 = vld [vmem:[%s6533_s12 + $0x28] sm:$0xff] }
 0xe3e   : > { %v2947_v28 = vpop.permute.xlu1 %2946  ;;  %3168 = vmatpush.msrb.mxu0 %v4086_v42  ;;  %v4125_v42 = vld [vmem:[%s6534_s13 + $0xa] sm:$0x3] }
 0xe3f   : > { %v2953_v21 = vmul.f32 %v2947_v28, %v6258_v46  ;;  %4082 = vmatmul.msk.f32.vlgmr.msrb.gmra.mxu2 %vm1434_vm0, %v3020_v2  ;;  %v3062_v46 = vld [vmem:[%s6533_s12 + $0x8] sm:$0xff]  ;;  %vm3071_vm0 = vcmask 130048   ;;  %v4098_v2 = vld [vmem:[%s6534_s13 + $0x4] sm:$0x3] }
 0xe40   : > { %3110 = vmatpush.msra.mxu2 %v3062_v46  ;;  %3285 = vmatpush.msra.mxu0 %v4106_v4  ;;  %v3184_v28 = vperm.slane %v4098_v2, 0  ;;  %v3185_v32 = vperm.slane %v4098_v2, 1 }
 0xe41   : > { %v2956_v30 = vmul.f32 %v2953_v21, %v2938_v29 }
 0xe42   : > { %3226 = vmatpush.msrb.mxu2 %v4097_v50  ;;  %3286 = vmatpush.msra.mxu0 %v4104_v8 }
 0xe43   : > { %4081 = vmatmul.msk.f32.gmra.mxu1 %vm1804_vm6, %v2956_v30  ;;  %v4116_v30 = vld [vmem:[%s6534_s13 + $0x8] sm:$0x3] }
 0xe44   : > { %3227 = vmatpush.msrb.mxu2 %v4095_v52  ;;  %v3302_v34 = vperm.slane %v4116_v30, 0 }
 0xec0   : > { %v2997_v36 = vpop.f32.mrf.mxu1 }
 0xec2   : > { %v3049_v37 = vpop.f32.mrf.mxu2 }
 0xec3   : > { %v3050_v38 = vadd.f32 %v4269_v35, %v3049_v37  ;;  %v4134_v37 = vld [vmem:[%s6534_s13 + $0xc] sm:$0x3] }
 0xec4   : > { %v3421_v50 = vperm.slane %v4134_v37, 1 }
 0xec5   : > { %v3053_v40 = vmul.f32 0.044715, %v3050_v38  ;;  %v3052_v48 = vmul.f32 0.5, %v3050_v38 }
 0xec7   : > { %v3054_v41 = vmul.f32 %v3053_v40, %v3050_v38  ;;  %v3420_v40 = vperm.slane %v4134_v37, 0 }
 0xec9   : > { %v3055_v39 = vmul.f32 %v3054_v41, %v3050_v38 }
 0xecb   : > { %v3056_v43 = vadd.f32 %v3055_v39, %v3050_v38  ;;  %v3303_v38 = vperm.slane %v4116_v30, 1 }
 0xecd   : > { %v3057_v44 = vmul.f32 0.7978846, %v3056_v43 }
 0xecf   : > { %4394 = vtanh.f32 %v3057_v44 }
 0xed5   : > { %v4395_v45 = vpop.eup %4394 }
 0xed6   : > { %v3059_v51 = vadd.f32 1.0, %v4395_v45 }
 0xed8   : > { %v3060_v33 = vmul.f32 %v3059_v51, %v3052_v48 }
 0xeda   : > { %3188 = vrot.lane.b32.xlu2 %v3060_v33, %s4491_s24  ;;  %3129 = vrot.lane.b32.xlu0 %v3060_v33, %s4492_s28  ;;  %s3637_s28 = sshll.u32 %s483_s20, 7  ;;  %s4419_s24 = scalar_lea.hbm %s6535_s14, 256 }
 0xedb   : > { %4083 = vmatmul.msk.f32.vlgmr.msrb.gmra.mxu3 %vm3071_vm0, %v3060_v33  ;;  %4084 = vmatmul.msk.f32.vlgmr.msra.gmra.mxu2 %vm3071_vm0, %v3060_v33 }
 0xedc   : > { %3344 = vmatpush.msra.mxu2 %v4115_v55  ;;  %3265 = vmatpush.msrb.mxu3 %v4105_v26  ;;  %v3362_v26 = vperm.slane %v4125_v42, 1 }
 0xede   : > { %3345 = vmatpush.msra.mxu2 %v4113_v15  ;;  %3266 = vmatpush.msrb.mxu3 %v4103_v58 }
 0xee2   : > { %3306 = vrot.lane.b32.xlu2 %v3060_v33, %s4490_s22  ;;  %3247 = vrot.lane.b32.xlu0 %v3060_v33, %s4493_s0  ;;  %s6440_s0 = scalar_lea.vmem [#allocation2], %s3637_s28  ;;  %s3544_s28 = scalar_lea.hbm %s6535_s14, %s4153_s19 }
 0xeea   : > { %3424 = vrot.lane.b32.xlu2 %v3060_v33, %s4494_s21  ;;  %3365 = vrot.lane.b32.xlu0 %v3060_v33, %s4495_s17  ;;  %s3545_s21 = sshll.u32 %s6440_s0, 4  ;;  %s3547_s17 = sshll.u32 %s3544_s28, 4  ;;  %s3546_s21 = int_to_ptr.vmem [resolvable:$true] %s3545_s21  ;;  %s3548_s17 = int_to_ptr.hbm [resolvable:$true] %s3547_s17 }
 0xeeb   : > { %s4413_s15 = sshra.s32 %s3548_s17, 4  ;;  %s4414_s15 = int_to_ptr.hbm [resolvable:$true] %s4413_s15 }
 0xeec   : > { %s4415_s27 = scalar_lea.hbm %s4414_s15, 128  ;;  %p4420_p1 = scmp.lt.s32.totalorder %s4414_s15, %s6535_s14 }
 0xeed   : > { %p4416_p12 = scmp.ne.s32.totalorder %s4414_s15, %s4415_s27  ;;  %p4421_p2 = scmp.lt.s32.totalorder %s4419_s24, %s4415_s27 }
 0xeef   : > { %p4417_p13 = pnand %p4416_p12, %p4613_p4  ;;  %p4422_p3 = por %p4421_p2, %p4420_p1 }
 0xef1   : > { %p4418_p0 = pneg %p4417_p13 }
 0xef2   : > { %3483 = vrot.lane.b32.xlu0 %v3060_v33, %s4496_s26  ;;  %v4107_v33 = vld [vmem:[%s6534_s13 + $0x6] sm:$0x3] }
 0xef3   : > { %v3244_v55 = vperm.slane %v4107_v33, 1  ;;  %v3243_v62 = vperm.slane %v4107_v33, 0  ;;  %p4423_p5 = pnand %p4422_p3, %p4418_p0 }
 0xf34   : > { %v3189_v5 = vpop.permute.xlu2 %3188 }
 0xf35   : > { %4099 = vmatmul.msk.f32.vlgmr.msrb.gmra.mxu1 %vm3071_vm0, %v3189_v5  ;;  %4100 = vmatmul.msk.f32.vlgmr.msrb.gmra.mxu2 %vm3071_vm0, %v3189_v5  ;;  %v3361_v5 = vperm.slane %v4125_v42, 0 }
 0xf36   : > { %3442 = vmatpush.msrb.mxu1 %v4132_v19  ;;  %3462 = vmatpush.msrb.mxu2 %v4133_v47  ;;  %v4143_v47 = vld [vmem:[%s6534_s13 + $0xe] sm:$0x3] }
 0xf38   : > { %3443 = vmatpush.msrb.mxu1 %v4130_v57  ;;  %3463 = vmatpush.msrb.mxu2 %v4131_v10  ;;  %v3480_v57 = vperm.slane %v4143_v47, 1 }
 0xf3c   : > { %v3307_v11 = vpop.permute.xlu2 %3306 }
 0xf3d   : > { %4117 = vmatmul.msk.f32.vlgmr.msra.gmra.mxu1 %vm3071_vm0, %v3307_v11  ;;  %4118 = vmatmul.msk.f32.vlgmr.msra.gmra.mxu2 %vm3071_vm0, %v3307_v11 }
 0xf44   : > { %v3425_v1 = vpop.permute.xlu2 %3424 }
 0xf45   : > { %4135 = vmatmul.msk.f32.vlgmr.msrb.gmra.mxu1 %vm3071_vm0, %v3425_v1  ;;  %4136 = vmatmul.msk.f32.vlgmr.msrb.gmra.mxu2 %vm3071_vm0, %v3425_v1 }
 0xf4c   : > { %v3130_v13 = vpop.permute.xlu0 %3129 }
 0xf4d   : > { %4090 = vmatmul.msk.f32.vlgmr.msra.gmra.mxu3 %vm3071_vm0, %v3130_v13  ;;  %4091 = vmatmul.msk.f32.vlgmr.msrb.gmra.mxu0 %vm3071_vm0, %v3130_v13 }
 0xf4e   : > { %3383 = vmatpush.msra.mxu3 %v4123_v12  ;;  %3403 = vmatpush.msrb.mxu0 %v4124_v49  ;;  %v3479_v49 = vperm.slane %v4143_v47, 0 }
 0xf50   : > { %3384 = vmatpush.msra.mxu3 %v4121_v6  ;;  %3404 = vmatpush.msrb.mxu0 %v4122_v60 }
 0xf54   : > { %v3248_v0 = vpop.permute.xlu0 %3247 }
 0xf55   : > { %4108 = vmatmul.msk.f32.vlgmr.msrb.gmra.mxu3 %vm3071_vm0, %v3248_v0  ;;  %4109 = vmatmul.msk.f32.vlgmr.msra.gmra.mxu0 %vm3071_vm0, %v3248_v0 }
 0xf56   : > { %3501 = vmatpush.msrb.mxu3 %v4141_v14  ;;  %3521 = vmatpush.msra.mxu0 %v4142_v54 }
 0xf58   : > { %3502 = vmatpush.msrb.mxu3 %v4139_v17  ;;  %3522 = vmatpush.msra.mxu0 %v4140_v18 }
 0xf5c   : > { %v3366_v63 = vpop.permute.xlu0 %3365 }
 0xf5d   : > { %4126 = vmatmul.msk.f32.vlgmr.msra.gmra.mxu3 %vm3071_vm0, %v3366_v63  ;;  %4127 = vmatmul.msk.f32.vlgmr.msrb.gmra.mxu0 %vm3071_vm0, %v3366_v63 }
 0xf5e   : > { %v3092_v25 = vpop.f32.mrf.mxu3  ;;  %v3112_v23 = vpop.f32.mrf.mxu2 }
 0xf5f   : > { %v3093_v31 = vadd.f32 %v3092_v25, %v3067_v53  ;;  %v3113_v16 = vadd.f32 %v3112_v23, %v3068_v24 }
 0xf61   : > { %3115 = vst [vmem:[%s6440_s0] sm:$0xff] %v3093_v31 }
 0xf62   : > { %3116 = vst [vmem:[%s6440_s0 + $0x8] sm:$0xff] %v3113_v16 }
 0xf64   : > { %v3484_v27 = vpop.permute.xlu0 %3483 }
 0xf65   : > { %4144 = vmatmul.msk.f32.vlgmr.msrb.gmra.mxu3 %vm3071_vm0, %v3484_v27  ;;  %4145 = vmatmul.msk.f32.vlgmr.msra.gmra.mxu0 %vm3071_vm0, %v3484_v27 }
 0xfb2   : > { %v3209_v29 = vpop.f32.mrf.mxu1 }
 0xfb3   : > { %v3210_v21 = vadd.f32 %v3209_v29, %v3184_v28 }
 0xfb5   : > { %4101 = vst [vmem:[%s6440_s0 + $0x20] sm:$0xff] %v3210_v21 }
 0xfb8   : > { %v3229_v9 = vpop.f32.mrf.mxu2 }
 0xfb9   : > { %v3230_v46 = vadd.f32 %v3229_v9, %v3185_v32 }
 0xfba   : > { %v3327_v35 = vpop.f32.mrf.mxu1 }
 0xfbb   : > { %4102 = vst [vmem:[%s6440_s0 + $0x28] sm:$0xff] %v3230_v46  ;;  %v3328_v36 = vadd.f32 %v3327_v35, %v3302_v34 }
 0xfbd   : > { %4119 = vst [vmem:[%s6440_s0 + $0x40] sm:$0xff] %v3328_v36 }
 0xfc0   : > { %v3347_v41 = vpop.f32.mrf.mxu2 }
 0xfc1   : > { %v3348_v39 = vadd.f32 %v3347_v41, %v3303_v38 }
 0xfc2   : > { %v3445_v43 = vpop.f32.mrf.mxu1 }
 0xfc3   : > { %4120 = vst [vmem:[%s6440_s0 + $0x48] sm:$0xff] %v3348_v39  ;;  %v3446_v44 = vadd.f32 %v3445_v43, %v3420_v40 }
 0xfc5   : > { %4137 = vst [vmem:[%s6440_s0 + $0x60] sm:$0xff] %v3446_v44 }
 0xfc8   : > { %v3465_v52 = vpop.f32.mrf.mxu2 }
 0xfc9   : > { %v3466_v45 = vadd.f32 %v3465_v52, %v3421_v50 }
 0xfca   : > { %v3170_v48 = vpop.f32.mrf.mxu0 }
 0xfcb   : > { %4138 = vst [vmem:[%s6440_s0 + $0x68] sm:$0xff] %v3466_v45  ;;  %v3171_v51 = vadd.f32 %v3170_v48, %v3126_v3 }
 0xfcd   : > { %4093 = vst [vmem:[%s6440_s0 + $0x18] sm:$0xff] %v3171_v51 }
 0xfd0   : > { %v3150_v59 = vpop.f32.mrf.mxu3 }
 0xfd1   : > { %v3151_v7 = vadd.f32 %v3150_v59, %v3125_v61 }
 0xfd2   : > { %v3288_v15 = vpop.f32.mrf.mxu0 }
 0xfd3   : > { %4092 = vst [vmem:[%s6440_s0 + $0x10] sm:$0xff] %v3151_v7  ;;  %v3289_v56 = vadd.f32 %v3288_v15, %v3244_v55 }
 0xfd5   : > { %4111 = vst [vmem:[%s6440_s0 + $0x38] sm:$0xff] %v3289_v56 }
 0xfd8   : > { %v3268_v58 = vpop.f32.mrf.mxu3 }
 0xfd9   : > { %v3269_v4 = vadd.f32 %v3268_v58, %v3243_v62 }
 0xfda   : > { %v3406_v8 = vpop.f32.mrf.mxu0 }
 0xfdb   : > { %4110 = vst [vmem:[%s6440_s0 + $0x30] sm:$0xff] %v3269_v4  ;;  %v3407_v19 = vadd.f32 %v3406_v8, %v3362_v26 }
 0xfdd   : > { %4129 = vst [vmem:[%s6440_s0 + $0x58] sm:$0xff] %v3407_v19 }
 0xfe0   : > { %v3386_v10 = vpop.f32.mrf.mxu3 }
 0xfe1   : > { %v3387_v11 = vadd.f32 %v3386_v10, %v3361_v5 }
 0xfe2   : > { %v3524_v1 = vpop.f32.mrf.mxu0 }
 0xfe3   : > { %4128 = vst [vmem:[%s6440_s0 + $0x50] sm:$0xff] %v3387_v11  ;;  %v3525_v12 = vadd.f32 %v3524_v1, %v3480_v57 }
 0xfe5   : > { %4147 = vst [vmem:[%s6440_s0 + $0x78] sm:$0xff] %v3525_v12 }
 0xfe8   : > { %v3504_v13 = vpop.f32.mrf.mxu3 }
 0xfe9   : > { %v3505_v6 = vadd.f32 %v3504_v13, %v3479_v49 }
 0xfeb   : > { %4146 = vst [vmem:[%s6440_s0 + $0x70] sm:$0xff] %v3505_v6 }
 0xfec   : > { %4426 = shalt.err (!%p4423_p5)
}
 0xfed   : > { %s4497_s20 = smov 256  }
 0xfee   : > { %4155 = dma.vmem_to_hbm [thread:$0]  (%p4613_p4), %s3546_s21, 2048, %s3548_s17, %s3531_s16, %s4497_s20, %s4497_s20, %s4496_s26  }
 0xfef PF: > { %p4161_p6 = scmp.ge.s32.totalorder %s4477_s18, 2  ;;  %s3562_s25 = sand.u32 1, %s4457_s29  }
 0xff0   : > { %s3563_s19 = scalar_lea.sflag [#allocation3], %s3562_s25 }
 0xff1   : > { %p4158_p7 = pnand %p4161_p6, %p4620_p8 }
 0xff3   : > { %p4159_p9 = pneg %p4158_p7 }
 0xff5   : > { %4452 = dma.done.wait (%p4159_p9), %s3563_s19, 2048  }
 0xff6   : > { %4454 = vsyncadd (%p4159_p9), %s3563_s19, 4294965248  ;;  %s27_s18 = sadd.s32 1, %s4477_s18   ;;  %s6550_s15 = sld [smem:[#allocation5_spill]] }
 0xff7   : > { %p24_p10 = scmp.ge.s32.totalorder %s27_s18, 4   ;;  %s6551_s23 = sld [smem:[#allocation9_spill]] }
 0xff8   : > { %s6552_s16 = sld [smem:[#allocation6_spill]]  ;;  %s6554_s29 = smov %s4461_s30 }
 0xff9   : > { %s6553_s17 = sld [smem:[#allocation7_spill]]  ;;  %26 = sbr.rel (!%p24_p10) target bundleno = 6 (0x6), region = 164 }
 0xffc   : > { %s6555_s30 = smov %s6550_s15 }
 0xffd   : > { %s6556_s15 = smov %s6551_s23 }
 0xffe   :  { %3569 = vsyncpa [#allocation3], 1 }
 0xfff   :  { %3571 = vsyncpa [#allocation3 + $0x1], 1 }

</bundles_post_ra>
